<compile_context>
chip_gen: v5e
topology: v5e:2x2
jax: 0.10.0
libtpu: 0.0.40
codegen_flags: <defaults>
</compile_context>

<pallas_src>
import jax
import jax.numpy as jnp
from jax.experimental import pallas as pl
from jax.experimental.pallas import tpu as pltpu


def _leaky_relu(x, slope=0.1):
    return jnp.where(x > 0, x, slope * x)


def panet_kernel(x_ref,
                 w1_ref, b1_ref,
                 w2_ref, b2_ref,
                 w3_ref, b3_ref,
                 w4_ref, b4_ref,
                 o_ref):
    # x_ref : (512, TP) f32 tile (channels on sublanes, pixels on lanes).
    #         Cast to bf16 in-kernel so HBM only sees one f32 read (no
    #         separate wrapper-side cast pass over the dominant stream).
    # w*_ref: (Cout, Cin) bf16, grid-invariant (resident across the grid).
    # b*_ref: (Cout, 1)  f32.
    x = x_ref[...].astype(jnp.bfloat16)

    h = jnp.dot(w1_ref[...], x, preferred_element_type=jnp.float32) + b1_ref[...]
    h = _leaky_relu(h).astype(jnp.bfloat16)              # PANet.conv1 + leaky_relu

    h = jnp.dot(w2_ref[...], h, preferred_element_type=jnp.float32) + b2_ref[...]
    h = _leaky_relu(h).astype(jnp.bfloat16)              # PANet.conv2 + leaky_relu

    h = jnp.dot(w3_ref[...], h, preferred_element_type=jnp.float32) + b3_ref[...]
    h = _leaky_relu(h).astype(jnp.bfloat16)              # DetectionHead.conv1 + leaky_relu

    h = jnp.dot(w4_ref[...], h, preferred_element_type=jnp.float32) + b4_ref[...]
    o_ref[...] = h.astype(o_ref.dtype)                   # DetectionHead.conv2 (no activation)


def _pick_tile(P, N, cap=2048):
    """Largest multiple of 128 that divides P, capped.  When N == 1, cap at
    P//2 so the 'parallel' pixel axis keeps >= 2 steps (v7x megacore)."""
    limit = min(P, cap)
    if N == 1 and P >= 256:
        limit = min(limit, P // 2)
    best = 0
    for t in range(128, limit + 1, 128):
        if P % t == 0:
            best = t
    if best == 0:
        # No 128-multiple divides P: fall back to the full extent.  Correct
        # (block == full array dim); only the trailing lanes store masked.
        best = P
    return best


def _vmem_estimate_bytes(tp, c_out):
    """Rough per-call VMEM footprint (double-buffered tiles + intermediates)."""
    x_buf = 2 * 512 * tp * 4                      # f32 input tile, double-buffered
    o_buf = 2 * max(c_out, 8) * tp * 4            # output tile, double-buffered
    inter = tp * (512 * 2 + 256 * 6 + 128 * 6 + 64 * 6)  # bf16 x + f32/bf16 hidden
    wts = 2 * 2 * (512 * 256 + 256 * 128 + 128 * 64 + 64 * c_out)
    return x_buf + o_buf + inter + wts + (1 << 20)


def panet_forward(x_nchw, prepped_params, *, tp=None, out_dtype=jnp.float32):
    """x_nchw: (N, 512, H, W) float32.
    prepped_params: output of prepare_params (bf16 weights, f32 (Cout,1) biases).
    Returns (N, num_classes+5, H, W) in out_dtype."""
    N, C_in, H, W = x_nchw.shape
    assert C_in == 512
    w1, b1, w2, b2, w3, b3, w4, b4 = prepped_params
    c_out = w4.shape[0]

    P = H * W
    if tp is None:
        tp = _pick_tile(P, N)
    tp = min(tp, P)
    assert P % tp == 0, (P, tp)

    # NCHW -> (N, C, P): pure reshape, no transpose, no dtype cast.
    x3d = x_nchw.reshape(N, C_in, P)

    # Grid-invariant operands (full-array blocks, constant index map).
    def weight_spec(a):
        return pl.BlockSpec(a.shape, lambda n, p: (0, 0))

    M = N * P
    layer_mac = 512 * 256 + 256 * 128 + 128 * 64 + 64 * c_out
    flops = 2 * M * layer_mac
    bytes_accessed = (M * C_in * 4                       # f32 activation read
                      + M * c_out * jnp.dtype(out_dtype).itemsize  # output write
                      + 2 * layer_mac                    # bf16 weights
                      + 4 * (256 + 128 + 64 + c_out))    # f32 biases

    vmem_limit = int(min(max(2 * _vmem_estimate_bytes(tp, c_out), 32 * 1024 * 1024),
                         48 * 1024 * 1024))

    out3d = pl.pallas_call(
        panet_kernel,
        out_shape=jax.ShapeDtypeStruct((N, c_out, P), out_dtype),
        grid_spec=pltpu.PrefetchScalarGridSpec(
            num_scalar_prefetch=0,
            grid=(N, P // tp),
            in_specs=[
                pl.BlockSpec((None, C_in, tp), lambda n, p: (n, 0, p)),  # x tile
                weight_spec(w1), weight_spec(b1),
                weight_spec(w2), weight_spec(b2),
                weight_spec(w3), weight_spec(b3),
                weight_spec(w4), weight_spec(b4),
            ],
            out_specs=pl.BlockSpec((None, c_out, tp), lambda n, p: (n, 0, p)),
        ),
        compiler_params=pltpu.CompilerParams(
            dimension_semantics=("parallel", "parallel"),
            vmem_limit_bytes=vmem_limit),
        cost_estimate=pl.CostEstimate(
            flops=flops, transcendentals=0, bytes_accessed=bytes_accessed),
    )(x3d, w1, b1, w2, b2, w3, b3, w4, b4)

    # (N, c_out, P) -> NCHW: again a pure reshape.
    return out3d.reshape(N, c_out, H, W)


def init_params(num_classes, key):
    """Deterministic synthetic f32 weights. 1x1 conv weight (Cout, Cin, 1, 1)
    is stored as (Cout, Cin); bias as (Cout, 1)."""
    dims = [(512, 256), (256, 128), (128, 64), (64, num_classes + 5)]
    params = []
    for i, (cin, cout) in enumerate(dims):
        kw, kb = jax.random.split(jax.random.fold_in(key, i))
        w = jax.random.normal(kw, (cout, cin), jnp.float32) * (1.0 / jnp.sqrt(cin))
        b = jax.random.normal(kb, (cout, 1), jnp.float32) * 0.01
        params += [w, b]
    return tuple(params)


def prepare_params(params):
    """One-time cast of matmul weights to bf16 (biases stay f32)."""
    w1, b1, w2, b2, w3, b3, w4, b4 = params
    bf = lambda w: w.astype(jnp.bfloat16)
    return (bf(w1), b1, bf(w2), b2, bf(w3), b3, bf(w4), b4)


def panet_reference(x_nchw, params):
    """f32 reference mirroring the PyTorch forward (1x1 convs as matmuls)."""
    w1, b1, w2, b2, w3, b3, w4, b4 = params
    N, C, H, W = x_nchw.shape
    h = x_nchw.reshape(N, C, H * W)
    mm = lambda w, a: jnp.einsum('oc,ncp->nop', w, a)
    h = _leaky_relu(mm(w1, h) + b1[None])
    h = _leaky_relu(mm(w2, h) + b2[None])
    h = _leaky_relu(mm(w3, h) + b3[None])
    h = mm(w4, h) + b4[None]
    return h.reshape(N, -1, H, W)


def panet_reference_bf16(x_nchw, params):
    """Reference mirroring the kernel's bf16-operand / f32-accumulate math."""
    w1, b1, w2, b2, w3, b3, w4, b4 = params
    N, C, H, W = x_nchw.shape
    h = x_nchw.reshape(N, C, H * W).astype(jnp.bfloat16)

    def layer(w, b, a, act):
        y = jnp.einsum('oc,ncp->nop', w.astype(jnp.bfloat16), a,
                       preferred_element_type=jnp.float32) + b[None]
        return _leaky_relu(y).astype(jnp.bfloat16) if act else y

    h = layer(w1, b1, h, True)
    h = layer(w2, b2, h, True)
    h = layer(w3, b3, h, True)
    h = layer(w4, b4, h, False)
    return h.reshape(N, -1, H, W)


if __name__ == "__main__":
    key = jax.random.PRNGKey(0)
    num_classes = 3                       # output channels = num_classes + 5 = 8
    N, H, W = 2, 16, 16                   # P = 256 pixels/image
    kx, kp = jax.random.split(key)

    x = jax.random.normal(kx, (N, 512, H, W), jnp.float32)
    params = init_params(num_classes, kp)
    prepped = prepare_params(params)      # one-time bf16 weight cast

    out = panet_forward(x, prepped)       # auto tile -> tp=256, grid=(2, 1)
    out = jax.block_until_ready(out)

    assert out.shape == (N, num_classes + 5, H, W), out.shape

    # Tight check against a reference that mirrors the kernel's bf16/f32 math.
    ref_bf16 = panet_reference_bf16(x, params)
    assert jnp.allclose(out, ref_bf16, atol=1e-2, rtol=1e-2), \
        float(jnp.max(jnp.abs(out - ref_bf16)))

    # Looser check against the pure-f32 PyTorch-equivalent reference
    # (difference is bf16 operand rounding only; accumulation stays f32).
    ref_f32 = panet_reference(x, params)
    assert jnp.allclose(out, ref_f32, atol=1e-1, rtol=1e-1), \
        float(jnp.max(jnp.abs(out - ref_f32)))

    print("KERNEL_OK")
</pallas_src>

<mosaic_0001>
module attributes {stable_mosaic.version = 11 : i64} {
  func.func @panet_kernel(%arg0: i32, %arg1: i32, %arg2: memref<1x512x256xf32, #tpu.memory_space<vmem>>, %arg3: memref<256x512xbf16, #tpu.memory_space<vmem>>, %arg4: memref<256x1xf32, #tpu.memory_space<vmem>>, %arg5: memref<128x256xbf16, #tpu.memory_space<vmem>>, %arg6: memref<128x1xf32, #tpu.memory_space<vmem>>, %arg7: memref<64x128xbf16, #tpu.memory_space<vmem>>, %arg8: memref<64x1xf32, #tpu.memory_space<vmem>>, %arg9: memref<8x64xbf16, #tpu.memory_space<vmem>>, %arg10: memref<8x1xf32, #tpu.memory_space<vmem>>, %arg11: memref<1x8x256xf32, #tpu.memory_space<vmem>>) attributes {dimension_semantics = [#tpu.dimension_semantics<parallel>, #tpu.dimension_semantics<parallel>], iteration_bounds = array<i64: 2, 1>, scalar_prefetch = 0 : i64, scratch_operands = 0 : i64, tpu.core_type = #tpu.core_type<tc>, window_params = [{transform_indices = @transform_0, window_bounds = array<i64: 1, 512, 256>}, {pipeline_mode = #tpu.pipeline_mode<synchronous>, transform_indices = @transform_1, window_bounds = array<i64: 256, 512>}, {pipeline_mode = #tpu.pipeline_mode<synchronous>, transform_indices = @transform_2, window_bounds = array<i64: 256, 1>}, {pipeline_mode = #tpu.pipeline_mode<synchronous>, transform_indices = @transform_3, window_bounds = array<i64: 128, 256>}, {pipeline_mode = #tpu.pipeline_mode<synchronous>, transform_indices = @transform_4, window_bounds = array<i64: 128, 1>}, {pipeline_mode = #tpu.pipeline_mode<synchronous>, transform_indices = @transform_5, window_bounds = array<i64: 64, 128>}, {pipeline_mode = #tpu.pipeline_mode<synchronous>, transform_indices = @transform_6, window_bounds = array<i64: 64, 1>}, {pipeline_mode = #tpu.pipeline_mode<synchronous>, transform_indices = @transform_7, window_bounds = array<i64: 8, 64>}, {pipeline_mode = #tpu.pipeline_mode<synchronous>, transform_indices = @transform_8, window_bounds = array<i64: 8, 1>}, {transform_indices = @transform_9, window_bounds = array<i64: 1, 8, 256>}]} {
    %c0 = arith.constant 0 : index
    %c0_0 = arith.constant 0 : index
    %c0_1 = arith.constant 0 : index
    %0 = vector.load %arg2[%c0, %c0_0, %c0_1] : memref<1x512x256xf32, #tpu.memory_space<vmem>>, vector<1x512x256xf32>
    %1 = vector.shape_cast %0 : vector<1x512x256xf32> to vector<512x256xf32>
    %2 = arith.truncf %1 : vector<512x256xf32> to vector<512x256xbf16>
    %c0_2 = arith.constant 0 : index
    %c0_3 = arith.constant 0 : index
    %3 = vector.load %arg3[%c0_2, %c0_3] : memref<256x512xbf16, #tpu.memory_space<vmem>>, vector<256x512xbf16>
    %cst = arith.constant dense<0.000000e+00> : vector<256x256xf32>
    %4 = tpu.matmul %3, %2, %cst {dimension_numbers = #tpu.dot_dimension_numbers<[1], [0], [0], [1], [0, 0, 1, 1], [], []>} : vector<256x512xbf16>, vector<512x256xbf16>, vector<256x256xf32> -> vector<256x256xf32>
    %c0_4 = arith.constant 0 : index
    %c0_5 = arith.constant 0 : index
    %5 = vector.load %arg4[%c0_4, %c0_5] : memref<256x1xf32, #tpu.memory_space<vmem>>, vector<256x1xf32>
    %6 = vector.broadcast %5 : vector<256x1xf32> to vector<256x256xf32>
    %7 = arith.addf %4, %6 : vector<256x256xf32>
    %cst_6 = arith.constant 0.000000e+00 : f32
    %8 = vector.broadcast %cst_6 : f32 to vector<256x256xf32>
    %9 = arith.cmpf ogt, %7, %8 : vector<256x256xf32>
    %cst_7 = arith.constant 1.000000e-01 : f32
    %10 = vector.broadcast %cst_7 : f32 to vector<256x256xf32>
    %11 = arith.mulf %10, %7 : vector<256x256xf32>
    %12 = arith.select %9, %7, %11 : vector<256x256xi1>, vector<256x256xf32>
    %13 = arith.truncf %12 : vector<256x256xf32> to vector<256x256xbf16>
    %c0_8 = arith.constant 0 : index
    %c0_9 = arith.constant 0 : index
    %14 = vector.load %arg5[%c0_8, %c0_9] : memref<128x256xbf16, #tpu.memory_space<vmem>>, vector<128x256xbf16>
    %cst_10 = arith.constant dense<0.000000e+00> : vector<128x256xf32>
    %15 = tpu.matmul %14, %13, %cst_10 {dimension_numbers = #tpu.dot_dimension_numbers<[1], [0], [0], [1], [0, 0, 1, 1], [], []>} : vector<128x256xbf16>, vector<256x256xbf16>, vector<128x256xf32> -> vector<128x256xf32>
    %c0_11 = arith.constant 0 : index
    %c0_12 = arith.constant 0 : index
    %16 = vector.load %arg6[%c0_11, %c0_12] : memref<128x1xf32, #tpu.memory_space<vmem>>, vector<128x1xf32>
    %17 = vector.broadcast %16 : vector<128x1xf32> to vector<128x256xf32>
    %18 = arith.addf %15, %17 : vector<128x256xf32>
    %cst_13 = arith.constant 0.000000e+00 : f32
    %19 = vector.broadcast %cst_13 : f32 to vector<128x256xf32>
    %20 = arith.cmpf ogt, %18, %19 : vector<128x256xf32>
    %cst_14 = arith.constant 1.000000e-01 : f32
    %21 = vector.broadcast %cst_14 : f32 to vector<128x256xf32>
    %22 = arith.mulf %21, %18 : vector<128x256xf32>
    %23 = arith.select %20, %18, %22 : vector<128x256xi1>, vector<128x256xf32>
    %24 = arith.truncf %23 : vector<128x256xf32> to vector<128x256xbf16>
    %c0_15 = arith.constant 0 : index
    %c0_16 = arith.constant 0 : index
    %25 = vector.load %arg7[%c0_15, %c0_16] : memref<64x128xbf16, #tpu.memory_space<vmem>>, vector<64x128xbf16>
    %cst_17 = arith.constant dense<0.000000e+00> : vector<64x256xf32>
    %26 = tpu.matmul %25, %24, %cst_17 {dimension_numbers = #tpu.dot_dimension_numbers<[1], [0], [0], [1], [0, 0, 1, 1], [], []>} : vector<64x128xbf16>, vector<128x256xbf16>, vector<64x256xf32> -> vector<64x256xf32>
    %c0_18 = arith.constant 0 : index
    %c0_19 = arith.constant 0 : index
    %27 = vector.load %arg8[%c0_18, %c0_19] : memref<64x1xf32, #tpu.memory_space<vmem>>, vector<64x1xf32>
    %28 = vector.broadcast %27 : vector<64x1xf32> to vector<64x256xf32>
    %29 = arith.addf %26, %28 : vector<64x256xf32>
    %cst_20 = arith.constant 0.000000e+00 : f32
    %30 = vector.broadcast %cst_20 : f32 to vector<64x256xf32>
    %31 = arith.cmpf ogt, %29, %30 : vector<64x256xf32>
    %cst_21 = arith.constant 1.000000e-01 : f32
    %32 = vector.broadcast %cst_21 : f32 to vector<64x256xf32>
    %33 = arith.mulf %32, %29 : vector<64x256xf32>
    %34 = arith.select %31, %29, %33 : vector<64x256xi1>, vector<64x256xf32>
    %35 = arith.truncf %34 : vector<64x256xf32> to vector<64x256xbf16>
    %c0_22 = arith.constant 0 : index
    %c0_23 = arith.constant 0 : index
    %36 = vector.load %arg9[%c0_22, %c0_23] : memref<8x64xbf16, #tpu.memory_space<vmem>>, vector<8x64xbf16>
    %cst_24 = arith.constant dense<0.000000e+00> : vector<8x256xf32>
    %37 = tpu.matmul %36, %35, %cst_24 {dimension_numbers = #tpu.dot_dimension_numbers<[1], [0], [0], [1], [0, 0, 1, 1], [], []>} : vector<8x64xbf16>, vector<64x256xbf16>, vector<8x256xf32> -> vector<8x256xf32>
    %c0_25 = arith.constant 0 : index
    %c0_26 = arith.constant 0 : index
    %38 = vector.load %arg10[%c0_25, %c0_26] : memref<8x1xf32, #tpu.memory_space<vmem>>, vector<8x1xf32>
    %39 = vector.broadcast %38 : vector<8x1xf32> to vector<8x256xf32>
    %40 = arith.addf %37, %39 : vector<8x256xf32>
    %c0_27 = arith.constant 0 : index
    %c0_28 = arith.constant 0 : index
    %c0_29 = arith.constant 0 : index
    %41 = vector.load %arg11[%c0_27, %c0_28, %c0_29] : memref<1x8x256xf32, #tpu.memory_space<vmem>>, vector<1x8x256xf32>
    %42 = vector.shape_cast %41 : vector<1x8x256xf32> to vector<8x256xf32>
    %43 = vector.shape_cast %40 : vector<8x256xf32> to vector<1x8x256xf32>
    tpu.vector_store %arg11[%c0_27, %c0_28, %c0_29], %43 {strides = array<i32>} : memref<1x8x256xf32, #tpu.memory_space<vmem>>, vector<1x8x256xf32>,
    return
  }
  func.func @transform_0(%arg0: i32, %arg1: i32) -> (i32, i32, i32) {
    %c0_i32 = arith.constant 0 : i32
    %c0_i32_0 = arith.constant 0 : i32
    return %arg0, %c0_i32, %arg1 : i32, i32, i32
  }
  func.func @transform_1(%arg0: i32, %arg1: i32) -> (i32, i32) {
    %c0_i32 = arith.constant 0 : i32
    %c0_i32_0 = arith.constant 0 : i32
    %c0_i32_1 = arith.constant 0 : i32
    return %c0_i32, %c0_i32_0 : i32, i32
  }
  func.func @transform_2(%arg0: i32, %arg1: i32) -> (i32, i32) {
    %c0_i32 = arith.constant 0 : i32
    %c0_i32_0 = arith.constant 0 : i32
    %c0_i32_1 = arith.constant 0 : i32
    return %c0_i32, %c0_i32_0 : i32, i32
  }
  func.func @transform_3(%arg0: i32, %arg1: i32) -> (i32, i32) {
    %c0_i32 = arith.constant 0 : i32
    %c0_i32_0 = arith.constant 0 : i32
    %c0_i32_1 = arith.constant 0 : i32
    return %c0_i32, %c0_i32_0 : i32, i32
  }
  func.func @transform_4(%arg0: i32, %arg1: i32) -> (i32, i32) {
    %c0_i32 = arith.constant 0 : i32
    %c0_i32_0 = arith.constant 0 : i32
    %c0_i32_1 = arith.constant 0 : i32
    return %c0_i32, %c0_i32_0 : i32, i32
  }
  func.func @transform_5(%arg0: i32, %arg1: i32) -> (i32, i32) {
    %c0_i32 = arith.constant 0 : i32
    %c0_i32_0 = arith.constant 0 : i32
    %c0_i32_1 = arith.constant 0 : i32
    return %c0_i32, %c0_i32_0 : i32, i32
  }
  func.func @transform_6(%arg0: i32, %arg1: i32) -> (i32, i32) {
    %c0_i32 = arith.constant 0 : i32
    %c0_i32_0 = arith.constant 0 : i32
    %c0_i32_1 = arith.constant 0 : i32
    return %c0_i32, %c0_i32_0 : i32, i32
  }
  func.func @transform_7(%arg0: i32, %arg1: i32) -> (i32, i32) {
    %c0_i32 = arith.constant 0 : i32
    %c0_i32_0 = arith.constant 0 : i32
    %c0_i32_1 = arith.constant 0 : i32
    return %c0_i32, %c0_i32_0 : i32, i32
  }
  func.func @transform_8(%arg0: i32, %arg1: i32) -> (i32, i32) {
    %c0_i32 = arith.constant 0 : i32
    %c0_i32_0 = arith.constant 0 : i32
    %c0_i32_1 = arith.constant 0 : i32
    return %c0_i32, %c0_i32_0 : i32, i32
  }
  func.func @transform_9(%arg0: i32, %arg1: i32) -> (i32, i32, i32) {
    %c0_i32 = arith.constant 0 : i32
    %c0_i32_0 = arith.constant 0 : i32
    return %arg0, %c0_i32, %arg1 : i32, i32, i32
  }
}

</mosaic_0001>

<bundles_post_ra>
// kernel: tpu_custom_call.1
= control target key start
LH: loop header
LB: loop body
LE: loop exit
PB: predicated region body
PF: predicated region fallthrough
CT: control target
= control target key end

     0   :  { %s5106_s0 = inlined_call_operand.hbm [shape: f32[2,512,256], index: 0, kind: input, shape index: {}]   ;;  %s5107_s1 = inlined_call_operand.hbm [shape: bf16[256,512], index: 1, kind: input, shape index: {}]   ;;  %s5108_s2 = inlined_call_operand.vmem [shape: f32[256,1], index: 2, kind: input, shape index: {}]   ;;  %s5109_s3 = inlined_call_operand.vmem [shape: bf16[128,256], index: 3, kind: input, shape index: {}]   ;;  %s5110_s4 = inlined_call_operand.vmem [shape: f32[128,1], index: 4, kind: input, shape index: {}]   ;;  %s5111_s5 = inlined_call_operand.vmem [shape: bf16[64,128], index: 5, kind: input, shape index: {}]   ;;  %s5112_s6 = inlined_call_operand.vmem [shape: f32[64,1], index: 6, kind: input, shape index: {}]   ;;  %s5113_s7 = inlined_call_operand.vmem [shape: bf16[8,64], index: 7, kind: input, shape index: {}]   ;;  %s5114_s8 = inlined_call_operand.vmem [shape: f32[8,1], index: 8, kind: input, shape index: {}]   ;;  %s5115_s9 = inlined_call_operand.hbm [shape: f32[2,8,256], index: 9, kind: output, shape index: {}]  }
   0x1   :  { %5211 = sst [smem:[#allocation93_spill]] %s5107_s1 }
   0x2   :  { %5212 = sst [smem:[#allocation94_spill]] %s5115_s9 }
   0x3   :  { %14 = vsyncpa [#allocation3], 0 }
   0x4   :  { %16 = vsyncpa [#allocation3 + $0x1], 0 }
   0x5   :  { %17 = vsyncpa [#allocation6], 0 }
   0x6   :  { %18 = vsyncpa [#allocation4], 0 }
   0x7   :  { %20 = vsyncpa [#allocation4 + $0x1], 0  ;;  %s3679_s30 = smov 0   ;;  %s3681_s10 = smov 0  }
   0x8   :  { %s3683_s11 = smov 0   ;;  %s3685_s12 = smov 0  }
   0x9   :  { %s3687_s13 = smov 0   ;;  %s3689_s14 = smov 0  }
   0xa LB: > { %5213 = sst [smem:[#allocation11_spill]] %s3603_s30  ;;  %s2941_s15 = sadd.s32 4294967295, %s3623_s14   ;;  %s3623_s14 = sphi %s3689_s14, %s26_s14   ;;  %s3619_s13 = sphi %s3687_s13, %s5427_s13   ;;  %s3615_s12 = sphi %s3685_s12, %s5426_s12   ;;  %s3611_s11 = sphi %s3683_s11, %s5425_s11   ;;  %s3607_s10 = sphi %s3681_s10, %s5424_s10   ;;  %s3603_s30 = sphi %s3679_s30, %s5423_s30  }
   0xb   : > { %5214 = sst [smem:[#allocation12_spill]] %s3623_s14  ;;  %s2942_s16 = sadd.s32 4294967294, %s3623_s14  }
   0xc   : > { %p60_p0 = scmp.ne.s32.totalorder %s3607_s10, %s3603_s30  ;;  %p3713_p1 = scmp.eq.s32.totalorder %s2941_s15, 0 }
   0xd   : > { %p3717_p2 = scmp.eq.s32.totalorder %s2941_s15, 1  ;;  %p260_p3 = scmp.eq.s32.totalorder %s2942_s16, 1 }
   0xe   : > { %p3723_p4 = por %p3713_p1, %p60_p0  ;;  %p2943_p5 = scmp.ge.s32.totalorder %s3623_s14, 1 }
   0xf   : > { %p3728_p6 = por %p260_p3, %p60_p0  ;;  %p267_p7 = scmp.lt.s32.totalorder %s3623_s14, 3 }
  0x10   : > { %s5220_s1 = sld [smem:[#allocation93_spill]]  ;;  %s3625_s25 = smov [#allocation5]  }
  0x11   : > { %s5218_s20 = scalar_select %p3728_p6, 1, 0 }
  0x12   : > { %p3736_p8 = pnand %p2943_p5, %p267_p7  ;;  %s280_s26 = sshll.u32 %s3625_s25, 4  ;;  %s281_s26 = int_to_ptr.vmem [resolvable:$true] %s280_s26 }
  0x13   : > { %5219 = sst [smem:[#allocation13_spill]] %s5218_s20  ;;  %p2945_p11 = scmp.ge.s32.totalorder %s3623_s14, 2 }
  0x14   : > { %p3406_p9 = pneg %p3736_p8  ;;  %s5116_s27 = smov 256  }
  0x15   : > { %s5117_s28 = smov 16   ;;  %s38_s29 = sadd.s32 1, %s3619_s13 }
  0x16   : > { %s278_s23 = sshll.u32 %s5220_s1, 4  ;;  %p3407_p10 = pnand %p3406_p9, %p3713_p1  ;;  %s279_s23 = int_to_ptr.hbm [resolvable:$true] %s278_s23 }
  0x17   : > { %p40_p12 = scmp.ge.s32.totalorder %s38_s29, 2  ;;  %s47_s15 = sadd.s32 1, %s3611_s11 }
  0x18   : > { %3409 = dma.hbm_to_vmem [thread:$0]  (!%p3407_p10), %s279_s23, 8192, %s281_s26, [#allocation6], %s5116_s27, %s5116_s27, %s5117_s28  }
  0x19   : > { %p54_p13 = scmp.ne.s32.totalorder %s3611_s11, %s3607_s10  ;;  %p55_p0 = scmp.eq.s32.totalorder %s3623_s14, 0 }
  0x1a   : > { %s5429_s29 = smov (%p40_p12, %s38_s29), 0  ;;  %p3419_p7 = scmp.lt.s32.totalorder %s3623_s14, 2 }
  0x1b   : > { %5222 = sst [smem:[#allocation14_spill]] %s5429_s29  ;;  %p3755_p3 = por %p55_p0, %p54_p13 }
  0x1c   : > { %p3761_p5 = por %p3717_p2, %p54_p13  ;;  %s42_s22 = ssub.s32 %s3619_s13, %s5429_s29 }
  0x1d   : > { %p45_p9 = scmp.eq.s32.totalorder %s42_s22, 0  ;;  %s315_s23 = sand.u32 1, %s3611_s11  }
  0x1e   : > { %s5224_s21 = scalar_select %p3761_p5, 1, 0 }
  0x1f   : > { %s2946_s25 = sshll.u32 %s315_s23, 10  ;;  %s3296_s27 = sshll.u32 %s3619_s13, 10 }
  0x20   : > { %5225 = sst [smem:[#allocation15_spill]] %s5224_s21  ;;  %s326_s20 = scalar_lea.hbm %s5106_s0, %s3296_s27 }
  0x21   : > { %s3770_s26 = scalar_select %p45_p9, %s3611_s11, %s47_s15  }
  0x22   : > { %s319_s30 = scalar_lea.vmem [#allocation2], %s2946_s25  ;;  %s327_s18 = sshll.u32 %s326_s20, 4  ;;  %s328_s18 = int_to_ptr.hbm [resolvable:$true] %s327_s18 }
  0x23   : > { %s329_s9 = sshll.u32 %s319_s30, 4  ;;  %p3411_p2 = pnand %p3419_p7, %p3755_p3  ;;  %s330_s9 = int_to_ptr.vmem [resolvable:$true] %s329_s9 }
  0x24   : > { %s316_s21 = scalar_lea.sflag [#allocation3], %s315_s23  ;;  %s5226_s29 = smov 16  }
  0x25   : > { %s5227_s14 = smov 256   ;;  %341 = sbr.rel (%p3736_p8) target bundleno = 1378 (0x562), region = 56 }
  0x26   : > { %3413 = dma.hbm_to_vmem [thread:$0]  (!%p3411_p2), %s328_s18, 16384, %s330_s9, %s316_s21, %s5227_s14, %s5227_s14, %s5226_s29  }
  0x2a   : > { %s3784_s15 = sand.u32 1, %s3607_s10  }
  0x2b   : > { %s2950_s1 = sshll.u32 %s3784_s15, 10  ;;  %s344_s30 = scalar_lea.sflag [#allocation3], %s3784_s15 }
  0x2c   : > { %s3788_s20 = scalar_lea.vmem [#allocation2], %s2950_s1 }
  0x2d   : > { %3590 = dma.done.wait (%p3723_p4), %s344_s30, 16384  }
  0x2e   : > { %3592 = vsyncadd (%p3723_p4), %s344_s30, 4294950912 }
  0x2f   : > { %3594 = dma.done.wait (%p3713_p1), [#allocation6], 8192  }
  0x30   : > { %3596 = vsyncadd (%p3713_p1), [#allocation6], 4294959104  ;;  %v3628_v0 = vmov 0   ;;  %v677_v1 = vld [vmem:[%s5108_s2 + $0xf0] sm:$0xff]  ;;  %v419_v3 = vld [vmem:[%s3788_s20 + $0xe0] sm:$0xff]  ;;  %s2952_s17 = sshll.u32 %s3784_s15, 4 }
  0x31   : > { %3475 = vset.pattern.permute.xlu1 %v3628_v0  ;;  %3474 = vset.pattern.permute.xlu0 %v3628_v0  ;;  %v661_v2 = vld [vmem:[%s5108_s2 + $0x70] sm:$0xff]  ;;  %v451_v5 = vld [vmem:[%s3788_s20 + $0x1e0] sm:$0xff]  ;;  %v678_v27 = vld [vmem:[%s5108_s2 + $0xf8] sm:$0xff]  ;;  %s5056_s27 = scalar_lea.vmem [#allocation7], %s2952_s17  ;;  %s3381_s29 = sshll.u32 %s3615_s12, 4 }
  0x32   : > { %3476 = vset.pattern.permute.xlu2 %v3628_v0  ;;  %831 = vperm.xlu1 %3475, %v677_v1   ;;  %v421_v4 = vld [vmem:[%s3788_s20 + $0xf0] sm:$0xff]  ;;  %v483_v9 = vld [vmem:[%s3788_s20 + $0x2e0] sm:$0xff]  ;;  %v662_v28 = vld [vmem:[%s5108_s2 + $0x78] sm:$0xff]  ;;  %s5418_s22 = sld [smem:[#allocation94_spill]]  ;;  %s2844_s25 = sshll.u32 %s5056_s27, 4  ;;  %s2845_s25 = int_to_ptr.vmem [resolvable:$true] %s2844_s25 }
  0x33   : > { %751 = vperm.xlu0 %3474, %v661_v2   ;;  %v453_v6 = vld [vmem:[%s3788_s20 + $0x1f0] sm:$0xff]  ;;  %v533_v7 = vpack.c.bf16 %v421_v4, %v419_v3  ;;  %v515_v11 = vld [vmem:[%s3788_s20 + $0x3e0] sm:$0xff]  ;;  %v660_v41 = vld [vmem:[%s5108_s2 + $0x68] sm:$0xff]  ;;  %s2829_s1 = scalar_lea.sflag [#allocation4], %s3784_s15 }
  0x34   : > { %v549_v8 = vpack.c.bf16 %v453_v6, %v451_v5  ;;  %v485_v10 = vld [vmem:[%s3788_s20 + $0x2f0] sm:$0xff]  ;;  %v659_v14 = vld [vmem:[%s5108_s2 + $0x60] sm:$0xff]  ;;  %v676_v53 = vld [vmem:[%s5108_s2 + $0xe8] sm:$0xff] }
  0x35   : > { %v565_v12 = vpack.c.bf16 %v485_v10, %v483_v9  ;;  %v517_v13 = vld [vmem:[%s3788_s20 + $0x3f0] sm:$0xff]  ;;  %v415_v15 = vld [vmem:[%s3788_s20 + $0xc0] sm:$0xff]  ;;  %1159 = vmatpush.bf16.msra.mxu0 %v533_v7  ;;  %741 = vperm.xlu2 %3476, %v659_v14  }
  0x36   : > { %1248 = vmatpush.bf16.msra.mxu1 %v549_v8  ;;  %v581_v16 = vpack.c.bf16 %v517_v13, %v515_v11  ;;  %v417_v17 = vld [vmem:[%s3788_s20 + $0xd0] sm:$0xff]  ;;  %v447_v18 = vld [vmem:[%s3788_s20 + $0x1c0] sm:$0xff] }
  0x37   : > { %v449_v19 = vld [vmem:[%s3788_s20 + $0x1d0] sm:$0xff]  ;;  %1337 = vmatpush.bf16.msra.mxu2 %v565_v12  ;;  %v531_v20 = vpack.c.bf16 %v417_v17, %v415_v15  ;;  %v479_v22 = vld [vmem:[%s3788_s20 + $0x2c0] sm:$0xff] }
  0x38   : > { %v547_v21 = vpack.c.bf16 %v449_v19, %v447_v18  ;;  %v481_v23 = vld [vmem:[%s3788_s20 + $0x2d0] sm:$0xff]  ;;  %v511_v24 = vld [vmem:[%s3788_s20 + $0x3c0] sm:$0xff]  ;;  %1426 = vmatpush.bf16.msra.mxu3 %v581_v16  ;;  %s2842_s23 = scalar_lea.hbm %s5418_s22, %s3381_s29  ;;  %s3557_s14 = scalar_lea.hbm %s5418_s22, 32 }
  0x39   : > { %v563_v25 = vpack.c.bf16 %v481_v23, %v479_v22  ;;  %v513_v26 = vld [vmem:[%s3788_s20 + $0x3d0] sm:$0xff]  ;;  %v411_v30 = vld [vmem:[%s3788_s20 + $0xa0] sm:$0xff]  ;;  %1160 = vmatpush.bf16.msra.mxu0 %v531_v20  ;;  %s2846_s18 = sshll.u32 %s2842_s23, 4  ;;  %s2847_s18 = int_to_ptr.hbm [resolvable:$true] %s2846_s18 }
  0x3a   : > { %v579_v29 = vpack.c.bf16 %v513_v26, %v511_v24  ;;  %v413_v31 = vld [vmem:[%s3788_s20 + $0xb0] sm:$0xff]  ;;  %v443_v32 = vld [vmem:[%s3788_s20 + $0x1a0] sm:$0xff]  ;;  %1249 = vmatpush.bf16.msra.mxu1 %v547_v21  ;;  %836 = vperm.xlu1 %3475, %v678_v27   ;;  %s3551_s30 = sshra.s32 %s2847_s18, 4  ;;  %s3552_s30 = int_to_ptr.hbm [resolvable:$true] %s3551_s30 }
  0x3b   : > { %v529_v33 = vpack.c.bf16 %v413_v31, %v411_v30  ;;  %v445_v34 = vld [vmem:[%s3788_s20 + $0x1b0] sm:$0xff]  ;;  %v475_v35 = vld [vmem:[%s3788_s20 + $0x2a0] sm:$0xff]  ;;  %1338 = vmatpush.bf16.msra.mxu2 %v563_v25  ;;  %756 = vperm.xlu0 %3474, %v662_v28   ;;  %v658_v25 = vld [vmem:[%s5108_s2 + $0x58] sm:$0xff]  ;;  %p3558_p10 = scmp.lt.s32.totalorder %s3552_s30, %s5418_s22 }
  0x3c   : > { %v477_v36 = vld [vmem:[%s3788_s20 + $0x2b0] sm:$0xff]  ;;  %v545_v37 = vpack.c.bf16 %v445_v34, %v443_v32  ;;  %v507_v39 = vld [vmem:[%s3788_s20 + $0x3a0] sm:$0xff]  ;;  %1427 = vmatpush.bf16.msra.mxu3 %v579_v29 }
  0x3d   : > { %v561_v38 = vpack.c.bf16 %v477_v36, %v475_v35  ;;  %v509_v40 = vld [vmem:[%s3788_s20 + $0x3b0] sm:$0xff]  ;;  %v407_v43 = vld [vmem:[%s3788_s20 + $0x80] sm:$0xff]  ;;  %1161 = vmatpush.bf16.msra.mxu0 %v529_v33  ;;  %746 = vperm.xlu2 %3476, %v660_v41   ;;  %v674_v36 = vld [vmem:[%s5108_s2 + $0xd8] sm:$0xff] }
  0x3e   : > { %v577_v42 = vpack.c.bf16 %v509_v40, %v507_v39  ;;  %v409_v44 = vld [vmem:[%s3788_s20 + $0x90] sm:$0xff]  ;;  %v439_v45 = vld [vmem:[%s3788_s20 + $0x180] sm:$0xff]  ;;  %1250 = vmatpush.bf16.msra.mxu1 %v545_v37 }
  0x3f   : > { %v441_v46 = vld [vmem:[%s3788_s20 + $0x190] sm:$0xff]  ;;  %v471_v47 = vld [vmem:[%s3788_s20 + $0x280] sm:$0xff]  ;;  %v527_v49 = vpack.c.bf16 %v409_v44, %v407_v43  ;;  %1339 = vmatpush.bf16.msra.mxu2 %v561_v38 }
  0x40   : > { %v473_v48 = vld [vmem:[%s3788_s20 + $0x290] sm:$0xff]  ;;  %v543_v50 = vpack.c.bf16 %v441_v46, %v439_v45  ;;  %v503_v51 = vld [vmem:[%s3788_s20 + $0x380] sm:$0xff]  ;;  %1428 = vmatpush.bf16.msra.mxu3 %v577_v42 }
  0x41   : > { %v505_v52 = vld [vmem:[%s3788_s20 + $0x390] sm:$0xff]  ;;  %v559_v54 = vpack.c.bf16 %v473_v48, %v471_v47  ;;  %v675_v55 = vld [vmem:[%s5108_s2 + $0xe0] sm:$0xff]  ;;  %1162 = vmatpush.bf16.msra.mxu0 %v527_v49  ;;  %v2963_v48 = vld [vmem:[#allocation5 + $0x8] sm:$0xf] }
  0x42   : > { %v403_v56 = vld [vmem:[%s3788_s20 + $0x60] sm:$0xff]  ;;  %v405_v57 = vld [vmem:[%s3788_s20 + $0x70] sm:$0xff]  ;;  %v575_v58 = vpack.c.bf16 %v505_v52, %v503_v51  ;;  %1251 = vmatpush.bf16.msra.mxu1 %v543_v50  ;;  %826 = vperm.xlu1 %3475, %v676_v53   ;;  %v3300_v49 = vld [vmem:[#allocation5 + $0x14] sm:$0xf0] }
  0x43   : > { %v435_v59 = vld [vmem:[%s3788_s20 + $0x160] sm:$0xff]  ;;  %v437_v60 = vld [vmem:[%s3788_s20 + $0x170] sm:$0xff]  ;;  %v525_v1 = vpack.c.bf16 %v405_v57, %v403_v56  ;;  %1340 = vmatpush.bf16.msra.mxu2 %v559_v54  ;;  %821 = vperm.xlu0 %3474, %v675_v55   ;;  %v656_v51 = vld [vmem:[%s5108_s2 + $0x48] sm:$0xff]  ;;  %v3908_v57 = vor.u32 %v3300_v49, %v2963_v48 }
  0x44   : > { %v467_v61 = vld [vmem:[%s3788_s20 + $0x260] sm:$0xff]  ;;  %v469_v62 = vld [vmem:[%s3788_s20 + $0x270] sm:$0xff]  ;;  %v541_v2 = vpack.c.bf16 %v437_v60, %v435_v59  ;;  %1429 = vmatpush.bf16.msra.mxu3 %v575_v58  ;;  %v3298_v52 = vld [vmem:[#allocation5 + $0xc] sm:$0xf] }
  0x45   : > { %v499_v63 = vld [vmem:[%s3788_s20 + $0x360] sm:$0xff]  ;;  %v501_v0 = vld [vmem:[%s3788_s20 + $0x370] sm:$0xff]  ;;  %v557_v4 = vpack.c.bf16 %v469_v62, %v467_v61  ;;  %1163 = vmatpush.bf16.msra.mxu0 %v525_v1  ;;  %v2965_v53 = vld [vmem:[#allocation5 + $0x18] sm:$0xf0] }
  0x46   : > { %v399_v3 = vld [vmem:[%s3788_s20 + $0x40] sm:$0xff]  ;;  %v401_v5 = vld [vmem:[%s3788_s20 + $0x50] sm:$0xff]  ;;  %v573_v8 = vpack.c.bf16 %v501_v0, %v499_v63  ;;  %1252 = vmatpush.bf16.msra.mxu1 %v541_v2  ;;  %v3910_v58 = vor.u32 %v3298_v52, %v2965_v53  ;;  %v672_v61 = vld [vmem:[%s5108_s2 + $0xc8] sm:$0xff] }
  0x47   : > { %v431_v6 = vld [vmem:[%s3788_s20 + $0x140] sm:$0xff]  ;;  %v433_v7 = vld [vmem:[%s3788_s20 + $0x150] sm:$0xff]  ;;  %v523_v14 = vpack.c.bf16 %v401_v5, %v399_v3  ;;  %1341 = vmatpush.bf16.msra.mxu2 %v557_v4  ;;  %v654_v62 = vld [vmem:[%s5108_s2 + $0x38] sm:$0xff] }
  0x48   : > { %v657_v9 = vld [vmem:[%s5108_s2 + $0x50] sm:$0xff]  ;;  %v463_v10 = vld [vmem:[%s3788_s20 + $0x240] sm:$0xff]  ;;  %v539_v15 = vpack.c.bf16 %v433_v7, %v431_v6  ;;  %1430 = vmatpush.bf16.msra.mxu3 %v573_v8  ;;  %v2979_v3 = vld [vmem:[#allocation5 + $0x28] sm:$0xf] }
  0x49   : > { %v465_v11 = vld [vmem:[%s3788_s20 + $0x250] sm:$0xff]  ;;  %v495_v12 = vld [vmem:[%s3788_s20 + $0x340] sm:$0xff]  ;;  %731 = vperm.xlu2 %3476, %v657_v9   ;;  %1164 = vmatpush.bf16.msra.mxu0 %v523_v14  ;;  %v3304_v4 = vld [vmem:[#allocation5 + $0x34] sm:$0xf0] }
  0x4a   : > { %v497_v13 = vld [vmem:[%s3788_s20 + $0x350] sm:$0xff]  ;;  %v395_v16 = vld [vmem:[%s3788_s20 + $0x20] sm:$0xff]  ;;  %v555_v17 = vpack.c.bf16 %v465_v11, %v463_v10  ;;  %1253 = vmatpush.bf16.msra.mxu1 %v539_v15  ;;  %v670_v5 = vld [vmem:[%s5108_s2 + $0xb8] sm:$0xff]  ;;  %v3938_v11 = vor.u32 %v3304_v4, %v2979_v3 }
  0x4b   : > { %v397_v18 = vld [vmem:[%s3788_s20 + $0x30] sm:$0xff]  ;;  %v427_v19 = vld [vmem:[%s3788_s20 + $0x120] sm:$0xff]  ;;  %v571_v21 = vpack.c.bf16 %v497_v13, %v495_v12  ;;  %736 = vperm.xlu0 %3474, %v658_v25   ;;  %v3302_v6 = vld [vmem:[#allocation5 + $0x2c] sm:$0xf] }
  0x4c   : > { %v429_v20 = vld [vmem:[%s3788_s20 + $0x130] sm:$0xff]  ;;  %v459_v23 = vld [vmem:[%s3788_s20 + $0x220] sm:$0xff]  ;;  %v521_v28 = vpack.c.bf16 %v397_v18, %v395_v16  ;;  %1342 = vmatpush.bf16.msra.mxu2 %v555_v17  ;;  %v2981_v7 = vld [vmem:[#allocation5 + $0x38] sm:$0xf0] }
  0x4d   : > { %v673_v22 = vld [vmem:[%s5108_s2 + $0xd0] sm:$0xff]  ;;  %v491_v26 = vld [vmem:[%s3788_s20 + $0x320] sm:$0xff]  ;;  %v537_v29 = vpack.c.bf16 %v429_v20, %v427_v19  ;;  %1431 = vmatpush.bf16.msra.mxu3 %v571_v21  ;;  %v3940_v12 = vor.u32 %v3302_v6, %v2981_v7  ;;  %v652_v15 = vld [vmem:[%s5108_s2 + $0x28] sm:$0xff] }
  0x4e   : > { %v461_v24 = vld [vmem:[%s3788_s20 + $0x230] sm:$0xff]  ;;  %v391_v30 = vld [vmem:[%s3788_s20] sm:$0xff]  ;;  %811 = vperm.xlu1 %3475, %v673_v22   ;;  %1165 = vmatpush.bf16.msra.mxu0 %v521_v28  ;;  %v668_v16 = vld [vmem:[%s5108_s2 + $0xa8] sm:$0xff] }
  0x4f   : > { %v493_v27 = vld [vmem:[%s3788_s20 + $0x330] sm:$0xff]  ;;  %v553_v31 = vpack.c.bf16 %v461_v24, %v459_v23  ;;  %v423_v33 = vld [vmem:[%s3788_s20 + $0x100] sm:$0xff]  ;;  %1254 = vmatpush.bf16.msra.mxu1 %v537_v29  ;;  %v2995_v21 = vld [vmem:[#allocation5 + $0x48] sm:$0xf] }
  0x50   : > { %v393_v32 = vld [vmem:[%s3788_s20 + $0x10] sm:$0xff]  ;;  %v569_v35 = vpack.c.bf16 %v493_v27, %v491_v26  ;;  %v455_v37 = vld [vmem:[%s3788_s20 + $0x200] sm:$0xff]  ;;  %v3308_v22 = vld [vmem:[#allocation5 + $0x54] sm:$0xf0] }
  0x51   : > { %v425_v34 = vld [vmem:[%s3788_s20 + $0x110] sm:$0xff]  ;;  %v487_v39 = vld [vmem:[%s3788_s20 + $0x300] sm:$0xff]  ;;  %v519_v42 = vpack.c.bf16 %v393_v32, %v391_v30  ;;  %1343 = vmatpush.bf16.msra.mxu2 %v553_v31  ;;  %816 = vperm.xlu2 %3476, %v674_v36   ;;  %v650_v23 = vld [vmem:[%s5108_s2 + $0x18] sm:$0xff]  ;;  %v3968_v29 = vor.u32 %v3308_v22, %v2995_v21 }
  0x52   : > { %v457_v38 = vld [vmem:[%s3788_s20 + $0x210] sm:$0xff]  ;;  %v2955_v41 = vld [vmem:[#allocation5] sm:$0xf]  ;;  %v535_v43 = vpack.c.bf16 %v425_v34, %v423_v33  ;;  %v3297_v45 = vld [vmem:[#allocation5 + $0x4] sm:$0xf]  ;;  %1432 = vmatpush.bf16.msra.mxu3 %v569_v35 }
  0x53   : > { %v489_v40 = vld [vmem:[%s3788_s20 + $0x310] sm:$0xff]  ;;  %v551_v47 = vpack.c.bf16 %v457_v38, %v455_v37  ;;  %v655_v54 = vld [vmem:[%s5108_s2 + $0x40] sm:$0xff]  ;;  %1166 = vmatpush.bf16.msra.mxu0 %v519_v42  ;;  %v3306_v24 = vld [vmem:[#allocation5 + $0x4c] sm:$0xf]  ;;  %5228 = vst [vmem:[#allocation16_spill] sm:$0xff] %v3968_v29 }
  0x54   : > { %v3299_v44 = vld [vmem:[#allocation5 + $0xc] sm:$0xf0]  ;;  %v2957_v46 = vld [vmem:[#allocation5 + $0x10] sm:$0xf0]  ;;  %v567_v50 = vpack.c.bf16 %v489_v40, %v487_v39  ;;  %1255 = vmatpush.bf16.msra.mxu1 %v535_v43  ;;  %721 = vperm.xlu0 %3474, %v655_v54   ;;  %v671_v59 = vld [vmem:[%s5108_s2 + $0xc0] sm:$0xff] }
  0x55   : > { %v3904_v55 = vor.u32 %v3299_v44, %v2955_v41  ;;  %v3906_v56 = vor.u32 %v3297_v45, %v2957_v46  ;;  %1344 = vmatpush.bf16.msra.mxu2 %v551_v47  ;;  %v653_v60 = vld [vmem:[%s5108_s2 + $0x30] sm:$0xff]  ;;  %v2971_v63 = vld [vmem:[#allocation5 + $0x20] sm:$0xf]  ;;  %v3301_v1 = vld [vmem:[#allocation5 + $0x24] sm:$0xf] }
  0x56   : > { %726 = vperm.xlu1 %3475, %v656_v51   ;;  %1433 = vmatpush.bf16.msra.mxu3 %v567_v50  ;;  %v3303_v0 = vld [vmem:[#allocation5 + $0x2c] sm:$0xf0]  ;;  %v2973_v2 = vld [vmem:[#allocation5 + $0x30] sm:$0xf0]  ;;  %v651_v13 = vld [vmem:[%s5108_s2 + $0x20] sm:$0xff] }
  0x57   : > { %1167 = vmatmul.bf16.vlgmr.msra.gmra.mxu0 %v3904_v55  ;;  %1256 = vmatmul.bf16.vlgmr.msra.gmra.mxu1 %v3906_v56  ;;  %v669_v8 = vld [vmem:[%s5108_s2 + $0xb0] sm:$0xff]  ;;  %v3934_v9 = vor.u32 %v3303_v0, %v2971_v63  ;;  %v3936_v10 = vor.u32 %v3301_v1, %v2973_v2  ;;  %v667_v14 = vld [vmem:[%s5108_s2 + $0xa0] sm:$0xff]  ;;  %v2997_v25 = vld [vmem:[#allocation5 + $0x58] sm:$0xf0] }
  0x58   : > { %1345 = vmatmul.bf16.vlgmr.msra.gmra.mxu2 %v3908_v57  ;;  %v2987_v17 = vld [vmem:[#allocation5 + $0x40] sm:$0xf]  ;;  %v3307_v18 = vld [vmem:[#allocation5 + $0x4c] sm:$0xf0]  ;;  %v3305_v19 = vld [vmem:[#allocation5 + $0x44] sm:$0xf]  ;;  %v3970_v30 = vor.u32 %v3306_v24, %v2997_v25 }
  0x59   : > { %1434 = vmatmul.bf16.vlgmr.msra.gmra.mxu3 %v3910_v58  ;;  %801 = vperm.xlu2 %3476, %v671_v59   ;;  %v2989_v20 = vld [vmem:[#allocation5 + $0x50] sm:$0xf0]  ;;  %v3964_v27 = vor.u32 %v3307_v18, %v2987_v17  ;;  %v647_v32 = vld [vmem:[%s5108_s2] sm:$0xff]  ;;  %v648_v33 = vld [vmem:[%s5108_s2 + $0x8] sm:$0xff] }
  0x5a   : > { %v649_v26 = vld [vmem:[%s5108_s2 + $0x10] sm:$0xff]  ;;  %v3966_v28 = vor.u32 %v3305_v19, %v2989_v20  ;;  %5229 = vst [vmem:[#allocation17_spill] sm:$0xff] %v3970_v30  ;;  %v3003_v34 = vld [vmem:[#allocation5 + $0x60] sm:$0xf]  ;;  %v3309_v36 = vld [vmem:[#allocation5 + $0x64] sm:$0xf] }
  0x5b   : > { %v665_v31 = vld [vmem:[%s5108_s2 + $0x90] sm:$0xff]  ;;  %v3011_v38 = vld [vmem:[#allocation5 + $0x68] sm:$0xf]  ;;  %v3312_v39 = vld [vmem:[#allocation5 + $0x74] sm:$0xf0] }
  0x5c   : > { %806 = vperm.xlu0 %3474, %v672_v61   ;;  %v3311_v35 = vld [vmem:[#allocation5 + $0x6c] sm:$0xf0]  ;;  %v3005_v37 = vld [vmem:[#allocation5 + $0x70] sm:$0xf0]  ;;  %v3310_v40 = vld [vmem:[#allocation5 + $0x6c] sm:$0xf]  ;;  %v3989_v44 = vor.u32 %v3312_v39, %v3011_v38 }
  0x5d   : > { %v3013_v41 = vld [vmem:[#allocation5 + $0x78] sm:$0xf0]  ;;  %v3985_v42 = vor.u32 %v3311_v35, %v3003_v34  ;;  %v3987_v43 = vor.u32 %v3309_v36, %v3005_v37  ;;  %v3019_v46 = vld [vmem:[#allocation5 + $0x80] sm:$0xf]  ;;  %v3315_v47 = vld [vmem:[#allocation5 + $0x8c] sm:$0xf0] }
  0x5e   : > { %711 = vperm.xlu1 %3475, %v653_v60   ;;  %5232 = vst [vmem:[#allocation20_spill] sm:$0xff] %v3989_v44  ;;  %v3991_v45 = vor.u32 %v3310_v40, %v3013_v41  ;;  %v3313_v48 = vld [vmem:[#allocation5 + $0x84] sm:$0xf]  ;;  %v3021_v49 = vld [vmem:[#allocation5 + $0x90] sm:$0xf0]  ;;  %v3999_v59 = vor.u32 %v3315_v47, %v3019_v46  ;;  %v666_v46 = vld [vmem:[%s5108_s2 + $0x98] sm:$0xff] }
  0x5f   : > { %5230 = vst [vmem:[#allocation18_spill] sm:$0xff] %v3985_v42  ;;  %v3027_v50 = vld [vmem:[#allocation5 + $0x88] sm:$0xf]  ;;  %v3316_v51 = vld [vmem:[#allocation5 + $0x94] sm:$0xf0]  ;;  %v4001_v60 = vor.u32 %v3313_v48, %v3021_v49 }
  0x60   : > { %5231 = vst [vmem:[#allocation19_spill] sm:$0xff] %v3987_v43  ;;  %v3314_v52 = vld [vmem:[#allocation5 + $0x8c] sm:$0xf]  ;;  %v3029_v53 = vld [vmem:[#allocation5 + $0x98] sm:$0xf0]  ;;  %v4003_v61 = vor.u32 %v3316_v51, %v3027_v50 }
  0x61   : > { %716 = vperm.xlu2 %3476, %v654_v62   ;;  %5233 = vst [vmem:[#allocation21_spill] sm:$0xff] %v3991_v45  ;;  %v4005_v62 = vor.u32 %v3314_v52, %v3029_v53  ;;  %v3035_v0 = vld [vmem:[#allocation5 + $0xa0] sm:$0xf]  ;;  %v3319_v1 = vld [vmem:[#allocation5 + $0xac] sm:$0xf0] }
  0x62   : > { %5234 = vst [vmem:[#allocation22_spill] sm:$0xff] %v3999_v59  ;;  %v3317_v2 = vld [vmem:[#allocation5 + $0xa4] sm:$0xf]  ;;  %v3037_v3 = vld [vmem:[#allocation5 + $0xb0] sm:$0xf0] }
  0x63   : > { %5235 = vst [vmem:[#allocation23_spill] sm:$0xff] %v4001_v60  ;;  %v3043_v4 = vld [vmem:[#allocation5 + $0xa8] sm:$0xf]  ;;  %v3318_v6 = vld [vmem:[#allocation5 + $0xac] sm:$0xf] }
  0x64   : > { %791 = vperm.xlu0 %3474, %v669_v8   ;;  %5236 = vst [vmem:[#allocation24_spill] sm:$0xff] %v4003_v61  ;;  %v3045_v7 = vld [vmem:[#allocation5 + $0xb8] sm:$0xf0]  ;;  %v3051_v21 = vld [vmem:[#allocation5 + $0xc0] sm:$0xf] }
  0x65   : > { %5237 = vst [vmem:[#allocation25_spill] sm:$0xff] %v4005_v62  ;;  %v3321_v24 = vld [vmem:[#allocation5 + $0xc4] sm:$0xf]  ;;  %v3053_v25 = vld [vmem:[#allocation5 + $0xd0] sm:$0xf0] }
  0x66   : > { %796 = vperm.xlu1 %3475, %v670_v5   ;;  %v3320_v5 = vld [vmem:[#allocation5 + $0xb4] sm:$0xf0]  ;;  %v4041_v36 = vor.u32 %v3321_v24, %v3053_v25  ;;  %v3067_v48 = vld [vmem:[#allocation5 + $0xe0] sm:$0xf]  ;;  %v3327_v50 = vld [vmem:[#allocation5 + $0xec] sm:$0xf0] }
  0x67   : > { %1172 = vmatmul.bf16.gmra.mxu0 %v3934_v9  ;;  %1261 = vmatmul.bf16.gmra.mxu1 %v3936_v10  ;;  %v3325_v51 = vld [vmem:[#allocation5 + $0xe4] sm:$0xf]  ;;  %v3069_v52 = vld [vmem:[#allocation5 + $0xf0] sm:$0xf0]  ;;  %v3075_v53 = vld [vmem:[#allocation5 + $0xe8] sm:$0xf] }
  0x68   : > { %1350 = vmatmul.bf16.gmra.mxu2 %v3938_v11  ;;  %5250 = vst [vmem:[#allocation38_spill] sm:$0xff] %v4041_v36  ;;  %v664_v25 = vld [vmem:[%s5108_s2 + $0x88] sm:$0xff] }
  0x69   : > { %1439 = vmatmul.bf16.gmra.mxu3 %v3940_v12  ;;  %701 = vperm.xlu2 %3476, %v651_v13   ;;  %v4015_v13 = vor.u32 %v3319_v1, %v3035_v0  ;;  %v3328_v0 = vld [vmem:[#allocation5 + $0xf4] sm:$0xf0]  ;;  %v3326_v1 = vld [vmem:[#allocation5 + $0xec] sm:$0xf] }
  0x6b   : > { %5240 = vst [vmem:[#allocation28_spill] sm:$0xff] %v4015_v13 }
  0x6c   : > { %706 = vperm.xlu0 %3474, %v652_v15   ;;  %v4019_v15 = vor.u32 %v3320_v5, %v3043_v4  ;;  %v4066_v4 = vor.u32 %v3327_v50, %v3067_v48  ;;  %v4068_v5 = vor.u32 %v3325_v51, %v3069_v52  ;;  %v3329_v48 = vld [vmem:[#allocation5 + $0x104] sm:$0xf]  ;;  %v3085_v50 = vld [vmem:[#allocation5 + $0x110] sm:$0xf0]  ;;  %v3091_v51 = vld [vmem:[#allocation5 + $0x108] sm:$0xf] }
  0x6d   : > { %v3332_v52 = vld [vmem:[#allocation5 + $0x114] sm:$0xf0] }
  0x6e   : > { %781 = vperm.xlu1 %3475, %v667_v14   ;;  %v4017_v14 = vor.u32 %v3317_v2, %v3037_v3  ;;  %5242 = vst [vmem:[#allocation30_spill] sm:$0xff] %v4019_v15  ;;  %v3077_v2 = vld [vmem:[#allocation5 + $0xf8] sm:$0xf0] }
  0x6f   : > { %5258 = vst [vmem:[#allocation46_spill] sm:$0xff] %v4066_v4 }
  0x70   : > { %5241 = vst [vmem:[#allocation29_spill] sm:$0xff] %v4017_v14 }
  0x71   : > { %786 = vperm.xlu2 %3476, %v668_v16   ;;  %v4021_v16 = vor.u32 %v3318_v6, %v3045_v7  ;;  %5259 = vst [vmem:[#allocation47_spill] sm:$0xff] %v4068_v5  ;;  %v4070_v6 = vor.u32 %v3328_v0, %v3075_v53  ;;  %v4072_v7 = vor.u32 %v3326_v1, %v3077_v2  ;;  %v3330_v53 = vld [vmem:[#allocation5 + $0x10c] sm:$0xf]  ;;  %v3093_v0 = vld [vmem:[#allocation5 + $0x118] sm:$0xf0] }
  0x73   : > { %5243 = vst [vmem:[#allocation31_spill] sm:$0xff] %v4021_v16 }
  0x74   : > { %691 = vperm.xlu0 %3474, %v649_v26   ;;  %v3059_v26 = vld [vmem:[#allocation5 + $0xc8] sm:$0xf]  ;;  %5260 = vst [vmem:[#allocation48_spill] sm:$0xff] %v4070_v6 }
  0x75   : > { %5261 = vst [vmem:[#allocation49_spill] sm:$0xff] %v4072_v7 }
  0x76   : > { %696 = vperm.xlu1 %3475, %v650_v23   ;;  %v3323_v23 = vld [vmem:[#allocation5 + $0xcc] sm:$0xf0] }
  0x77   : > { %1177 = vmatmul.bf16.gmra.mxu0 %v3964_v27  ;;  %1266 = vmatmul.bf16.gmra.mxu1 %v3966_v28  ;;  %v4039_v35 = vor.u32 %v3323_v23, %v3051_v21  ;;  %v663_v21 = vld [vmem:[%s5108_s2 + $0x80] sm:$0xff] }
  0x78   : > { %1355 = vmatmul.bf16.gmra.mxu2 %v3968_v29 }
  0x79   : > { %1444 = vmatmul.bf16.gmra.mxu3 %v3970_v30  ;;  %771 = vperm.xlu2 %3476, %v665_v31   ;;  %v3324_v31 = vld [vmem:[#allocation5 + $0xd4] sm:$0xf0]  ;;  %5249 = vst [vmem:[#allocation37_spill] sm:$0xff] %v4039_v35 }
  0x7a   : > { %v4043_v37 = vor.u32 %v3324_v31, %v3059_v26 }
  0x7c   : > { %5251 = vst [vmem:[#allocation39_spill] sm:$0xff] %v4043_v37  ;;  %776 = vperm.xlu0 %3474, %v666_v46   ;;  %v3331_v46 = vld [vmem:[#allocation5 + $0x10c] sm:$0xf0] }
  0x7e   : > { %681 = vperm.xlu1 %3475, %v647_v32   ;;  %v3322_v32 = vld [vmem:[#allocation5 + $0xcc] sm:$0xf] }
  0x81   : > { %686 = vperm.xlu2 %3476, %v648_v33   ;;  %v3061_v33 = vld [vmem:[#allocation5 + $0xd8] sm:$0xf0] }
  0x82   : > { %v4045_v38 = vor.u32 %v3322_v32, %v3061_v33  ;;  %v3083_v32 = vld [vmem:[#allocation5 + $0x100] sm:$0xf] }
  0x83   : > { %v4096_v2 = vor.u32 %v3331_v46, %v3083_v32 }
  0x84   : > { %5252 = vst [vmem:[#allocation40_spill] sm:$0xff] %v4045_v38  ;;  %761 = vperm.xlu0 %3474, %v663_v21   ;;  %v4098_v21 = vor.u32 %v3329_v48, %v3085_v50 }
  0x85   : > { %5266 = vst [vmem:[#allocation54_spill] sm:$0xff] %v4096_v2 }
  0x86   : > { %766 = vperm.xlu1 %3475, %v664_v25   ;;  %5267 = vst [vmem:[#allocation55_spill] sm:$0xff] %v4098_v21 }
  0x87   : > { %1182 = vmatmul.bf16.gmra.mxu0 %v3985_v42  ;;  %1271 = vmatmul.bf16.gmra.mxu1 %v3987_v43  ;;  %v460_v43 = vld [vmem:[%s3788_s20 + $0x228] sm:$0xff]  ;;  %v462_v42 = vld [vmem:[%s3788_s20 + $0x238] sm:$0xff] }
  0x88   : > { %1360 = vmatmul.bf16.gmra.mxu2 %v3989_v44  ;;  %v430_v44 = vld [vmem:[%s3788_s20 + $0x138] sm:$0xff] }
  0x89   : > { %1449 = vmatmul.bf16.gmra.mxu3 %v3991_v45 }
  0x8f   : > { %v3997_v54 = vpop.permute.xlu2 %741 }
  0x97   : > { %1187 = vmatmul.bf16.gmra.mxu0 %v3999_v59  ;;  %1276 = vmatmul.bf16.gmra.mxu1 %v4001_v60  ;;  %v4011_v63 = vpop.permute.xlu2 %746 }
  0x98   : > { %1365 = vmatmul.bf16.gmra.mxu2 %v4003_v61  ;;  %5238 = vst [vmem:[#allocation26_spill] sm:$0xff] %v4011_v63 }
  0x99   : > { %1454 = vmatmul.bf16.gmra.mxu3 %v4005_v62 }
  0xa3   : > { %v4013_v8 = vpop.permute.xlu2 %731 }
  0xa4   : > { %5239 = vst [vmem:[#allocation27_spill] sm:$0xff] %v4013_v8  ;;  %v4025_v17 = vpop.permute.xlu1 %831 }
  0xa5   : > { %5244 = vst [vmem:[#allocation32_spill] sm:$0xff] %v4025_v17  ;;  %v4027_v18 = vpop.permute.xlu0 %751 }
  0xa6   : > { %5245 = vst [vmem:[#allocation33_spill] sm:$0xff] %v4027_v18 }
  0xa7   : > { %1192 = vmatmul.bf16.gmra.mxu0 %v4015_v13  ;;  %1281 = vmatmul.bf16.gmra.mxu1 %v4017_v14  ;;  %v3337_v14 = vld [vmem:[#allocation5 + $0x144] sm:$0xf]  ;;  %v3123_v13 = vld [vmem:[#allocation5 + $0x148] sm:$0xf] }
  0xa8   : > { %1370 = vmatmul.bf16.gmra.mxu2 %v4019_v15 }
  0xa9   : > { %1459 = vmatmul.bf16.gmra.mxu3 %v4021_v16 }
  0xab   : > { %v4031_v19 = vpop.permute.xlu2 %816 }
  0xac   : > { %5246 = vst [vmem:[#allocation34_spill] sm:$0xff] %v4031_v19  ;;  %v4033_v20 = vpop.permute.xlu1 %836  ;;  %v4100_v19 = vor.u32 %v3332_v52, %v3091_v51 }
  0xad   : > { %5247 = vst [vmem:[#allocation35_spill] sm:$0xff] %v4033_v20  ;;  %v4035_v22 = vpop.permute.xlu0 %756 }
  0xae   : > { %5268 = vst [vmem:[#allocation56_spill] sm:$0xff] %v4100_v19 }
  0xb3   : > { %v4037_v34 = vpop.permute.xlu2 %801 }
  0xb4   : > { %5248 = vst [vmem:[#allocation36_spill] sm:$0xff] %v4037_v34  ;;  %v4049_v39 = vpop.permute.xlu1 %826  ;;  %v408_v34 = vld [vmem:[%s3788_s20 + $0x88] sm:$0xff] }
  0xb5   : > { %5253 = vst [vmem:[#allocation41_spill] sm:$0xff] %v4049_v39  ;;  %v4052_v40 = vpop.permute.xlu0 %821 }
  0xb6   : > { %5254 = vst [vmem:[#allocation42_spill] sm:$0xff] %v4052_v40  ;;  %v3333_v40 = vld [vmem:[#allocation5 + $0x124] sm:$0xf] }
  0xb7   : > { %1197 = vmatmul.bf16.gmra.mxu0 %v4039_v35  ;;  %1286 = vmatmul.bf16.gmra.mxu1 %v4041_v36 }
  0xb8   : > { %1375 = vmatmul.bf16.gmra.mxu2 %v4043_v37 }
  0xb9   : > { %1464 = vmatmul.bf16.gmra.mxu3 %v4045_v38 }
  0xbb   : > { %v4055_v41 = vpop.permute.xlu2 %716 }
  0xbc   : > { %5255 = vst [vmem:[#allocation43_spill] sm:$0xff] %v4055_v41 }
  0xbd   : > { %v4062_v49 = vpop.permute.xlu0 %736 }
  0xc0   : > { %v4060_v47 = vpop.permute.xlu1 %811 }
  0xc1   : > { %5256 = vst [vmem:[#allocation44_spill] sm:$0xff] %v4060_v47  ;;  %v4102_v47 = vor.u32 %v3330_v53, %v3093_v0 }
  0xc3   : > { %v4064_v3 = vpop.permute.xlu2 %701  ;;  %5269 = vst [vmem:[#allocation57_spill] sm:$0xff] %v4102_v47 }
  0xc4   : > { %5257 = vst [vmem:[#allocation45_spill] sm:$0xff] %v4064_v3 }
  0xc6   : > { %v4082_v24 = vpop.permute.xlu0 %721 }
  0xc7   : > { %1202 = vmatmul.bf16.gmra.mxu0 %v4066_v4  ;;  %1291 = vmatmul.bf16.gmra.mxu1 %v4068_v5  ;;  %5262 = vst [vmem:[#allocation50_spill] sm:$0xff] %v4082_v24  ;;  %v3334_v5 = vld [vmem:[#allocation5 + $0x12c] sm:$0xf]  ;;  %v3109_v4 = vld [vmem:[#allocation5 + $0x138] sm:$0xf0] }
  0xc8   : > { %v4079_v23 = vpop.permute.xlu1 %726  ;;  %1380 = vmatmul.bf16.gmra.mxu2 %v4070_v6  ;;  %v3107_v6 = vld [vmem:[#allocation5 + $0x128] sm:$0xf]  ;;  %v4127_v35 = vor.u32 %v3334_v5, %v3109_v4 }
  0xc9   : > { %1469 = vmatmul.bf16.gmra.mxu3 %v4072_v7  ;;  %v3101_v7 = vld [vmem:[#allocation5 + $0x130] sm:$0xf0] }
  0xca   : > { %v4123_v37 = vor.u32 %v3333_v40, %v3101_v7  ;;  %5277 = vst [vmem:[#allocation65_spill] sm:$0xff] %v4127_v35 }
  0xcb   : > { %v4088_v26 = vpop.permute.xlu2 %786 }
  0xcc   : > { %5263 = vst [vmem:[#allocation51_spill] sm:$0xff] %v4088_v26  ;;  %v3189_v26 = vld [vmem:[#allocation5 + $0x1d8] sm:$0xf0] }
  0xcd   : > { %5275 = vst [vmem:[#allocation63_spill] sm:$0xff] %v4123_v37 }
  0xce   : > { %v4092_v33 = vpop.permute.xlu0 %806 }
  0xcf   : > { %5265 = vst [vmem:[#allocation53_spill] sm:$0xff] %v4092_v33 }
  0xd0   : > { %v4090_v31 = vpop.permute.xlu1 %711 }
  0xd1   : > { %5264 = vst [vmem:[#allocation52_spill] sm:$0xff] %v4090_v31 }
  0xd3   : > { %v4094_v1 = vpop.permute.xlu2 %771 }
  0xd4   : > { %v1168_v25 = vpop.f32.mrf.mxu0  ;;  %v1257_v20 = vpop.f32.mrf.mxu1 }
  0xd6   : > { %v4109_v39 = vpop.permute.xlu0 %791 }
  0xd7   : > { %1207 = vmatmul.bf16.gmra.mxu0 %v4096_v2  ;;  %1296 = vmatmul.bf16.gmra.mxu1 %v4098_v21  ;;  %5271 = vst [vmem:[#allocation59_spill] sm:$0xff] %v4109_v39  ;;  %v3099_v21 = vld [vmem:[#allocation5 + $0x120] sm:$0xf]  ;;  %v3356_v39 = vld [vmem:[#allocation5 + $0x1d4] sm:$0xf0] }
  0xd8   : > { %v4106_v33 = vpop.permute.xlu1 %796  ;;  %1385 = vmatmul.bf16.gmra.mxu2 %v4100_v19  ;;  %v3335_v19 = vld [vmem:[#allocation5 + $0x12c] sm:$0xf0] }
  0xd9   : > { %5270 = vst [vmem:[#allocation58_spill] sm:$0xff] %v4106_v33  ;;  %1474 = vmatmul.bf16.gmra.mxu3 %v4102_v47  ;;  %v3336_v47 = vld [vmem:[#allocation5 + $0x134] sm:$0xf0]  ;;  %v4121_v38 = vor.u32 %v3335_v19, %v3099_v21 }
  0xda   : > { %v506_v33 = vld [vmem:[%s3788_s20 + $0x398] sm:$0xff] }
  0xdb   : > { %v1346_v32 = vpop.f32.mrf.mxu2  ;;  %v4112_v46 = vpop.permute.xlu2 %686  ;;  %5274 = vst [vmem:[#allocation62_spill] sm:$0xff] %v4121_v38 }
  0xdc   : > { %5272 = vst [vmem:[#allocation60_spill] sm:$0xff] %v4112_v46  ;;  %v4114_v48 = vpop.f32.mrf.mxu3  ;;  %v1170_v50 = vpop.f32.mrf.mxu0 }
  0xdd   : > { %v1171_v51 = vadd.f32 %v1170_v50, %v4112_v46  ;;  %v1259_v52 = vpop.f32.mrf.mxu1 }
  0xde   : > { %v4119_v2 = vpop.permute.xlu0 %706 }
  0xdf   : > { %v1260_v53 = vadd.f32 %v1259_v52, %v1171_v51  ;;  %5273 = vst [vmem:[#allocation61_spill] sm:$0xff] %v4119_v2  ;;  %v4125_v52 = vor.u32 %v3336_v47, %v3107_v6 }
  0xe0   : > { %v4117_v0 = vpop.permute.xlu1 %781 }
  0xe1   : > { %5276 = vst [vmem:[#allocation64_spill] sm:$0xff] %v4125_v52 }
  0xe3   : > { %v1348_v17 = vpop.f32.mrf.mxu2 }
  0xe4   : > { %v1349_v50 = vadd.f32 %v1348_v17, %v1260_v53  ;;  %v1437_v46 = vpop.f32.mrf.mxu3  ;;  %v1173_v51 = vpop.f32.mrf.mxu0 }
  0xe5   : > { %v1262_v36 = vpop.f32.mrf.mxu1 }
  0xe6   : > { %v1438_v16 = vadd.f32 %v1437_v46, %v1349_v50  ;;  %v4134_v19 = vpop.permute.xlu0 %691 }
  0xe7   : > { %1212 = vmatmul.bf16.gmra.mxu0 %v4121_v38  ;;  %1301 = vmatmul.bf16.gmra.mxu1 %v4123_v37  ;;  %5279 = vst [vmem:[#allocation67_spill] sm:$0xff] %v4134_v19  ;;  %v1174_v17 = vadd.f32 %v1173_v51, %v4134_v19  ;;  %v3115_v37 = vld [vmem:[#allocation5 + $0x140] sm:$0xf]  ;;  %v3339_v38 = vld [vmem:[#allocation5 + $0x14c] sm:$0xf0] }
  0xe8   : > { %v4131_v15 = vpop.permute.xlu1 %696  ;;  %1390 = vmatmul.bf16.gmra.mxu2 %v4125_v52  ;;  %v3340_v51 = vld [vmem:[#allocation5 + $0x154] sm:$0xf0]  ;;  %v3125_v19 = vld [vmem:[#allocation5 + $0x158] sm:$0xf0]  ;;  %v1937_v60 = vmul.f32 0.1, %v1438_v16 }
  0xe9   : > { %5278 = vst [vmem:[#allocation66_spill] sm:$0xff] %v4131_v15  ;;  %1479 = vmatmul.bf16.gmra.mxu3 %v4127_v35  ;;  %v1263_v40 = vadd.f32 %v1262_v36, %v1174_v17  ;;  %v3117_v35 = vld [vmem:[#allocation5 + $0x150] sm:$0xf0]  ;;  %v3338_v17 = vld [vmem:[#allocation5 + $0x14c] sm:$0xf]  ;;  %vm1873_vm1 = vcmp.gt.f32.partialorder %v1438_v16, 0.0 }
  0xeb   : > { %v1351_v47 = vpop.f32.mrf.mxu2 }
  0xec   : > { %v1440_v6 = vpop.f32.mrf.mxu3  ;;  %v1175_v4 = vpop.f32.mrf.mxu0  ;;  %v1352_v5 = vadd.f32 %v1351_v47, %v1263_v40  ;;  %v4142_v40 = vor.u32 %v3339_v38, %v3115_v37  ;;  %v4144_v47 = vor.u32 %v3337_v14, %v3117_v35 }
  0xed   : > { %v1176_v7 = vadd.f32 %v1175_v4, %v4131_v15  ;;  %v1264_v21 = vpop.f32.mrf.mxu1 }
  0xee   : > { %v1441_v46 = vadd.f32 %v1440_v6, %v1352_v5  ;;  %5281 = vst [vmem:[#allocation69_spill] sm:$0xff] %v4142_v40 }
  0xef   : > { %v1265_v53 = vadd.f32 %v1264_v21, %v1176_v7  ;;  %5282 = vst [vmem:[#allocation70_spill] sm:$0xff] %v4144_v47  ;;  %v4146_v21 = vor.u32 %v3340_v51, %v3123_v13 }
  0xf0   : > { %v4139_v50 = vpop.permute.xlu1 %681  ;;  %v1939_v61 = vmul.f32 0.1, %v1441_v46  ;;  %vm1875_vm0 = vcmp.gt.f32.partialorder %v1441_v46, 0.0 }
  0xf1   : > { %5280 = vst [vmem:[#allocation68_spill] sm:$0xff] %v4139_v50  ;;  %v1169_v52 = vadd.f32 %v1168_v25, %v4139_v50  ;;  %v4149_v50 = vor.u32 %v3338_v17, %v3125_v19 }
  0xf2   : > { %5283 = vst [vmem:[#allocation71_spill] sm:$0xff] %v4146_v21  ;;  %v4156_v14 = vsel %vm1875_vm0, %v1441_v46, %v1939_v61 }
  0xf3   : > { %v1258_v36 = vadd.f32 %v1257_v20, %v1169_v52  ;;  %v1353_v62 = vpop.f32.mrf.mxu2  ;;  %5284 = vst [vmem:[#allocation72_spill] sm:$0xff] %v4149_v50 }
  0xf4   : > { %v1354_v4 = vadd.f32 %v1353_v62, %v1265_v53  ;;  %v1442_v5 = vpop.f32.mrf.mxu3  ;;  %v1178_v7 = vpop.f32.mrf.mxu0 }
  0xf5   : > { %v1347_v6 = vadd.f32 %v1346_v32, %v1258_v36  ;;  %v1179_v25 = vadd.f32 %v1178_v7, %v4064_v3  ;;  %v1267_v15 = vpop.f32.mrf.mxu1  ;;  %v3341_v7 = vld [vmem:[#allocation5 + $0x164] sm:$0xf]  ;;  %v510_v3 = vld [vmem:[%s3788_s20 + $0x3b8] sm:$0xff] }
  0xf6   : > { %v1443_v52 = vadd.f32 %v1442_v5, %v1354_v4  ;;  %v3131_v4 = vld [vmem:[#allocation5 + $0x160] sm:$0xf]  ;;  %v3343_v5 = vld [vmem:[#allocation5 + $0x16c] sm:$0xf0] }
  0xf7   : > { %v1436_v20 = vadd.f32 %v4114_v48, %v1347_v6  ;;  %v1268_v37 = vadd.f32 %v1267_v15, %v1179_v25  ;;  %1217 = vmatmul.bf16.gmra.mxu0 %v4142_v40  ;;  %1306 = vmatmul.bf16.gmra.mxu1 %v4144_v47  ;;  %v4164_v48 = vsel %vm1873_vm1, %v1438_v16, %v1937_v60  ;;  %v3133_v25 = vld [vmem:[#allocation5 + $0x170] sm:$0xf0]  ;;  %v3141_v60 = vld [vmem:[#allocation5 + $0x178] sm:$0xf0]  ;;  %v3352_v40 = vld [vmem:[#allocation5 + $0x1b4] sm:$0xf0] }
  0xf8   : > { %vm1877_vm2 = vcmp.gt.f32.partialorder %v1443_v52, 0.0  ;;  %v1941_v62 = vmul.f32 0.1, %v1443_v52  ;;  %1395 = vmatmul.bf16.gmra.mxu2 %v4146_v21  ;;  %5286 = vst [vmem:[#allocation74_spill] sm:$0xff] %v4164_v48  ;;  %v478_v47 = vld [vmem:[%s3788_s20 + $0x2b8] sm:$0xff] }
  0xf9   : > { %1484 = vmatmul.bf16.gmra.mxu3 %v4149_v50  ;;  %vm1871_vm3 = vcmp.gt.f32.partialorder %v1436_v20, 0.0  ;;  %v1935_v13 = vmul.f32 0.1, %v1436_v20 }
  0xfa   : > { %v4158_v35 = vsel %vm1877_vm2, %v1443_v52, %v1941_v62  ;;  %v3139_v52 = vld [vmem:[#allocation5 + $0x168] sm:$0xf]  ;;  %v3342_v62 = vld [vmem:[#allocation5 + $0x16c] sm:$0xf] }
  0xfb   : > { %v1356_v38 = vpop.f32.mrf.mxu2  ;;  %v4162_v32 = vsel %vm1871_vm3, %v1436_v20, %v1935_v13  ;;  %v3344_v20 = vld [vmem:[#allocation5 + $0x174] sm:$0xf0]  ;;  %v4171_v13 = vor.u32 %v3341_v7, %v3133_v25 }
  0xfc   : > { %5285 = vst [vmem:[#allocation73_spill] sm:$0xff] %v4162_v32  ;;  %v1357_v19 = vadd.f32 %v1356_v38, %v1268_v37  ;;  %v1445_v53 = vpop.f32.mrf.mxu3  ;;  %v1180_v51 = vpop.f32.mrf.mxu0  ;;  %v4169_v37 = vor.u32 %v3343_v5, %v3131_v4 }
  0xfd   : > { %v1181_v17 = vadd.f32 %v1180_v51, %v4119_v2  ;;  %v1269_v61 = vpop.f32.mrf.mxu1  ;;  %5288 = vst [vmem:[#allocation76_spill] sm:$0xff] %v4171_v13  ;;  %v4173_v51 = vor.u32 %v3344_v20, %v3139_v52 }
  0xfe   : > { %v1446_v46 = vadd.f32 %v1445_v53, %v1357_v19  ;;  %5287 = vst [vmem:[#allocation75_spill] sm:$0xff] %v4169_v37 }
  0xff   : > { %v1270_v6 = vadd.f32 %v1269_v61, %v1181_v17  ;;  %5289 = vst [vmem:[#allocation77_spill] sm:$0xff] %v4173_v51  ;;  %v4176_v17 = vor.u32 %v3342_v62, %v3141_v60 }
 0x100   : > { %v1943_v61 = vmul.f32 0.1, %v1446_v46  ;;  %vm1879_vm4 = vcmp.gt.f32.partialorder %v1446_v46, 0.0 }
 0x101   : > { %5290 = vst [vmem:[#allocation78_spill] sm:$0xff] %v4176_v17 }
 0x103   : > { %v1358_v16 = vpop.f32.mrf.mxu2 }
 0x104   : > { %v1359_v38 = vadd.f32 %v1358_v16, %v1270_v6  ;;  %v1447_v36 = vpop.f32.mrf.mxu3  ;;  %v1183_v15 = vpop.f32.mrf.mxu0  ;;  %v4182_v6 = vsel %vm1879_vm4, %v1446_v46, %v1943_v61  ;;  %v3155_v46 = vld [vmem:[#allocation5 + $0x188] sm:$0xf]  ;;  %v3348_v61 = vld [vmem:[#allocation5 + $0x194] sm:$0xf0] }
 0x105   : > { %v1184_v19 = vadd.f32 %v1183_v15, %v4090_v31  ;;  %v1272_v53 = vpop.f32.mrf.mxu1  ;;  %v444_v31 = vld [vmem:[%s3788_s20 + $0x1a8] sm:$0xff] }
 0x106   : > { %v1448_v2 = vadd.f32 %v1447_v36, %v1359_v38  ;;  %v3147_v38 = vld [vmem:[#allocation5 + $0x180] sm:$0xf] }
 0x107   : > { %v1273_v50 = vadd.f32 %v1272_v53, %v1184_v19  ;;  %1222 = vmatmul.bf16.gmra.mxu0 %v4169_v37  ;;  %1311 = vmatmul.bf16.gmra.mxu1 %v4171_v13  ;;  %v3347_v19 = vld [vmem:[#allocation5 + $0x18c] sm:$0xf0]  ;;  %v3345_v53 = vld [vmem:[#allocation5 + $0x184] sm:$0xf]  ;;  %v3165_v37 = vld [vmem:[#allocation5 + $0x1b0] sm:$0xf0] }
 0x108   : > { %vm1881_vm5 = vcmp.gt.f32.partialorder %v1448_v2, 0.0  ;;  %v1945_v4 = vmul.f32 0.1, %v1448_v2  ;;  %1400 = vmatmul.bf16.gmra.mxu2 %v4173_v51  ;;  %v4189_v13 = vor.u32 %v3347_v19, %v3147_v38  ;;  %v422_v19 = vld [vmem:[%s3788_s20 + $0xf8] sm:$0xff] }
 0x109   : > { %1489 = vmatmul.bf16.gmra.mxu3 %v4176_v17  ;;  %v3149_v17 = vld [vmem:[#allocation5 + $0x190] sm:$0xf0] }
 0x10a   : > { %v4184_v15 = vsel %vm1881_vm5, %v1448_v2, %v1945_v4  ;;  %v3346_v2 = vld [vmem:[#allocation5 + $0x18c] sm:$0xf]  ;;  %v3157_v4 = vld [vmem:[#allocation5 + $0x198] sm:$0xf0]  ;;  %5291 = vst [vmem:[#allocation79_spill] sm:$0xff] %v4189_v13  ;;  %v4191_v36 = vor.u32 %v3345_v53, %v3149_v17 }
 0x10b   : > { %v1361_v5 = vpop.f32.mrf.mxu2  ;;  %v452_v53 = vld [vmem:[%s3788_s20 + $0x1e8] sm:$0xff] }
 0x10c   : > { %v1362_v7 = vadd.f32 %v1361_v5, %v1273_v50  ;;  %v1450_v25 = vpop.f32.mrf.mxu3  ;;  %v1185_v52 = vpop.f32.mrf.mxu0  ;;  %5292 = vst [vmem:[#allocation80_spill] sm:$0xff] %v4191_v36 }
 0x10d   : > { %v1186_v20 = vadd.f32 %v1185_v52, %v4055_v41  ;;  %v1274_v62 = vpop.f32.mrf.mxu1 }
 0x10e   : > { %v1451_v60 = vadd.f32 %v1450_v25, %v1362_v7  ;;  %v4193_v7 = vor.u32 %v3348_v61, %v3155_v46  ;;  %v454_v61 = vld [vmem:[%s3788_s20 + $0x1f8] sm:$0xff] }
 0x10f   : > { %v1275_v16 = vadd.f32 %v1274_v62, %v1186_v20  ;;  %v4196_v62 = vor.u32 %v3346_v2, %v3157_v4  ;;  %v484_v2 = vld [vmem:[%s3788_s20 + $0x2e8] sm:$0xff]  ;;  %v486_v4 = vld [vmem:[%s3788_s20 + $0x2f8] sm:$0xff] }
 0x110   : > { %5293 = vst [vmem:[#allocation81_spill] sm:$0xff] %v4193_v7  ;;  %v1947_v41 = vmul.f32 0.1, %v1451_v60  ;;  %vm1883_vm6 = vcmp.gt.f32.partialorder %v1451_v60, 0.0 }
 0x111   : > { %5294 = vst [vmem:[#allocation82_spill] sm:$0xff] %v4196_v62 }
 0x113   : > { %v1363_v51 = vpop.f32.mrf.mxu2 }
 0x114   : > { %v1364_v50 = vadd.f32 %v1363_v51, %v1275_v16  ;;  %v1452_v5 = vpop.f32.mrf.mxu3  ;;  %v1188_v52 = vpop.f32.mrf.mxu0  ;;  %v420_v16 = vld [vmem:[%s3788_s20 + $0xe8] sm:$0xff] }
 0x115   : > { %v1189_v25 = vadd.f32 %v1188_v52, %v4082_v24  ;;  %v1277_v20 = vpop.f32.mrf.mxu1  ;;  %v534_v46 = vpack.c.bf16 %v422_v19, %v420_v16 }
 0x116   : > { %v1453_v38 = vadd.f32 %v1452_v5, %v1364_v50  ;;  %v4208_v50 = vsel %vm1883_vm6, %v1451_v60, %v1947_v41  ;;  %v418_v60 = vld [vmem:[%s3788_s20 + $0xd8] sm:$0xff] }
 0x117   : > { %v1278_v17 = vadd.f32 %v1277_v20, %v1189_v25  ;;  %1227 = vmatmul.bf16.gmra.mxu0 %v4189_v13  ;;  %1316 = vmatmul.bf16.gmra.mxu1 %v4191_v36  ;;  %v550_v25 = vpack.c.bf16 %v454_v61, %v452_v53  ;;  %v566_v20 = vpack.c.bf16 %v486_v4, %v484_v2  ;;  %v518_v36 = vld [vmem:[%s3788_s20 + $0x3f8] sm:$0xff]  ;;  %v480_v4 = vld [vmem:[%s3788_s20 + $0x2c8] sm:$0xff] }
 0x118   : > { %vm1885_vm7 = vcmp.gt.f32.partialorder %v1453_v38, 0.0  ;;  %v1949_v51 = vmul.f32 0.1, %v1453_v38  ;;  %1405 = vmatmul.bf16.gmra.mxu2 %v4193_v7  ;;  %v516_v7 = vld [vmem:[%s3788_s20 + $0x3e8] sm:$0xff]  ;;  %1515 = vmatpush.bf16.msrb.mxu0 %v534_v46  ;;  %v3349_v46 = vld [vmem:[#allocation5 + $0x1a4] sm:$0xf] }
 0x119   : > { %1494 = vmatmul.bf16.gmra.mxu3 %v4196_v62  ;;  %v416_v62 = vld [vmem:[%s3788_s20 + $0xc8] sm:$0xff]  ;;  %v582_v41 = vpack.c.bf16 %v518_v36, %v516_v7  ;;  %1604 = vmatpush.bf16.msrb.mxu1 %v550_v25  ;;  %v3163_v36 = vld [vmem:[#allocation5 + $0x1a0] sm:$0xf]  ;;  %v3351_v7 = vld [vmem:[#allocation5 + $0x1ac] sm:$0xf0]  ;;  %v4242_v59 = vor.u32 %v3349_v46, %v3165_v37 }
 0x11a   : > { %v4210_v5 = vsel %vm1885_vm7, %v1453_v38, %v1949_v51  ;;  %v448_v38 = vld [vmem:[%s3788_s20 + $0x1c8] sm:$0xff]  ;;  %v450_v51 = vld [vmem:[%s3788_s20 + $0x1d8] sm:$0xff]  ;;  %1693 = vmatpush.bf16.msrb.mxu2 %v566_v20  ;;  %v532_v61 = vpack.c.bf16 %v418_v60, %v416_v62 }
 0x11b   : > { %v1366_v52 = vpop.f32.mrf.mxu2  ;;  %v548_v2 = vpack.c.bf16 %v450_v51, %v448_v38  ;;  %1782 = vmatpush.bf16.msrb.mxu3 %v582_v41  ;;  %v514_v20 = vld [vmem:[%s3788_s20 + $0x3d8] sm:$0xff]  ;;  %v3171_v62 = vld [vmem:[#allocation5 + $0x1a8] sm:$0xf]  ;;  %5296 = vst [vmem:[#allocation84_spill] sm:$0xff] %v4242_v59 }
 0x11c   : > { %v1367_v19 = vadd.f32 %v1366_v52, %v1278_v17  ;;  %v1455_v13 = vpop.f32.mrf.mxu3  ;;  %v4217_v24 = vpop.f32.mrf.mxu0  ;;  %v482_v17 = vld [vmem:[%s3788_s20 + $0x2d8] sm:$0xff]  ;;  %v512_v52 = vld [vmem:[%s3788_s20 + $0x3c8] sm:$0xff]  ;;  %1516 = vmatpush.bf16.msrb.mxu0 %v532_v61 }
 0x11d   : > { %v4222_v53 = vpop.f32.mrf.mxu1  ;;  %v564_v25 = vpack.c.bf16 %v482_v17, %v480_v4  ;;  %v580_v60 = vpack.c.bf16 %v514_v20, %v512_v52  ;;  %v412_v38 = vld [vmem:[%s3788_s20 + $0xa8] sm:$0xff]  ;;  %v414_v51 = vld [vmem:[%s3788_s20 + $0xb8] sm:$0xff]  ;;  %1605 = vmatpush.bf16.msrb.mxu1 %v548_v2 }
 0x11e   : > { %v4227_v16 = vadd.f32 %v1455_v13, %v1367_v19  ;;  %v530_v21 = vpack.c.bf16 %v414_v51, %v412_v38  ;;  %v446_v13 = vld [vmem:[%s3788_s20 + $0x1b8] sm:$0xff]  ;;  %v476_v19 = vld [vmem:[%s3788_s20 + $0x2a8] sm:$0xff]  ;;  %v4240_v51 = vor.u32 %v3351_v7, %v3163_v36 }
 0x11f   : > { %1694 = vmatpush.bf16.msrb.mxu2 %v564_v25  ;;  %v546_v41 = vpack.c.bf16 %v446_v13, %v444_v31  ;;  %v562_v4 = vpack.c.bf16 %v478_v47, %v476_v19  ;;  %v508_v17 = vld [vmem:[%s3788_s20 + $0x3a8] sm:$0xff]  ;;  %v3173_v20 = vld [vmem:[#allocation5 + $0x1b8] sm:$0xf0]  ;;  %1783 = vmatpush.bf16.msrb.mxu3 %v580_v60  ;;  %v4251_v13 = vor.u32 %v3352_v40, %v3171_v62 }
 0x120   : > { %v3350_v52 = vld [vmem:[#allocation5 + $0x1ac] sm:$0xf]  ;;  %v578_v61 = vpack.c.bf16 %v510_v3, %v508_v17  ;;  %5295 = vst [vmem:[#allocation83_spill] sm:$0xff] %v4240_v51  ;;  %v410_v2 = vld [vmem:[%s3788_s20 + $0x98] sm:$0xff]  ;;  %1517 = vmatpush.bf16.msrb.mxu0 %v530_v21  ;;  %vm1887_vm15 = vcmp.gt.f32.partialorder %v4227_v16, 0.0 }
 0x121   : > { %v440_v31 = vld [vmem:[%s3788_s20 + $0x188] sm:$0xff]  ;;  %5297 = vst [vmem:[#allocation85_spill] sm:$0xff] %v4251_v13  ;;  %v528_v60 = vpack.c.bf16 %v410_v2, %v408_v34  ;;  %v442_v3 = vld [vmem:[%s3788_s20 + $0x198] sm:$0xff]  ;;  %v4258_v37 = vor.u32 %v3350_v52, %v3173_v20  ;;  %1606 = vmatpush.bf16.msrb.mxu1 %v546_v41 }
 0x122   : > { %v472_v19 = vld [vmem:[%s3788_s20 + $0x288] sm:$0xff]  ;;  %v474_v36 = vld [vmem:[%s3788_s20 + $0x298] sm:$0xff]  ;;  %v544_v46 = vpack.c.bf16 %v442_v3, %v440_v31 }
 0x123   : > { %v4238_v38 = vpop.f32.mrf.mxu2  ;;  %5298 = vst [vmem:[#allocation86_spill] sm:$0xff] %v4258_v37  ;;  %1695 = vmatpush.bf16.msrb.mxu2 %v562_v4  ;;  %v504_v17 = vld [vmem:[%s3788_s20 + $0x388] sm:$0xff]  ;;  %1784 = vmatpush.bf16.msrb.mxu3 %v578_v61  ;;  %v560_v40 = vpack.c.bf16 %v474_v36, %v472_v19  ;;  %v406_v62 = vld [vmem:[%s3788_s20 + $0x78] sm:$0xff] }
 0x124   : > { %v4247_v47 = vpop.f32.mrf.mxu3  ;;  %v4249_v25 = vpop.f32.mrf.mxu0  ;;  %v576_v34 = vpack.c.bf16 %v506_v33, %v504_v17  ;;  %1518 = vmatpush.bf16.msrb.mxu0 %v528_v60  ;;  %v404_v21 = vld [vmem:[%s3788_s20 + $0x68] sm:$0xff]  ;;  %v438_v4 = vld [vmem:[%s3788_s20 + $0x178] sm:$0xff] }
 0x125   : > { %v4256_v7 = vpop.f32.mrf.mxu1  ;;  %1607 = vmatpush.bf16.msrb.mxu1 %v544_v46  ;;  %v436_v41 = vld [vmem:[%s3788_s20 + $0x168] sm:$0xff]  ;;  %v526_v33 = vpack.c.bf16 %v406_v62, %v404_v21  ;;  %v470_v20 = vld [vmem:[%s3788_s20 + $0x278] sm:$0xff] }
 0x126   : > { %v468_v52 = vld [vmem:[%s3788_s20 + $0x268] sm:$0xff]  ;;  %v542_v2 = vpack.c.bf16 %v438_v4, %v436_v41  ;;  %v502_v3 = vld [vmem:[%s3788_s20 + $0x378] sm:$0xff] }
 0x127   : > { %1232 = vmatmul.bf16.gmra.mxu0 %v4240_v51  ;;  %1321 = vmatmul.bf16.gmra.mxu1 %v4242_v59  ;;  %v558_v31 = vpack.c.bf16 %v470_v20, %v468_v52  ;;  %v500_v60 = vld [vmem:[%s3788_s20 + $0x368] sm:$0xff]  ;;  %v434_v21 = vld [vmem:[%s3788_s20 + $0x158] sm:$0xff] }
 0x128   : > { %1410 = vmatmul.bf16.gmra.mxu2 %v4251_v13  ;;  %1785 = vmatpush.bf16.msrb.mxu3 %v576_v34  ;;  %v400_v19 = vld [vmem:[%s3788_s20 + $0x48] sm:$0xff]  ;;  %v574_v17 = vpack.c.bf16 %v502_v3, %v500_v60  ;;  %v466_v20 = vld [vmem:[%s3788_s20 + $0x258] sm:$0xff]  ;;  %v3179_v13 = vld [vmem:[#allocation5 + $0x1c0] sm:$0xf] }
 0x129   : > { %1499 = vmatmul.bf16.gmra.mxu3 %v4258_v37  ;;  %1696 = vmatpush.bf16.msrb.mxu2 %v560_v40  ;;  %v402_v40 = vld [vmem:[%s3788_s20 + $0x58] sm:$0xff]  ;;  %v432_v34 = vld [vmem:[%s3788_s20 + $0x148] sm:$0xff]  ;;  %v3353_v60 = vld [vmem:[#allocation5 + $0x1c4] sm:$0xf] }
 0x12a   : > { %1519 = vmatpush.bf16.msrb.mxu0 %v526_v33  ;;  %1608 = vmatpush.bf16.msrb.mxu1 %v542_v2  ;;  %v524_v41 = vpack.c.bf16 %v402_v40, %v400_v19  ;;  %v540_v4 = vpack.c.bf16 %v434_v21, %v432_v34  ;;  %v464_v52 = vld [vmem:[%s3788_s20 + $0x248] sm:$0xff]  ;;  %v3355_v33 = vld [vmem:[#allocation5 + $0x1cc] sm:$0xf0]  ;;  %v3181_v3 = vld [vmem:[#allocation5 + $0x1d0] sm:$0xf0] }
 0x12b   : > { %v4272_v61 = vpop.f32.mrf.mxu2  ;;  %v496_v37 = vld [vmem:[%s3788_s20 + $0x348] sm:$0xff]  ;;  %v556_v59 = vpack.c.bf16 %v466_v20, %v464_v52  ;;  %v498_v2 = vld [vmem:[%s3788_s20 + $0x358] sm:$0xff] }
 0x12c   : > { %v4277_v36 = vpop.f32.mrf.mxu3  ;;  %v4279_v46 = vpop.f32.mrf.mxu0  ;;  %1786 = vmatpush.bf16.msrb.mxu3 %v574_v17  ;;  %v3187_v19 = vld [vmem:[#allocation5 + $0x1c8] sm:$0xf]  ;;  %v572_v40 = vpack.c.bf16 %v498_v2, %v496_v37  ;;  %v398_v21 = vld [vmem:[%s3788_s20 + $0x38] sm:$0xff]  ;;  %v3354_v20 = vld [vmem:[#allocation5 + $0x1cc] sm:$0xf]  ;;  %v554_v37 = vpack.c.bf16 %v462_v42, %v460_v43 }
 0x12d   : > { %v4284_v62 = vpop.f32.mrf.mxu1  ;;  %1697 = vmatpush.bf16.msrb.mxu2 %v558_v31  ;;  %v396_v34 = vld [vmem:[%s3788_s20 + $0x28] sm:$0xff]  ;;  %v494_v52 = vld [vmem:[%s3788_s20 + $0x338] sm:$0xff] }
 0x12e   : > { %v428_v51 = vld [vmem:[%s3788_s20 + $0x128] sm:$0xff]  ;;  %1520 = vmatpush.bf16.msrb.mxu0 %v524_v41  ;;  %v522_v45 = vpack.c.bf16 %v398_v21, %v396_v34  ;;  %1609 = vmatpush.bf16.msrb.mxu1 %v540_v4  ;;  %v4300_v34 = vor.u32 %v3355_v33, %v3179_v13  ;;  %v4302_v21 = vor.u32 %v3353_v60, %v3181_v3  ;;  %v426_v42 = vld [vmem:[%s3788_s20 + $0x118] sm:$0xff] }
 0x12f   : > { %v538_v31 = vpack.c.bf16 %v430_v44, %v428_v51  ;;  %v492_v17 = vld [vmem:[%s3788_s20 + $0x328] sm:$0xff]  ;;  %v394_v44 = vld [vmem:[%s3788_s20 + $0x18] sm:$0xff]  ;;  %v4314_v13 = vor.u32 %v3354_v20, %v3189_v26  ;;  %v3359_v20 = vld [vmem:[#allocation5 + $0x1ec] sm:$0xf0] }
 0x130   : > { %1787 = vmatpush.bf16.msrb.mxu3 %v572_v40  ;;  %v570_v41 = vpack.c.bf16 %v494_v52, %v492_v17  ;;  %v392_v4 = vld [vmem:[%s3788_s20 + $0x8] sm:$0xff]  ;;  %v458_v17 = vld [vmem:[%s3788_s20 + $0x218] sm:$0xff] }
 0x131   : > { %1698 = vmatpush.bf16.msrb.mxu2 %v556_v59  ;;  %v424_v51 = vld [vmem:[%s3788_s20 + $0x108] sm:$0xff]  ;;  %v4309_v59 = vor.u32 %v3356_v39, %v3187_v19  ;;  %v520_v40 = vpack.c.bf16 %v394_v44, %v392_v4  ;;  %5300 = vst [vmem:[#allocation88_spill] sm:$0xff] %v4314_v13  ;;  %v490_v3 = vld [vmem:[%s3788_s20 + $0x318] sm:$0xff] }
 0x132   : > { %1521 = vmatpush.bf16.msrb.mxu0 %v522_v45  ;;  %v456_v43 = vld [vmem:[%s3788_s20 + $0x208] sm:$0xff]  ;;  %1610 = vmatpush.bf16.msrb.mxu1 %v538_v31  ;;  %v536_v33 = vpack.c.bf16 %v426_v42, %v424_v51  ;;  %v3195_v31 = vld [vmem:[#allocation5 + $0x1e0] sm:$0xf]  ;;  %v3360_v44 = vld [vmem:[#allocation5 + $0x1f4] sm:$0xf0] }
 0x133   : > { %v4298_v2 = vpop.f32.mrf.mxu2  ;;  %5299 = vst [vmem:[#allocation87_spill] sm:$0xff] %v4309_v59  ;;  %v488_v60 = vld [vmem:[%s3788_s20 + $0x308] sm:$0xff]  ;;  %v552_v30 = vpack.c.bf16 %v458_v17, %v456_v43  ;;  %v3205_v42 = vld [vmem:[#allocation5 + $0x1f8] sm:$0xf0]  ;;  %v4322_v17 = vor.u32 %v3359_v20, %v3195_v31  ;;  %s3553_s20 = scalar_lea.hbm %s3552_s30, 16 }
 0x134   : > { %v4307_v32 = vpop.f32.mrf.mxu3  ;;  %v1198_v48 = vpop.f32.mrf.mxu0  ;;  %1788 = vmatpush.bf16.msrb.mxu3 %v570_v41  ;;  %v568_v29 = vpack.c.bf16 %v490_v3, %v488_v60  ;;  %v3197_v41 = vld [vmem:[#allocation5 + $0x1f0] sm:$0xf0]  ;;  %v3203_v4 = vld [vmem:[#allocation5 + $0x1e8] sm:$0xf]  ;;  %v3358_v51 = vld [vmem:[#allocation5 + $0x1ec] sm:$0xf]  ;;  %p3554_p1 = scmp.ne.s32.totalorder %s3552_s30, %s3553_s20  ;;  %p3559_p12 = scmp.lt.s32.totalorder %s3557_s14, %s3553_s20 }
 0x135   : > { %v1287_v52 = vpop.f32.mrf.mxu1  ;;  %1699 = vmatpush.bf16.msrb.mxu2 %v554_v37  ;;  %v3357_v37 = vld [vmem:[#allocation5 + $0x1e4] sm:$0xf]  ;;  %5301 = vst [vmem:[#allocation89_spill] sm:$0xff] %v4322_v17  ;;  %v4328_v3 = vor.u32 %v3358_v51, %v3205_v42  ;;  %v1199_v31 = vadd.f32 %v1198_v48, %v3997_v54  ;;  %v1194_v51 = vadd.f32 %v4249_v25, %v4013_v8 }
 0x136   : > { %1522 = vmatpush.bf16.msrb.mxu0 %v520_v40  ;;  %1611 = vmatpush.bf16.msrb.mxu1 %v536_v33  ;;  %v4324_v40 = vor.u32 %v3357_v37, %v3197_v41  ;;  %v1196_v42 = vadd.f32 %v4279_v46, %v4062_v49  ;;  %v1191_v48 = vadd.f32 %v4217_v24, %v4079_v23  ;;  %p3555_p4 = pnand %p3554_p1, %p3761_p5  ;;  %p3560_p13 = por %p3559_p12, %p3558_p10 }
 0x137   : > { %1237 = vmatmul.bf16.gmra.mxu0 %v4300_v34  ;;  %1326 = vmatmul.bf16.gmra.mxu1 %v4302_v21  ;;  %5304 = vst [vmem:[#allocation92_spill] sm:$0xff] %v4328_v3 }
 0x138   : > { %1415 = vmatmul.bf16.gmra.mxu2 %v4309_v59  ;;  %1789 = vmatpush.bf16.msrb.mxu3 %v568_v29  ;;  %5302 = vst [vmem:[#allocation90_spill] sm:$0xff] %v4324_v40  ;;  %v4326_v29 = vor.u32 %v3360_v44, %v3203_v4  ;;  %v4334_v59 = vpop.permute.xlu0 %776  ;;  %p3556_p8 = pneg %p3555_p4 }
 0x139   : > { %1504 = vmatmul.bf16.gmra.mxu3 %v4314_v13  ;;  %1700 = vmatpush.bf16.msrb.mxu2 %v552_v30 }
 0x13a   : > { %5303 = vst [vmem:[#allocation91_spill] sm:$0xff] %v4326_v29  ;;  %p3561_p0 = pnand %p3560_p13, %p3556_p8 }
 0x13b   : > { %v1376_v45 = vpop.f32.mrf.mxu2 }
 0x13c   : > { %v1465_v39 = vpop.f32.mrf.mxu3  ;;  %v1200_v26 = vpop.f32.mrf.mxu0 }
 0x13d   : > { %v1289_v19 = vpop.f32.mrf.mxu1  ;;  %v1201_v20 = vadd.f32 %v1200_v26, %v4011_v63  ;;  %v1285_v26 = vadd.f32 %v4284_v62, %v1196_v42 }
 0x140   : > { %v4348_v8 = vpop.permute.xlu0 %761 }
 0x143   : > { %v1378_v43 = vpop.f32.mrf.mxu2 }
 0x144   : > { %v1467_v33 = vpop.f32.mrf.mxu3  ;;  %v1203_v30 = vpop.f32.mrf.mxu0 }
 0x145   : > { %v1292_v60 = vpop.f32.mrf.mxu1  ;;  %v1204_v13 = vadd.f32 %v1203_v30, %v4027_v18 }
 0x147   : > { %1242 = vmatmul.bf16.gmra.mxu0 %v4322_v17  ;;  %1331 = vmatmul.bf16.gmra.mxu1 %v4324_v40  ;;  %v1293_v37 = vadd.f32 %v1292_v60, %v1204_v13  ;;  %v1290_v40 = vadd.f32 %v1289_v19, %v1201_v20  ;;  %v1283_v13 = vadd.f32 %v4256_v7, %v1194_v51 }
 0x148   : > { %1420 = vmatmul.bf16.gmra.mxu2 %v4326_v29  ;;  %v1288_v29 = vadd.f32 %v1287_v52, %v1199_v31  ;;  %v1374_v52 = vadd.f32 %v4298_v2, %v1285_v26 }
 0x149   : > { %1509 = vmatmul.bf16.gmra.mxu3 %v4328_v3  ;;  %v1379_v18 = vadd.f32 %v1378_v43, %v1290_v40  ;;  %v1280_v43 = vadd.f32 %v4222_v53, %v1191_v48  ;;  %v1372_v7 = vadd.f32 %v4272_v61, %v1283_v13 }
 0x14a   : > { %v1377_v60 = vadd.f32 %v1376_v45, %v1288_v29  ;;  %v1463_v2 = vadd.f32 %v4307_v32, %v1374_v52 }
 0x14b   : > { %v1381_v41 = vpop.f32.mrf.mxu2  ;;  %v1468_v19 = vadd.f32 %v1467_v33, %v1379_v18  ;;  %v1369_v29 = vadd.f32 %v4238_v38, %v1280_v43  ;;  %v1461_v61 = vadd.f32 %v4277_v36, %v1372_v7 }
 0x14c   : > { %v1470_v4 = vpop.f32.mrf.mxu3  ;;  %v1205_v44 = vpop.f32.mrf.mxu0  ;;  %v1382_v17 = vadd.f32 %v1381_v41, %v1293_v37  ;;  %v1466_v62 = vadd.f32 %v1465_v39, %v1377_v60  ;;  %vm1893_vm12 = vcmp.gt.f32.partialorder %v1463_v2, 0.0 }
 0x14d   : > { %v1294_v30 = vpop.f32.mrf.mxu1  ;;  %v1206_v3 = vadd.f32 %v1205_v44, %v4035_v22  ;;  %v1961_v33 = vmul.f32 0.1, %v1468_v19  ;;  %vm1897_vm10 = vcmp.gt.f32.partialorder %v1468_v19, 0.0  ;;  %v4361_v41 = vpop.permute.xlu1 %766  ;;  %v1458_v32 = vadd.f32 %v4247_v47, %v1369_v29 }
 0x14e   : > { %v1471_v63 = vadd.f32 %v1470_v4, %v1382_v17  ;;  %v1959_v39 = vmul.f32 0.1, %v1466_v62  ;;  %vm1895_vm11 = vcmp.gt.f32.partialorder %v1466_v62, 0.0  ;;  %v1957_v4 = vmul.f32 0.1, %v1463_v2 }
 0x14f   : > { %v1295_v25 = vadd.f32 %v1294_v30, %v1206_v3  ;;  %v1955_v36 = vmul.f32 0.1, %v1461_v61  ;;  %vm1891_vm13 = vcmp.gt.f32.partialorder %v1461_v61, 0.0  ;;  %v1953_v60 = vmul.f32 0.1, %v1458_v32 }
 0x150   : > { %v1963_v45 = vmul.f32 0.1, %v1471_v63  ;;  %vm1899_vm8 = vcmp.gt.f32.partialorder %v1471_v63, 0.0  ;;  %v2023_v48 = vsel %vm1895_vm11, %v1466_v62, %v1959_v39  ;;  %vm1889_vm14 = vcmp.gt.f32.partialorder %v1458_v32, 0.0 }
 0x151   : > { %v1951_v47 = vmul.f32 0.1, %v4227_v16  ;;  %v2017_v43 = vsel %vm1889_vm14, %v1458_v32, %v1953_v60 }
 0x152   : > { %v2027_v38 = vsel %vm1899_vm8, %v1471_v63, %v1963_v45 }
 0x153   : > { %v1383_v46 = vpop.f32.mrf.mxu2  ;;  %v2015_v45 = vsel %vm1887_vm15, %v4227_v16, %v1951_v47  ;;  %v5340_v16 = vld [vmem:[#allocation44_spill] sm:$0xff] }
 0x154   : > { %v1384_v31 = vadd.f32 %v1383_v46, %v1295_v25  ;;  %v1472_v20 = vpop.f32.mrf.mxu3  ;;  %v1208_v37 = vpop.f32.mrf.mxu0  ;;  %v2021_v25 = vsel %vm1893_vm12, %v1463_v2, %v1957_v4  ;;  %v2019_v46 = vsel %vm1891_vm13, %v1461_v61, %v1955_v36  ;;  %v2071_v29 = vpack.c.bf16 %v2017_v43, %v2015_v45  ;;  %v5310_v36 = vld [vmem:[#allocation74_spill] sm:$0xff] }
 0x155   : > { %v1297_v40 = vpop.f32.mrf.mxu1  ;;  %v1209_v24 = vadd.f32 %v1208_v37, %v4348_v8 }
 0x156   : > { %v1473_v17 = vadd.f32 %v1472_v20, %v1384_v31 }
 0x157   : > { %1523 = vmatmul.bf16.vlgmr.msrb.gmra.mxu0 %v3904_v55  ;;  %1612 = vmatmul.bf16.vlgmr.msrb.gmra.mxu1 %v3906_v56  ;;  %v1298_v18 = vadd.f32 %v1297_v40, %v1209_v24 }
 0x158   : > { %vm1901_vm9 = vcmp.gt.f32.partialorder %v1473_v17, 0.0  ;;  %v1965_v53 = vmul.f32 0.1, %v1473_v17  ;;  %1701 = vmatmul.bf16.vlgmr.msrb.gmra.mxu2 %v3908_v57  ;;  %v2025_v57 = vsel %vm1897_vm10, %v1468_v19, %v1961_v33  ;;  %v2073_v19 = vpack.c.bf16 %v2021_v25, %v2019_v46  ;;  %v5313_v25 = vld [vmem:[#allocation51_spill] sm:$0xff] }
 0x159   : > { %1790 = vmatmul.bf16.vlgmr.msrb.gmra.mxu3 %v3910_v58  ;;  %v2075_v26 = vpack.c.bf16 %v2025_v57, %v2023_v48  ;;  %v5307_v57 = vpack.c.bf16 %v4158_v35, %v4156_v14 }
 0x15a   : > { %v2029_v3 = vsel %vm1901_vm9, %v1473_v17, %v1965_v53 }
 0x15b   : > { %v2077_v55 = vpack.c.bf16 %v2029_v3, %v2027_v38  ;;  %v1386_v56 = vpop.f32.mrf.mxu2 }
 0x15c   : > { %v1387_v44 = vadd.f32 %v1386_v56, %v1298_v18  ;;  %v1475_v51 = vpop.f32.mrf.mxu3  ;;  %v1210_v42 = vpop.f32.mrf.mxu0 }
 0x15d   : > { %v1211_v58 = vadd.f32 %v1210_v42, %v4361_v41  ;;  %v1299_v30 = vpop.f32.mrf.mxu1  ;;  %2287 = vmatpush.bf16.msra.mxu0 %v2077_v55  ;;  %v5306_v55 = vpack.c.bf16 %v4184_v15, %v4182_v6  ;;  %v5308_v15 = vld [vmem:[#allocation16_spill] sm:$0xff] }
 0x15e   : > { %v1476_v63 = vadd.f32 %v1475_v51, %v1387_v44 }
 0x15f   : > { %v1300_v13 = vadd.f32 %v1299_v30, %v1211_v58  ;;  %v5309_v30 = vld [vmem:[#allocation17_spill] sm:$0xff] }
 0x160   : > { %v1967_v7 = vmul.f32 0.1, %v1476_v63  ;;  %vm1903_vm0 = vcmp.gt.f32.partialorder %v1476_v63, 0.0 }
 0x161   : > { %2288 = vmatpush.bf16.msra.mxu0 %v2075_v26 }
 0x162   : > { %v4373_v2 = vsel %vm1903_vm0, %v1476_v63, %v1967_v7  ;;  %v5311_v63 = vld [vmem:[#allocation73_spill] sm:$0xff] }
 0x163   : > { %v1388_v52 = vpop.f32.mrf.mxu2  ;;  %v5312_v48 = vpack.c.bf16 %v5310_v36, %v5311_v63 }
 0x164   : > { %v1389_v31 = vadd.f32 %v1388_v52, %v1300_v13  ;;  %v1477_v20 = vpop.f32.mrf.mxu3  ;;  %v1213_v37 = vpop.f32.mrf.mxu0 }
 0x165   : > { %v1214_v40 = vadd.f32 %v1213_v37, %v4094_v1  ;;  %v1302_v24 = vpop.f32.mrf.mxu1  ;;  %2289 = vmatpush.bf16.msra.mxu0 %v2073_v19 }
 0x166   : > { %v1478_v62 = vadd.f32 %v1477_v20, %v1389_v31 }
 0x167   : > { %v1303_v17 = vadd.f32 %v1302_v24, %v1214_v40  ;;  %1528 = vmatmul.bf16.gmra.mxu0 %v3934_v9  ;;  %1617 = vmatmul.bf16.gmra.mxu1 %v3936_v10  ;;  %v5314_v40 = vld [vmem:[#allocation59_spill] sm:$0xff] }
 0x168   : > { %vm1905_vm1 = vcmp.gt.f32.partialorder %v1478_v62, 0.0  ;;  %v1969_v18 = vmul.f32 0.1, %v1478_v62  ;;  %1706 = vmatmul.bf16.gmra.mxu2 %v3938_v11  ;;  %v5305_v11 = vpack.c.bf16 %v4210_v5, %v4208_v50 }
 0x169   : > { %1795 = vmatmul.bf16.gmra.mxu3 %v3940_v12  ;;  %2290 = vmatpush.bf16.msra.mxu0 %v2071_v29  ;;  %v5315_v29 = vld [vmem:[#allocation18_spill] sm:$0xff] }
 0x16a   : > { %v4375_v33 = vsel %vm1905_vm1, %v1478_v62, %v1969_v18  ;;  %v5316_v18 = vld [vmem:[#allocation19_spill] sm:$0xff] }
 0x16b   : > { %v1391_v53 = vpop.f32.mrf.mxu2 }
 0x16c   : > { %v1392_v61 = vadd.f32 %v1391_v53, %v1303_v17  ;;  %v1480_v9 = vpop.f32.mrf.mxu3  ;;  %v1215_v39 = vpop.f32.mrf.mxu0 }
 0x16d   : > { %v1216_v10 = vadd.f32 %v1215_v39, %v4334_v59  ;;  %v1304_v38 = vpop.f32.mrf.mxu1  ;;  %2291 = vmatpush.bf16.msra.mxu0 %v5305_v11  ;;  %v5341_v11 = vld [vmem:[#allocation34_spill] sm:$0xff] }
 0x16e   : > { %v1481_v12 = vadd.f32 %v1480_v9, %v1392_v61  ;;  %v5317_v61 = vld [vmem:[#allocation20_spill] sm:$0xff]  ;;  %v5318_v9 = vld [vmem:[#allocation21_spill] sm:$0xff] }
 0x16f   : > { %v1305_v3 = vadd.f32 %v1304_v38, %v1216_v10 }
 0x170   : > { %v1971_v58 = vmul.f32 0.1, %v1481_v12  ;;  %vm1907_vm2 = vcmp.gt.f32.partialorder %v1481_v12, 0.0 }
 0x171   : > { %2292 = vmatpush.bf16.msra.mxu0 %v5306_v55 }
 0x172   : > { %v4397_v14 = vsel %vm1907_vm2, %v1481_v12, %v1971_v58 }
 0x173   : > { %v1393_v56 = vpop.f32.mrf.mxu2 }
 0x174   : > { %v1394_v32 = vadd.f32 %v1393_v56, %v1305_v3  ;;  %v1482_v4 = vpop.f32.mrf.mxu3  ;;  %v1218_v44 = vpop.f32.mrf.mxu0  ;;  %v5319_v56 = vld [vmem:[#allocation58_spill] sm:$0xff] }
 0x175   : > { %v1219_v51 = vadd.f32 %v1218_v44, %v4117_v0  ;;  %v1307_v42 = vpop.f32.mrf.mxu1  ;;  %2293 = vmatpush.bf16.msra.mxu0 %v5307_v57 }
 0x176   : > { %v1483_v50 = vadd.f32 %v1482_v4, %v1394_v32 }
 0x177   : > { %v1308_v5 = vadd.f32 %v1307_v42, %v1219_v51  ;;  %1533 = vmatmul.bf16.gmra.mxu0 %v3964_v27  ;;  %1622 = vmatmul.bf16.gmra.mxu1 %v3966_v28 }
 0x178   : > { %vm1909_vm3 = vcmp.gt.f32.partialorder %v1483_v50, 0.0  ;;  %v1973_v6 = vmul.f32 0.1, %v1483_v50  ;;  %1711 = vmatmul.bf16.gmra.mxu2 %v5308_v15 }
 0x179   : > { %1800 = vmatmul.bf16.gmra.mxu3 %v5309_v30  ;;  %2294 = vmatpush.bf16.msra.mxu0 %v5312_v48  ;;  %v5321_v48 = vld [vmem:[#allocation22_spill] sm:$0xff] }
 0x17a   : > { %v4399_v35 = vsel %vm1909_vm3, %v1483_v50, %v1973_v6 }
 0x17b   : > { %v1396_v13 = vpop.f32.mrf.mxu2 }
 0x17c   : > { %v1397_v26 = vadd.f32 %v1396_v13, %v1308_v5  ;;  %v1485_v28 = vpop.f32.mrf.mxu3  ;;  %v1220_v60 = vpop.f32.mrf.mxu0  ;;  %v5320_v5 = vld [vmem:[#allocation36_spill] sm:$0xff]  ;;  %v5322_v13 = vld [vmem:[#allocation23_spill] sm:$0xff] }
 0x17d   : > { %v1221_v47 = vadd.f32 %v1220_v60, %v5313_v25  ;;  %v1309_v46 = vpop.f32.mrf.mxu1  ;;  %v5324_v60 = vld [vmem:[#allocation25_spill] sm:$0xff] }
 0x17e   : > { %v1486_v52 = vadd.f32 %v1485_v28, %v1397_v26  ;;  %v5323_v28 = vld [vmem:[#allocation24_spill] sm:$0xff] }
 0x17f   : > { %v1310_v19 = vadd.f32 %v1309_v46, %v1221_v47 }
 0x180   : > { %v1975_v62 = vmul.f32 0.1, %v1486_v52  ;;  %vm1911_vm4 = vcmp.gt.f32.partialorder %v1486_v52, 0.0 }
 0x182   : > { %v4409_v39 = vsel %vm1911_vm4, %v1486_v52, %v1975_v62 }
 0x183   : > { %v1398_v31 = vpop.f32.mrf.mxu2 }
 0x184   : > { %v1399_v20 = vadd.f32 %v1398_v31, %v1310_v19  ;;  %v1487_v37 = vpop.f32.mrf.mxu3  ;;  %v1223_v43 = vpop.f32.mrf.mxu0 }
 0x185   : > { %v1224_v24 = vadd.f32 %v1223_v43, %v5314_v40  ;;  %v1312_v7 = vpop.f32.mrf.mxu1 }
 0x186   : > { %v1488_v45 = vadd.f32 %v1487_v37, %v1399_v20 }
 0x187   : > { %v1313_v17 = vadd.f32 %v1312_v7, %v1224_v24  ;;  %1538 = vmatmul.bf16.gmra.mxu0 %v5315_v29  ;;  %1627 = vmatmul.bf16.gmra.mxu1 %v5316_v18  ;;  %v5325_v29 = vld [vmem:[#allocation28_spill] sm:$0xff]  ;;  %v5326_v18 = vld [vmem:[#allocation29_spill] sm:$0xff] }
 0x188   : > { %vm1913_vm5 = vcmp.gt.f32.partialorder %v1488_v45, 0.0  ;;  %v1977_v53 = vmul.f32 0.1, %v1488_v45  ;;  %1716 = vmatmul.bf16.gmra.mxu2 %v5317_v61  ;;  %v5328_v61 = vld [vmem:[#allocation31_spill] sm:$0xff] }
 0x189   : > { %1805 = vmatmul.bf16.gmra.mxu3 %v5318_v9 }
 0x18a   : > { %v4411_v10 = vsel %vm1913_vm5, %v1488_v45, %v1977_v53  ;;  %v5327_v53 = vld [vmem:[#allocation30_spill] sm:$0xff] }
 0x18b   : > { %v1401_v38 = vpop.f32.mrf.mxu2 }
 0x18c   : > { %v1402_v12 = vadd.f32 %v1401_v38, %v1313_v17  ;;  %v1490_v3 = vpop.f32.mrf.mxu3  ;;  %v1225_v55 = vpop.f32.mrf.mxu0 }
 0x18d   : > { %v1226_v32 = vadd.f32 %v1225_v55, %v5319_v56  ;;  %v1314_v4 = vpop.f32.mrf.mxu1 }
 0x18e   : > { %v1491_v44 = vadd.f32 %v1490_v3, %v1402_v12 }
 0x18f   : > { %v1315_v51 = vadd.f32 %v1314_v4, %v1226_v32 }
 0x190   : > { %v1979_v30 = vmul.f32 0.1, %v1491_v44  ;;  %vm1915_vm6 = vcmp.gt.f32.partialorder %v1491_v44, 0.0 }
 0x192   : > { %v4421_v47 = vsel %vm1915_vm6, %v1491_v44, %v1979_v30 }
 0x193   : > { %v1403_v42 = vpop.f32.mrf.mxu2 }
 0x194   : > { %v1404_v57 = vadd.f32 %v1403_v42, %v1315_v51  ;;  %v1492_v58 = vpop.f32.mrf.mxu3  ;;  %v1228_v50 = vpop.f32.mrf.mxu0  ;;  %v5329_v51 = vld [vmem:[#allocation37_spill] sm:$0xff]  ;;  %v5330_v42 = vld [vmem:[#allocation38_spill] sm:$0xff] }
 0x195   : > { %v1229_v6 = vadd.f32 %v1228_v50, %v5320_v5  ;;  %v1317_v15 = vpop.f32.mrf.mxu1  ;;  %v5342_v5 = vld [vmem:[#allocation35_spill] sm:$0xff] }
 0x196   : > { %v1493_v36 = vadd.f32 %v1492_v58, %v1404_v57  ;;  %v5331_v57 = vld [vmem:[#allocation39_spill] sm:$0xff]  ;;  %v5332_v58 = vld [vmem:[#allocation40_spill] sm:$0xff] }
 0x197   : > { %v1318_v63 = vadd.f32 %v1317_v15, %v1229_v6  ;;  %1543 = vmatmul.bf16.gmra.mxu0 %v5321_v48  ;;  %1632 = vmatmul.bf16.gmra.mxu1 %v5322_v13 }
 0x198   : > { %vm1917_vm7 = vcmp.gt.f32.partialorder %v1493_v36, 0.0  ;;  %v1981_v26 = vmul.f32 0.1, %v1493_v36  ;;  %1721 = vmatmul.bf16.gmra.mxu2 %v5323_v28 }
 0x199   : > { %1810 = vmatmul.bf16.gmra.mxu3 %v5324_v60  ;;  %v5334_v60 = vld [vmem:[#allocation46_spill] sm:$0xff] }
 0x19a   : > { %v4423_v46 = vsel %vm1917_vm7, %v1493_v36, %v1981_v26  ;;  %v5333_v26 = vld [vmem:[#allocation32_spill] sm:$0xff] }
 0x19b   : > { %v1406_v52 = vpop.f32.mrf.mxu2 }
 0x19c   : > { %v1407_v31 = vadd.f32 %v1406_v52, %v1318_v63  ;;  %v1495_v20 = vpop.f32.mrf.mxu3  ;;  %v1230_v37 = vpop.f32.mrf.mxu0  ;;  %v5335_v52 = vld [vmem:[#allocation47_spill] sm:$0xff] }
 0x19d   : > { %v4427_v43 = vpop.f32.mrf.mxu1 }
 0x19e   : > { %v4429_v24 = vadd.f32 %v1495_v20, %v1407_v31  ;;  %v5336_v31 = vld [vmem:[#allocation48_spill] sm:$0xff]  ;;  %v5337_v20 = vld [vmem:[#allocation49_spill] sm:$0xff] }
 0x1a0   : > { %vm1919_vm15 = vcmp.gt.f32.partialorder %v4429_v24, 0.0 }
 0x1a3   : > { %v4431_v7 = vpop.f32.mrf.mxu2 }
 0x1a4   : > { %v4433_v62 = vpop.f32.mrf.mxu3  ;;  %v1233_v45 = vpop.f32.mrf.mxu0 }
 0x1a5   : > { %v1322_v17 = vpop.f32.mrf.mxu1  ;;  %v1234_v27 = vadd.f32 %v1233_v45, %v5340_v16  ;;  %v2123_v45 = vld [vmem:[%s5110_s4 + $0x60] sm:$0xff] }
 0x1a6   : > { %2189 = vperm.xlu1 %3475, %v2123_v45  }
 0x1a7   : > { %1548 = vmatmul.bf16.gmra.mxu0 %v5325_v29  ;;  %1637 = vmatmul.bf16.gmra.mxu1 %v5326_v18  ;;  %v5338_v29 = vld [vmem:[#allocation42_spill] sm:$0xff] }
 0x1a8   : > { %1726 = vmatmul.bf16.gmra.mxu2 %v5327_v53  ;;  %v5339_v53 = vld [vmem:[#allocation41_spill] sm:$0xff] }
 0x1a9   : > { %1815 = vmatmul.bf16.gmra.mxu3 %v5328_v61 }
 0x1ab   : > { %v1411_v9 = vpop.f32.mrf.mxu2 }
 0x1ac   : > { %v4439_v38 = vpop.f32.mrf.mxu3  ;;  %v1235_v12 = vpop.f32.mrf.mxu0 }
 0x1ad   : > { %v1324_v3 = vpop.f32.mrf.mxu1 }
 0x1b3   : > { %v1413_v55 = vpop.f32.mrf.mxu2 }
 0x1b4   : > { %v1502_v32 = vpop.f32.mrf.mxu3  ;;  %v1238_v4 = vpop.f32.mrf.mxu0 }
 0x1b5   : > { %v1327_v44 = vpop.f32.mrf.mxu1  ;;  %v1239_v18 = vadd.f32 %v1238_v4, %v5338_v29  ;;  %v1323_v4 = vadd.f32 %v1322_v17, %v1234_v27 }
 0x1b7   : > { %1553 = vmatmul.bf16.gmra.mxu0 %v5329_v51  ;;  %1642 = vmatmul.bf16.gmra.mxu1 %v5330_v42 }
 0x1b8   : > { %1731 = vmatmul.bf16.gmra.mxu2 %v5331_v57 }
 0x1b9   : > { %1820 = vmatmul.bf16.gmra.mxu3 %v5332_v58 }
 0x1bb   : > { %v1416_v50 = vpop.f32.mrf.mxu2 }
 0x1bc   : > { %v1505_v6 = vpop.f32.mrf.mxu3  ;;  %v1240_v15 = vpop.f32.mrf.mxu0 }
 0x1bd   : > { %v1329_v30 = vpop.f32.mrf.mxu1  ;;  %v1241_v61 = vadd.f32 %v1240_v15, %v5339_v53  ;;  %v2126_v15 = vld [vmem:[%s5110_s4 + $0x78] sm:$0xff] }
 0x1be   : > { %2204 = vperm.xlu0 %3474, %v2126_v15  }
 0x1c3   : > { %v1418_v36 = vpop.f32.mrf.mxu2 }
 0x1c4   : > { %v1507_v63 = vpop.f32.mrf.mxu3  ;;  %v1243_v48 = vpop.f32.mrf.mxu0 }
 0x1c5   : > { %v1332_v13 = vpop.f32.mrf.mxu1  ;;  %v1244_v28 = vadd.f32 %v1243_v48, %v5333_v26  ;;  %v1236_v48 = vadd.f32 %v1235_v12, %v5341_v11  ;;  %v1330_v26 = vadd.f32 %v1329_v30, %v1241_v61 }
 0x1c7   : > { %1558 = vmatmul.bf16.gmra.mxu0 %v5334_v60  ;;  %1647 = vmatmul.bf16.gmra.mxu1 %v5335_v52  ;;  %v1333_v51 = vadd.f32 %v1332_v13, %v1244_v28  ;;  %v1328_v60 = vadd.f32 %v1327_v44, %v1239_v18  ;;  %v1419_v56 = vadd.f32 %v1418_v36, %v1330_v26 }
 0x1c8   : > { %1736 = vmatmul.bf16.gmra.mxu2 %v5336_v31  ;;  %v1325_v29 = vadd.f32 %v1324_v3, %v1236_v48  ;;  %v5344_v3 = vld [vmem:[#allocation68_spill] sm:$0xff] }
 0x1c9   : > { %1825 = vmatmul.bf16.gmra.mxu3 %v5337_v20  ;;  %v5343_v20 = vld [vmem:[#allocation53_spill] sm:$0xff]  ;;  %v1417_v12 = vadd.f32 %v1416_v50, %v1328_v60  ;;  %v1508_v36 = vadd.f32 %v1507_v63, %v1419_v56 }
 0x1ca   : > { %v1231_v40 = vadd.f32 %v1230_v37, %v5343_v20  ;;  %v1414_v28 = vadd.f32 %v1413_v55, %v1325_v29  ;;  %v5346_v55 = vld [vmem:[#allocation55_spill] sm:$0xff] }
 0x1cb   : > { %v1421_v42 = vpop.f32.mrf.mxu2  ;;  %v1993_v63 = vmul.f32 0.1, %v1508_v36  ;;  %vm1929_vm10 = vcmp.gt.f32.partialorder %v1508_v36, 0.0 }
 0x1cc   : > { %v1510_v57 = vpop.f32.mrf.mxu3  ;;  %v1245_v58 = vpop.f32.mrf.mxu0  ;;  %v1422_v52 = vadd.f32 %v1421_v42, %v1333_v51  ;;  %v1320_v17 = vadd.f32 %v4427_v43, %v1231_v40  ;;  %v1412_v51 = vadd.f32 %v1411_v9, %v1323_v4  ;;  %v1506_v42 = vadd.f32 %v1505_v6, %v1417_v12  ;;  %v5347_v40 = vld [vmem:[#allocation56_spill] sm:$0xff]  ;;  %v5348_v43 = vld [vmem:[#allocation57_spill] sm:$0xff]  ;;  %v2121_v9 = vld [vmem:[%s5110_s4 + $0x50] sm:$0xff] }
 0x1cd   : > { %v1334_v19 = vpop.f32.mrf.mxu1  ;;  %v1246_v31 = vadd.f32 %v1245_v58, %v5342_v5  ;;  %v1503_v56 = vadd.f32 %v1502_v32, %v1414_v28  ;;  %2179 = vperm.xlu0 %3474, %v2121_v9   ;;  %v2057_v28 = vsel %vm1929_vm10, %v1508_v36, %v1993_v63  ;;  %v2117_v36 = vld [vmem:[%s5110_s4 + $0x30] sm:$0xff]  ;;  %v5350_v63 = vld [vmem:[#allocation67_spill] sm:$0xff] }
 0x1ce   : > { %v1511_v13 = vadd.f32 %v1510_v57, %v1422_v52  ;;  %v1409_v50 = vadd.f32 %v4431_v7, %v1320_v17  ;;  %v5345_v57 = vld [vmem:[#allocation54_spill] sm:$0xff]  ;;  %v2122_v7 = vld [vmem:[%s5110_s4 + $0x58] sm:$0xff]  ;;  %v1501_v6 = vadd.f32 %v4439_v38, %v1412_v51  ;;  %v1991_v60 = vmul.f32 0.1, %v1506_v42 }
 0x1cf   : > { %v1335_v44 = vadd.f32 %v1334_v19, %v1246_v31  ;;  %2184 = vperm.xlu1 %3475, %v2122_v7   ;;  %vm1927_vm11 = vcmp.gt.f32.partialorder %v1506_v42, 0.0  ;;  %v1989_v45 = vmul.f32 0.1, %v1503_v56  ;;  %vm1925_vm12 = vcmp.gt.f32.partialorder %v1503_v56, 0.0 }
 0x1d0   : > { %v1995_v58 = vmul.f32 0.1, %v1511_v13  ;;  %vm1931_vm8 = vcmp.gt.f32.partialorder %v1511_v13, 0.0  ;;  %v1498_v15 = vadd.f32 %v4433_v62, %v1409_v50  ;;  %v2055_v17 = vsel %vm1927_vm11, %v1506_v42, %v1991_v60  ;;  %v2120_v62 = vld [vmem:[%s5110_s4 + $0x48] sm:$0xff]  ;;  %v5351_v60 = vld [vmem:[#allocation62_spill] sm:$0xff] }
 0x1d1   : > { %vm1923_vm13 = vcmp.gt.f32.partialorder %v1501_v6, 0.0  ;;  %v2053_v51 = vsel %vm1925_vm12, %v1503_v56, %v1989_v45  ;;  %v5354_v45 = vld [vmem:[#allocation65_spill] sm:$0xff] }
 0x1d2   : > { %v2059_v32 = vsel %vm1931_vm8, %v1511_v13, %v1995_v58  ;;  %v1987_v13 = vmul.f32 0.1, %v1501_v6  ;;  %vm1921_vm14 = vcmp.gt.f32.partialorder %v1498_v15, 0.0  ;;  %v1983_v58 = vmul.f32 0.1, %v4429_v24 }
 0x1d3   : > { %v1423_v30 = vpop.f32.mrf.mxu2 }
 0x1d4   : > { %v1424_v26 = vadd.f32 %v1423_v30, %v1335_v44  ;;  %v1512_v37 = vpop.f32.mrf.mxu3  ;;  %v1524_v27 = vpop.f32.mrf.mxu0  ;;  %v2047_v7 = vsel %vm1919_vm15, %v4429_v24, %v1983_v58  ;;  %v2115_v24 = vld [vmem:[%s5110_s4 + $0x20] sm:$0xff]  ;;  %v2114_v58 = vld [vmem:[%s5110_s4 + $0x18] sm:$0xff] }
 0x1d5   : > { %v1525_v18 = vadd.f32 %v1524_v27, %v5344_v3  ;;  %v1613_v61 = vpop.f32.mrf.mxu1  ;;  %2174 = vperm.xlu0 %3474, %v2120_v62  }
 0x1d6   : > { %v1513_v48 = vadd.f32 %v1512_v37, %v1424_v26  ;;  %v5349_v26 = vld [vmem:[#allocation60_spill] sm:$0xff] }
 0x1d7   : > { %v1614_v19 = vadd.f32 %v1613_v61, %v1525_v18  ;;  %1563 = vmatmul.bf16.gmra.mxu0 %v5345_v57  ;;  %1652 = vmatmul.bf16.gmra.mxu1 %v5346_v55  ;;  %v2091_v18 = vpack.c.bf16 %v2057_v28, %v2055_v17  ;;  %v1985_v61 = vmul.f32 0.1, %v1498_v15  ;;  %v5355_v17 = vld [vmem:[#allocation66_spill] sm:$0xff] }
 0x1d8   : > { %vm1933_vm9 = vcmp.gt.f32.partialorder %v1513_v48, 0.0  ;;  %v1997_v29 = vmul.f32 0.1, %v1513_v48  ;;  %1741 = vmatmul.bf16.gmra.mxu2 %v5347_v40  ;;  %2159 = vperm.xlu1 %3475, %v2117_v36   ;;  %v5357_v36 = vpack.c.bf16 %v4411_v10, %v4409_v39  ;;  %v5359_v39 = vpack.c.bf16 %v4399_v35, %v4397_v14  ;;  %v2609_v35 = vld [vmem:[%s5112_s6 + $0x30] sm:$0xff] }
 0x1d9   : > { %1830 = vmatmul.bf16.gmra.mxu3 %v5348_v43  ;;  %v2049_v56 = vsel %vm1921_vm14, %v1498_v15, %v1985_v61  ;;  %v5353_v15 = vld [vmem:[#allocation64_spill] sm:$0xff]  ;;  %v5356_v61 = vpack.c.bf16 %v4423_v46, %v4421_v47  ;;  %v5364_v14 = vpack.c.bf16 %v4375_v33, %v4373_v2 }
 0x1da   : > { %v2061_v52 = vsel %vm1933_vm9, %v1513_v48, %v1997_v29  ;;  %v2051_v48 = vsel %vm1923_vm13, %v1501_v6, %v1987_v13  ;;  %v2111_v47 = vld [vmem:[%s5110_s4] sm:$0xff] }
 0x1db   : > { %v2093_v31 = vpack.c.bf16 %v2061_v52, %v2059_v32  ;;  %v1702_v4 = vpop.f32.mrf.mxu2  ;;  %v2089_v50 = vpack.c.bf16 %v2053_v51, %v2051_v48  ;;  %v5352_v32 = vld [vmem:[#allocation63_spill] sm:$0xff]  ;;  %v2087_v52 = vpack.c.bf16 %v2049_v56, %v2047_v7 }
 0x1dc   : > { %v1703_v12 = vadd.f32 %v1702_v4, %v1614_v19  ;;  %v1791_v44 = vpop.f32.mrf.mxu3  ;;  %v1526_v30 = vpop.f32.mrf.mxu0  ;;  %v5362_v7 = vld [vmem:[#allocation71_spill] sm:$0xff] }
 0x1dd   : > { %v1527_v37 = vadd.f32 %v1526_v30, %v5349_v26  ;;  %v1615_v38 = vpop.f32.mrf.mxu1  ;;  %2336 = vmatpush.bf16.msra.mxu1 %v2093_v31  ;;  %v2125_v31 = vld [vmem:[%s5110_s4 + $0x70] sm:$0xff]  ;;  %2149 = vperm.xlu0 %3474, %v2115_v24  }
 0x1de   : > { %v1792_v27 = vadd.f32 %v1791_v44, %v1703_v12  ;;  %2199 = vperm.xlu2 %3476, %v2125_v31   ;;  %v2116_v12 = vld [vmem:[%s5110_s4 + $0x28] sm:$0xff] }
 0x1df   : > { %v1616_v3 = vadd.f32 %v1615_v38, %v1527_v37 }
 0x1e0   : > { %v1936_v43 = vmul.f32 0.1, %v1792_v27  ;;  %vm1872_vm0 = vcmp.gt.f32.partialorder %v1792_v27, 0.0  ;;  %2154 = vperm.xlu1 %3475, %v2116_v12  }
 0x1e1   : > { %2337 = vmatpush.bf16.msra.mxu1 %v2091_v18 }
 0x1e2   : > { %v4503_v44 = vsel %vm1872_vm0, %v1792_v27, %v1936_v43  ;;  %v2124_v27 = vld [vmem:[%s5110_s4 + $0x68] sm:$0xff]  ;;  %v2119_v43 = vld [vmem:[%s5110_s4 + $0x40] sm:$0xff] }
 0x1e3   : > { %v1704_v42 = vpop.f32.mrf.mxu2 }
 0x1e4   : > { %v1705_v19 = vadd.f32 %v1704_v42, %v1616_v3  ;;  %v1793_v57 = vpop.f32.mrf.mxu3  ;;  %v1529_v55 = vpop.f32.mrf.mxu0 }
 0x1e5   : > { %v1530_v29 = vadd.f32 %v1529_v55, %v5350_v63  ;;  %v1618_v40 = vpop.f32.mrf.mxu1  ;;  %2338 = vmatpush.bf16.msra.mxu1 %v2089_v50  ;;  %2144 = vperm.xlu0 %3474, %v2114_v58  }
 0x1e6   : > { %v1794_v9 = vadd.f32 %v1793_v57, %v1705_v19  ;;  %2194 = vperm.xlu2 %3476, %v2124_v27   ;;  %v5358_v19 = vld [vmem:[#allocation45_spill] sm:$0xff] }
 0x1e7   : > { %v1619_v6 = vadd.f32 %v1618_v40, %v1530_v29  ;;  %1568 = vmatmul.bf16.gmra.mxu0 %v5351_v60  ;;  %1657 = vmatmul.bf16.gmra.mxu1 %v5352_v32  ;;  %v5360_v29 = vld [vmem:[#allocation69_spill] sm:$0xff]  ;;  %v5361_v40 = vld [vmem:[#allocation70_spill] sm:$0xff]  ;;  %v2610_v60 = vld [vmem:[%s5112_s6 + $0x38] sm:$0xff] }
 0x1e8   : > { %vm1874_vm1 = vcmp.gt.f32.partialorder %v1794_v9, 0.0  ;;  %v1938_v4 = vmul.f32 0.1, %v1794_v9  ;;  %1746 = vmatmul.bf16.gmra.mxu2 %v5353_v15  ;;  %2129 = vperm.xlu1 %3475, %v2111_v47  }
 0x1e9   : > { %1835 = vmatmul.bf16.gmra.mxu3 %v5354_v45  ;;  %2339 = vmatpush.bf16.msra.mxu1 %v2087_v52  ;;  %v5365_v45 = vld [vmem:[#allocation61_spill] sm:$0xff] }
 0x1ea   : > { %v4505_v30 = vsel %vm1874_vm1, %v1794_v9, %v1938_v4 }
 0x1eb   : > { %v1707_v28 = vpop.f32.mrf.mxu2 }
 0x1ec   : > { %v1708_v37 = vadd.f32 %v1707_v28, %v1619_v6  ;;  %v1796_v38 = vpop.f32.mrf.mxu3  ;;  %v1531_v13 = vpop.f32.mrf.mxu0  ;;  %v5363_v6 = vld [vmem:[#allocation72_spill] sm:$0xff] }
 0x1ed   : > { %v1532_v3 = vadd.f32 %v1531_v13, %v5355_v17  ;;  %v1620_v18 = vpop.f32.mrf.mxu1  ;;  %2340 = vmatpush.bf16.msra.mxu1 %v5356_v61  ;;  %2643 = vperm.xlu0 %3474, %v2609_v35   ;;  %v2608_v13 = vld [vmem:[%s5112_s6 + $0x28] sm:$0xff]  ;;  %v2605_v17 = vld [vmem:[%s5112_s6 + $0x10] sm:$0xff] }
 0x1ee   : > { %v1797_v51 = vadd.f32 %v1796_v38, %v1708_v37  ;;  %2169 = vperm.xlu2 %3476, %v2119_v43   ;;  %v2118_v38 = vld [vmem:[%s5110_s4 + $0x38] sm:$0xff] }
 0x1ef   : > { %v1621_v62 = vadd.f32 %v1620_v18, %v1532_v3 }
 0x1f0   : > { %v1940_v10 = vmul.f32 0.1, %v1797_v51  ;;  %vm1876_vm2 = vcmp.gt.f32.partialorder %v1797_v51, 0.0  ;;  %2648 = vperm.xlu1 %3475, %v2610_v60  }
 0x1f1   : > { %2341 = vmatpush.bf16.msra.mxu1 %v5357_v36 }
 0x1f2   : > { %v4545_v32 = vsel %vm1876_vm2, %v1797_v51, %v1940_v10  ;;  %v2604_v10 = vld [vmem:[%s5112_s6 + $0x8] sm:$0xff] }
 0x1f3   : > { %v1709_v46 = vpop.f32.mrf.mxu2 }
 0x1f4   : > { %v1710_v48 = vadd.f32 %v1709_v46, %v1621_v62  ;;  %v1798_v42 = vpop.f32.mrf.mxu3  ;;  %v1534_v50 = vpop.f32.mrf.mxu0  ;;  %v5366_v62 = vld [vmem:[#allocation52_spill] sm:$0xff] }
 0x1f5   : > { %v1535_v57 = vadd.f32 %v1534_v50, %v5358_v19  ;;  %v1623_v55 = vpop.f32.mrf.mxu1  ;;  %2342 = vmatpush.bf16.msra.mxu1 %v5359_v39  ;;  %2638 = vperm.xlu0 %3474, %v2608_v13   ;;  %v2113_v50 = vld [vmem:[%s5110_s4 + $0x10] sm:$0xff]  ;;  %v2603_v39 = vld [vmem:[%s5112_s6] sm:$0xff] }
 0x1f6   : > { %v1799_v56 = vadd.f32 %v1798_v42, %v1710_v48  ;;  %2164 = vperm.xlu2 %3476, %v2118_v38   ;;  %v5367_v48 = vld [vmem:[#allocation75_spill] sm:$0xff]  ;;  %v5368_v42 = vld [vmem:[#allocation76_spill] sm:$0xff] }
 0x1f7   : > { %v1624_v63 = vadd.f32 %v1623_v55, %v1535_v57  ;;  %1573 = vmatmul.bf16.gmra.mxu0 %v5360_v29  ;;  %1662 = vmatmul.bf16.gmra.mxu1 %v5361_v40  ;;  %v5369_v57 = vld [vmem:[#allocation77_spill] sm:$0xff]  ;;  %v5370_v55 = vld [vmem:[#allocation78_spill] sm:$0xff] }
 0x1f8   : > { %vm1878_vm3 = vcmp.gt.f32.partialorder %v1799_v56, 0.0  ;;  %v1942_v9 = vmul.f32 0.1, %v1799_v56  ;;  %1751 = vmatmul.bf16.gmra.mxu2 %v5362_v7  ;;  %2623 = vperm.xlu1 %3475, %v2605_v17  }
 0x1f9   : > { %1840 = vmatmul.bf16.gmra.mxu3 %v5363_v6  ;;  %2343 = vmatpush.bf16.msra.mxu1 %v5364_v14  ;;  %v5371_v6 = vld [vmem:[#allocation43_spill] sm:$0xff] }
 0x1fa   : > { %v4547_v52 = vsel %vm1878_vm3, %v1799_v56, %v1942_v9 }
 0x1fb   : > { %v1712_v31 = vpop.f32.mrf.mxu2 }
 0x1fc   : > { %v1713_v2 = vadd.f32 %v1712_v31, %v1624_v63  ;;  %v1801_v33 = vpop.f32.mrf.mxu3  ;;  %v1536_v15 = vpop.f32.mrf.mxu0 }
 0x1fd   : > { %v1537_v24 = vadd.f32 %v1536_v15, %v5365_v45  ;;  %v1625_v12 = vpop.f32.mrf.mxu1  ;;  %2613 = vperm.xlu0 %3474, %v2603_v39  }
 0x1fe   : > { %v1802_v28 = vadd.f32 %v1801_v33, %v1713_v2  ;;  %2139 = vperm.xlu2 %3476, %v2113_v50   ;;  %v2112_v2 = vld [vmem:[%s5110_s4 + $0x8] sm:$0xff] }
 0x1ff   : > { %v1626_v37 = vadd.f32 %v1625_v12, %v1537_v24  ;;  %v5372_v12 = vld [vmem:[#allocation50_spill] sm:$0xff] }
 0x200   : > { %v1944_v58 = vmul.f32 0.1, %v1802_v28  ;;  %vm1880_vm4 = vcmp.gt.f32.partialorder %v1802_v28, 0.0  ;;  %2618 = vperm.xlu1 %3475, %v2604_v10  }
 0x202   : > { %v4575_v56 = vsel %vm1880_vm4, %v1802_v28, %v1944_v58 }
 0x203   : > { %v1714_v3 = vpop.f32.mrf.mxu2 }
 0x204   : > { %v1715_v18 = vadd.f32 %v1714_v3, %v1626_v37  ;;  %v1803_v61 = vpop.f32.mrf.mxu3  ;;  %v1539_v51 = vpop.f32.mrf.mxu0  ;;  %v5373_v3 = vld [vmem:[#allocation79_spill] sm:$0xff] }
 0x205   : > { %v1540_v27 = vadd.f32 %v1539_v51, %v5366_v62  ;;  %v1628_v36 = vpop.f32.mrf.mxu1  ;;  %v5375_v62 = vld [vmem:[#allocation81_spill] sm:$0xff] }
 0x206   : > { %v1804_v47 = vadd.f32 %v1803_v61, %v1715_v18  ;;  %2134 = vperm.xlu2 %3476, %v2112_v2   ;;  %v5374_v18 = vld [vmem:[#allocation80_spill] sm:$0xff] }
 0x207   : > { %v1629_v46 = vadd.f32 %v1628_v36, %v1540_v27  ;;  %1578 = vmatmul.bf16.gmra.mxu0 %v5367_v48  ;;  %1667 = vmatmul.bf16.gmra.mxu1 %v5368_v42  ;;  %v2607_v61 = vld [vmem:[%s5112_s6 + $0x20] sm:$0xff]  ;;  %v5376_v27 = vld [vmem:[#allocation82_spill] sm:$0xff] }
 0x208   : > { %vm1882_vm5 = vcmp.gt.f32.partialorder %v1804_v47, 0.0  ;;  %v1946_v19 = vmul.f32 0.1, %v1804_v47  ;;  %1756 = vmatmul.bf16.gmra.mxu2 %v5369_v57 }
 0x209   : > { %1845 = vmatmul.bf16.gmra.mxu3 %v5370_v55  ;;  %v2606_v55 = vld [vmem:[%s5112_s6 + $0x18] sm:$0xff] }
 0x20a   : > { %v4577_v63 = vsel %vm1882_vm5, %v1804_v47, %v1946_v19 }
 0x20b   : > { %v1717_v29 = vpop.f32.mrf.mxu2  ;;  %v2068_v40 = vpack.c.bf16 %v4577_v63, %v4575_v56 }
 0x20c   : > { %v1718_v43 = vadd.f32 %v1717_v29, %v1629_v46  ;;  %v1806_v9 = vpop.f32.mrf.mxu3  ;;  %v1541_v7 = vpop.f32.mrf.mxu0 }
 0x20d   : > { %v1542_v14 = vadd.f32 %v1541_v7, %v5371_v6  ;;  %v1630_v35 = vpop.f32.mrf.mxu1  ;;  %v5378_v7 = vld [vmem:[#allocation84_spill] sm:$0xff] }
 0x20e   : > { %v1807_v60 = vadd.f32 %v1806_v9, %v1718_v43  ;;  %2633 = vperm.xlu2 %3476, %v2607_v61   ;;  %v5377_v9 = vld [vmem:[#allocation83_spill] sm:$0xff]  ;;  %v2790_v6 = vld [vmem:[%s5114_s8] sm:$0xff] }
 0x20f   : > { %v1631_v31 = vadd.f32 %v1630_v35, %v1542_v14  ;;  %v5379_v14 = vld [vmem:[#allocation85_spill] sm:$0xff]  ;;  %v5380_v35 = vld [vmem:[#allocation86_spill] sm:$0xff] }
 0x210   : > { %v1948_v38 = vmul.f32 0.1, %v1807_v60  ;;  %vm1884_vm6 = vcmp.gt.f32.partialorder %v1807_v60, 0.0 }
 0x212   : > { %v4593_v36 = vsel %vm1884_vm6, %v1807_v60, %v1948_v38 }
 0x213   : > { %v1719_v33 = vpop.f32.mrf.mxu2 }
 0x214   : > { %v1720_v15 = vadd.f32 %v1719_v33, %v1631_v31  ;;  %v1808_v45 = vpop.f32.mrf.mxu3  ;;  %v1544_v24 = vpop.f32.mrf.mxu0 }
 0x215   : > { %v1545_v28 = vadd.f32 %v1544_v24, %v5372_v12  ;;  %v1633_v37 = vpop.f32.mrf.mxu1 }
 0x216   : > { %v1809_v13 = vadd.f32 %v1808_v45, %v1720_v15  ;;  %2628 = vperm.xlu2 %3476, %v2606_v55  }
 0x217   : > { %v1634_v17 = vadd.f32 %v1633_v37, %v1545_v28  ;;  %1583 = vmatmul.bf16.gmra.mxu0 %v5373_v3  ;;  %1672 = vmatmul.bf16.gmra.mxu1 %v5374_v18  ;;  %v5381_v28 = vld [vmem:[#allocation87_spill] sm:$0xff]  ;;  %v5382_v37 = vld [vmem:[#allocation88_spill] sm:$0xff] }
 0x218   : > { %vm1886_vm7 = vcmp.gt.f32.partialorder %v1809_v13, 0.0  ;;  %v1950_v51 = vmul.f32 0.1, %v1809_v13  ;;  %1761 = vmatmul.bf16.gmra.mxu2 %v5375_v62 }
 0x219   : > { %1850 = vmatmul.bf16.gmra.mxu3 %v5376_v27  ;;  %v5383_v27 = vld [vmem:[#allocation33_spill] sm:$0xff] }
 0x21a   : > { %v4595_v58 = vsel %vm1886_vm7, %v1809_v13, %v1950_v51 }
 0x21b   : > { %v1722_v47 = vpop.f32.mrf.mxu2  ;;  %v2070_v46 = vpack.c.bf16 %v4595_v58, %v4593_v36 }
 0x21c   : > { %v1723_v48 = vadd.f32 %v1722_v47, %v1634_v17  ;;  %v1811_v42 = vpop.f32.mrf.mxu3  ;;  %v1546_v50 = vpop.f32.mrf.mxu0 }
 0x21d   : > { %v4599_v19 = vpop.f32.mrf.mxu1 }
 0x21e   : > { %v4601_v57 = vadd.f32 %v1811_v42, %v1723_v48  ;;  %2793 = vperm.xlu2 %3476, %v2790_v6   ;;  %v5384_v48 = vld [vmem:[#allocation89_spill] sm:$0xff]  ;;  %v5385_v42 = vld [vmem:[#allocation90_spill] sm:$0xff] }
 0x220   : > { %vm1888_vm15 = vcmp.gt.f32.partialorder %v4601_v57, 0.0 }
 0x223   : > { %v4606_v39 = vpop.f32.mrf.mxu2 }
 0x224   : > { %v4608_v10 = vpop.f32.mrf.mxu3  ;;  %v1549_v29 = vpop.f32.mrf.mxu0 }
 0x225   : > { %v1638_v43 = vpop.f32.mrf.mxu1 }
 0x227   : > { %1588 = vmatmul.bf16.gmra.mxu0 %v5377_v9  ;;  %1677 = vmatmul.bf16.gmra.mxu1 %v5378_v7  ;;  %v5388_v9 = vld [vmem:[#allocation26_spill] sm:$0xff] }
 0x228   : > { %1766 = vmatmul.bf16.gmra.mxu2 %v5379_v14 }
 0x229   : > { %1855 = vmatmul.bf16.gmra.mxu3 %v5380_v35 }
 0x22b   : > { %v1727_v60 = vpop.f32.mrf.mxu2 }
 0x22c   : > { %v4617_v31 = vpop.f32.mrf.mxu3  ;;  %v1551_v2 = vpop.f32.mrf.mxu0 }
 0x22d   : > { %v1640_v33 = vpop.f32.mrf.mxu1 }
 0x233   : > { %v1729_v15 = vpop.f32.mrf.mxu2 }
 0x234   : > { %v4619_v45 = vpop.f32.mrf.mxu3  ;;  %v1554_v24 = vpop.f32.mrf.mxu0 }
 0x235   : > { %v1643_v12 = vpop.f32.mrf.mxu1  ;;  %v1555_v55 = vadd.f32 %v1554_v24, %v3997_v54  ;;  %v3211_v54 = vld [vmem:[%s5109_s3] sm:$0xf] }
 0x237   : > { %1593 = vmatmul.bf16.gmra.mxu0 %v4300_v34  ;;  %1682 = vmatmul.bf16.gmra.mxu1 %v4302_v21  ;;  %v5386_v34 = vld [vmem:[#allocation91_spill] sm:$0xff]  ;;  %v5387_v21 = vld [vmem:[#allocation92_spill] sm:$0xff] }
 0x238   : > { %1771 = vmatmul.bf16.gmra.mxu2 %v5381_v28 }
 0x239   : > { %1860 = vmatmul.bf16.gmra.mxu3 %v5382_v37  ;;  %v5389_v37 = vld [vmem:[#allocation27_spill] sm:$0xff] }
 0x23a   : > { %v1550_v26 = vadd.f32 %v1549_v29, %v5389_v37  ;;  %v3361_v29 = vld [vmem:[%s5109_s3 + $0x4] sm:$0xf] }
 0x23b   : > { %v1732_v38 = vpop.f32.mrf.mxu2 }
 0x23c   : > { %v1821_v13 = vpop.f32.mrf.mxu3  ;;  %v1556_v17 = vpop.f32.mrf.mxu0 }
 0x23d   : > { %v1645_v3 = vpop.f32.mrf.mxu1  ;;  %v1557_v7 = vadd.f32 %v1556_v17, %v5388_v9  ;;  %v3362_v17 = vld [vmem:[%s5109_s3 + $0x4] sm:$0xf0] }
 0x23f   : > { %v1646_v4 = vadd.f32 %v1645_v3, %v1557_v7 }
 0x243   : > { %v1734_v18 = vpop.f32.mrf.mxu2 }
 0x244   : > { %v1823_v61 = vpop.f32.mrf.mxu3  ;;  %v1559_v51 = vpop.f32.mrf.mxu0  ;;  %v1735_v24 = vadd.f32 %v1734_v18, %v1646_v4  ;;  %v4648_v18 = vor.u32 %v3362_v17, %v3211_v54 }
 0x245   : > { %v1648_v62 = vpop.f32.mrf.mxu1  ;;  %v1560_v47 = vadd.f32 %v1559_v51, %v5383_v27  ;;  %v1552_v51 = vadd.f32 %v1551_v2, %v4062_v49  ;;  %v3213_v49 = vld [vmem:[%s5109_s3 + $0x8] sm:$0xf0]  ;;  %v1547_v2 = vadd.f32 %v1546_v50, %v4079_v23 }
 0x246   : > { %v1824_v9 = vadd.f32 %v1823_v61, %v1735_v24 }
 0x247   : > { %1598 = vmatmul.bf16.gmra.mxu0 %v5384_v48  ;;  %1687 = vmatmul.bf16.gmra.mxu1 %v5385_v42  ;;  %v1649_v6 = vadd.f32 %v1648_v62, %v1560_v47  ;;  %v1644_v48 = vadd.f32 %v1643_v12, %v1555_v55  ;;  %v1641_v12 = vadd.f32 %v1640_v33, %v1552_v51 }
 0x248   : > { %1776 = vmatmul.bf16.gmra.mxu2 %v5386_v34  ;;  %v1962_v61 = vmul.f32 0.1, %v1824_v9  ;;  %vm1898_vm10 = vcmp.gt.f32.partialorder %v1824_v9, 0.0 }
 0x249   : > { %1865 = vmatmul.bf16.gmra.mxu3 %v5387_v21  ;;  %v1733_v3 = vadd.f32 %v1732_v38, %v1644_v48  ;;  %v4650_v21 = vor.u32 %v3361_v29, %v3213_v49  ;;  %v1730_v55 = vadd.f32 %v1729_v15, %v1641_v12 }
 0x24a   : > { %v2026_v17 = vsel %vm1898_vm10, %v1824_v9, %v1962_v61 }
 0x24b   : > { %v1737_v14 = vpop.f32.mrf.mxu2  ;;  %v1822_v50 = vadd.f32 %v1821_v13, %v1733_v3  ;;  %v1819_v15 = vadd.f32 %v4619_v45, %v1730_v55  ;;  %v3219_v3 = vld [vmem:[%s5109_s3 + $0x10] sm:$0xf]  ;;  %v1952_v55 = vmul.f32 0.1, %v4601_v57 }
 0x24c   : > { %v1826_v35 = vpop.f32.mrf.mxu3  ;;  %v1561_v28 = vpop.f32.mrf.mxu0  ;;  %v1738_v42 = vadd.f32 %v1737_v14, %v1649_v6 }
 0x24d   : > { %v1650_v27 = vpop.f32.mrf.mxu1  ;;  %v1562_v34 = vadd.f32 %v1561_v28, %v4035_v22  ;;  %v1639_v22 = vadd.f32 %v1638_v43, %v1550_v26  ;;  %v1636_v28 = vadd.f32 %v4599_v19, %v1547_v2  ;;  %vm1896_vm11 = vcmp.gt.f32.partialorder %v1822_v50, 0.0 }
 0x24e   : > { %v1827_v62 = vadd.f32 %v1826_v35, %v1738_v42  ;;  %v1958_v42 = vmul.f32 0.1, %v1819_v15  ;;  %vm1894_vm12 = vcmp.gt.f32.partialorder %v1819_v15, 0.0 }
 0x24f   : > { %v1651_v47 = vadd.f32 %v1650_v27, %v1562_v34  ;;  %v1728_v26 = vadd.f32 %v1727_v60, %v1639_v22  ;;  %v1725_v38 = vadd.f32 %v4606_v39, %v1636_v28  ;;  %v1960_v60 = vmul.f32 0.1, %v1822_v50 }
 0x250   : > { %v1964_v43 = vmul.f32 0.1, %v1827_v62  ;;  %vm1900_vm8 = vcmp.gt.f32.partialorder %v1827_v62, 0.0 }
 0x251   : > { %v1814_v27 = vadd.f32 %v4608_v10, %v1725_v38  ;;  %v2024_v2 = vsel %vm1896_vm11, %v1822_v50, %v1960_v60 }
 0x252   : > { %v2028_v13 = vsel %vm1900_vm8, %v1827_v62, %v1964_v43  ;;  %v2076_v10 = vpack.c.bf16 %v2026_v17, %v2024_v2  ;;  %v2022_v62 = vsel %vm1894_vm12, %v1819_v15, %v1958_v42  ;;  %v2016_v15 = vsel %vm1888_vm15, %v4601_v57, %v1952_v55  ;;  %v3366_v17 = vld [vmem:[%s5109_s3 + $0x24] sm:$0xf0] }
 0x253   : > { %v1739_v4 = vpop.f32.mrf.mxu2  ;;  %v1954_v22 = vmul.f32 0.1, %v1814_v27  ;;  %vm1890_vm14 = vcmp.gt.f32.partialorder %v1814_v27, 0.0 }
 0x254   : > { %v1740_v7 = vadd.f32 %v1739_v4, %v1651_v47  ;;  %v1828_v6 = vpop.f32.mrf.mxu3  ;;  %v1564_v14 = vpop.f32.mrf.mxu0  ;;  %v3364_v47 = vld [vmem:[%s5109_s3 + $0x14] sm:$0xf0]  ;;  %v3221_v4 = vld [vmem:[%s5109_s3 + $0x18] sm:$0xf0] }
 0x255   : > { %v1565_v37 = vadd.f32 %v1564_v14, %v4348_v8  ;;  %v1653_v23 = vpop.f32.mrf.mxu1  ;;  %v1817_v8 = vadd.f32 %v4617_v31, %v1728_v26  ;;  %v4675_v14 = vor.u32 %v3364_v47, %v3219_v3  ;;  %v2018_v50 = vsel %vm1890_vm14, %v1814_v27, %v1954_v22 }
 0x256   : > { %v1829_v33 = vadd.f32 %v1828_v6, %v1740_v7 }
 0x257   : > { %v1654_v35 = vadd.f32 %v1653_v23, %v1565_v37  ;;  %2295 = vmatmul.bf16.vlgmr.msra.gmra.mxu0 %v4648_v18  ;;  %2344 = vmatmul.bf16.vlgmr.msra.gmra.mxu1 %v4650_v21  ;;  %v1956_v49 = vmul.f32 0.1, %v1817_v8  ;;  %vm1892_vm13 = vcmp.gt.f32.partialorder %v1817_v8, 0.0 }
 0x258   : > { %vm1902_vm9 = vcmp.gt.f32.partialorder %v1829_v33, 0.0  ;;  %v1966_v19 = vmul.f32 0.1, %v1829_v33 }
 0x259   : > { %v2020_v9 = vsel %vm1892_vm13, %v1817_v8, %v1956_v49 }
 0x25a   : > { %v2030_v51 = vsel %vm1902_vm9, %v1829_v33, %v1966_v19  ;;  %v2074_v6 = vpack.c.bf16 %v2022_v62, %v2020_v9  ;;  %v2072_v19 = vpack.c.bf16 %v2018_v50, %v2016_v15 }
 0x25b   : > { %v2078_v39 = vpack.c.bf16 %v2030_v51, %v2028_v13  ;;  %v1742_v48 = vpop.f32.mrf.mxu2 }
 0x25c   : > { %v1743_v34 = vadd.f32 %v1742_v48, %v1654_v35  ;;  %v1831_v54 = vpop.f32.mrf.mxu3  ;;  %v1566_v24 = vpop.f32.mrf.mxu0 }
 0x25d   : > { %v1567_v45 = vadd.f32 %v1566_v24, %v4361_v41  ;;  %v1655_v29 = vpop.f32.mrf.mxu1  ;;  %2385 = vmatpush.bf16.msra.mxu2 %v2078_v39  ;;  %v3363_v41 = vld [vmem:[%s5109_s3 + $0x14] sm:$0xf]  ;;  %v3227_v24 = vld [vmem:[%s5109_s3 + $0x20] sm:$0xf] }
 0x25e   : > { %v1832_v31 = vadd.f32 %v1831_v54, %v1743_v34  ;;  %v4677_v28 = vor.u32 %v3363_v41, %v3221_v4  ;;  %v4708_v58 = vor.u32 %v3366_v17, %v3227_v24  ;;  %v5393_v24 = vld [vmem:[#allocation58_spill] sm:$0xff] }
 0x25f   : > { %v1656_v12 = vadd.f32 %v1655_v29, %v1567_v45  ;;  %v3365_v45 = vld [vmem:[%s5109_s3 + $0x24] sm:$0xf] }
 0x260   : > { %v1968_v38 = vmul.f32 0.1, %v1832_v31  ;;  %vm1904_vm0 = vcmp.gt.f32.partialorder %v1832_v31, 0.0 }
 0x261   : > { %2386 = vmatpush.bf16.msra.mxu2 %v2076_v10 }
 0x262   : > { %v4683_v60 = vsel %vm1904_vm0, %v1832_v31, %v1968_v38  ;;  %v5392_v38 = vld [vmem:[#allocation59_spill] sm:$0xff] }
 0x263   : > { %v1744_v7 = vpop.f32.mrf.mxu2 }
 0x264   : > { %v1745_v37 = vadd.f32 %v1744_v7, %v1656_v12  ;;  %v1833_v23 = vpop.f32.mrf.mxu3  ;;  %v1569_v26 = vpop.f32.mrf.mxu0  ;;  %v5390_v12 = vpack.c.bf16 %v4547_v52, %v4545_v32 }
 0x265   : > { %v1570_v43 = vadd.f32 %v1569_v26, %v4094_v1  ;;  %v1658_v33 = vpop.f32.mrf.mxu1  ;;  %2387 = vmatpush.bf16.msra.mxu2 %v2074_v6 }
 0x266   : > { %v1834_v35 = vadd.f32 %v1833_v23, %v1745_v37  ;;  %v3367_v37 = vld [vmem:[%s5109_s3 + $0x34] sm:$0xf] }
 0x267   : > { %v1659_v61 = vadd.f32 %v1658_v33, %v1570_v43  ;;  %2300 = vmatmul.bf16.gmra.mxu0 %v4675_v14  ;;  %2349 = vmatmul.bf16.gmra.mxu1 %v4677_v28 }
 0x268   : > { %vm1906_vm1 = vcmp.gt.f32.partialorder %v1834_v35, 0.0  ;;  %v1970_v8 = vmul.f32 0.1, %v1834_v35 }
 0x269   : > { %2388 = vmatpush.bf16.msra.mxu2 %v2072_v19 }
 0x26a   : > { %v4685_v13 = vsel %vm1906_vm1, %v1834_v35, %v1970_v8 }
 0x26b   : > { %v1747_v1 = vpop.f32.mrf.mxu2 }
 0x26c   : > { %v1748_v27 = vadd.f32 %v1747_v1, %v1659_v61  ;;  %v1836_v57 = vpop.f32.mrf.mxu3  ;;  %v1571_v39 = vpop.f32.mrf.mxu0 }
 0x26d   : > { %v1572_v48 = vadd.f32 %v1571_v39, %v4334_v59  ;;  %v1660_v42 = vpop.f32.mrf.mxu1  ;;  %2389 = vmatpush.bf16.msra.mxu2 %v2070_v46  ;;  %v3229_v59 = vld [vmem:[%s5109_s3 + $0x28] sm:$0xf0] }
 0x26e   : > { %v1837_v34 = vadd.f32 %v1836_v57, %v1748_v27  ;;  %v4710_v46 = vor.u32 %v3365_v45, %v3229_v59 }
 0x26f   : > { %v1661_v54 = vadd.f32 %v1660_v42, %v1572_v48 }
 0x270   : > { %v1972_v10 = vmul.f32 0.1, %v1837_v34  ;;  %vm1908_vm2 = vcmp.gt.f32.partialorder %v1837_v34, 0.0 }
 0x271   : > { %2390 = vmatpush.bf16.msra.mxu2 %v2068_v40  ;;  %v5391_v40 = vpack.c.bf16 %v4505_v30, %v4503_v44  ;;  %v3235_v44 = vld [vmem:[%s5109_s3 + $0x30] sm:$0xf]  ;;  %v3368_v30 = vld [vmem:[%s5109_s3 + $0x34] sm:$0xf0] }
 0x272   : > { %v4741_v23 = vor.u32 %v3368_v30, %v3235_v44 }
 0x273   : > { %v1749_v36 = vpop.f32.mrf.mxu2 }
 0x274   : > { %v1750_v29 = vadd.f32 %v1749_v36, %v1661_v54  ;;  %v1838_v49 = vpop.f32.mrf.mxu3  ;;  %v1574_v31 = vpop.f32.mrf.mxu0 }
 0x275   : > { %v1575_v2 = vadd.f32 %v1574_v31, %v4117_v0  ;;  %v1663_v22 = vpop.f32.mrf.mxu1  ;;  %2391 = vmatpush.bf16.msra.mxu2 %v5390_v12  ;;  %v4721_v0 = vsel %vm1908_vm2, %v1837_v34, %v1972_v10  ;;  %v3369_v31 = vld [vmem:[%s5109_s3 + $0x44] sm:$0xf] }
 0x276   : > { %v1839_v3 = vadd.f32 %v1838_v49, %v1750_v29  ;;  %v3243_v29 = vld [vmem:[%s5109_s3 + $0x40] sm:$0xf]  ;;  %v3370_v49 = vld [vmem:[%s5109_s3 + $0x44] sm:$0xf0] }
 0x277   : > { %v1664_v56 = vadd.f32 %v1663_v22, %v1575_v2  ;;  %2305 = vmatmul.bf16.gmra.mxu0 %v4708_v58  ;;  %2354 = vmatmul.bf16.gmra.mxu1 %v4710_v46  ;;  %v3244_v22 = vor.u32 %v3370_v49, %v3243_v29  ;;  %v3261_v29 = vld [vmem:[%s5109_s3 + $0x68] sm:$0xf0] }
 0x278   : > { %vm1910_vm3 = vcmp.gt.f32.partialorder %v1839_v3, 0.0  ;;  %v1974_v63 = vmul.f32 0.1, %v1839_v3 }
 0x279   : > { %2392 = vmatpush.bf16.msra.mxu2 %v5391_v40 }
 0x27a   : > { %v4723_v62 = vsel %vm1910_vm3, %v1839_v3, %v1974_v63  ;;  %v5394_v63 = vld [vmem:[#allocation36_spill] sm:$0xff] }
 0x27b   : > { %v1752_v32 = vpop.f32.mrf.mxu2 }
 0x27c   : > { %v1753_v47 = vadd.f32 %v1752_v32, %v1664_v56  ;;  %v1841_v41 = vpop.f32.mrf.mxu3  ;;  %2393 = vmatmul.bf16.vlgmr.msra.gmra.mxu2 %v4648_v18  ;;  %v1576_v4 = vpop.f32.mrf.mxu0  ;;  %v3237_v18 = vld [vmem:[%s5109_s3 + $0x38] sm:$0xf0] }
 0x27d   : > { %v1577_v55 = vadd.f32 %v1576_v4, %v5313_v25  ;;  %v1665_v9 = vpop.f32.mrf.mxu1  ;;  %v4743_v26 = vor.u32 %v3367_v37, %v3237_v18 }
 0x27e   : > { %v1842_v7 = vadd.f32 %v1841_v41, %v1753_v47 }
 0x27f   : > { %v1666_v6 = vadd.f32 %v1665_v9, %v1577_v55 }
 0x280   : > { %v1976_v61 = vmul.f32 0.1, %v1842_v7  ;;  %vm1912_vm4 = vcmp.gt.f32.partialorder %v1842_v7, 0.0 }
 0x282   : > { %v4748_v27 = vsel %vm1912_vm4, %v1842_v7, %v1976_v61 }
 0x283   : > { %v1754_v25 = vpop.f32.mrf.mxu2 }
 0x284   : > { %v1755_v50 = vadd.f32 %v1754_v25, %v1666_v6  ;;  %v1843_v43 = vpop.f32.mrf.mxu3  ;;  %v1579_v33 = vpop.f32.mrf.mxu0 }
 0x285   : > { %v1580_v35 = vadd.f32 %v1579_v33, %v5392_v38  ;;  %v1668_v15 = vpop.f32.mrf.mxu1  ;;  %v3372_v33 = vld [vmem:[%s5109_s3 + $0x54] sm:$0xf0]  ;;  %v3371_v38 = vld [vmem:[%s5109_s3 + $0x54] sm:$0xf] }
 0x286   : > { %v1844_v19 = vadd.f32 %v1843_v43, %v1755_v50  ;;  %v3251_v43 = vld [vmem:[%s5109_s3 + $0x50] sm:$0xf] }
 0x287   : > { %v1669_v8 = vadd.f32 %v1668_v15, %v1580_v35  ;;  %2310 = vmatmul.bf16.gmra.mxu0 %v4741_v23  ;;  %2359 = vmatmul.bf16.gmra.mxu1 %v4743_v26  ;;  %v3252_v15 = vor.u32 %v3372_v33, %v3251_v43 }
 0x288   : > { %vm1914_vm5 = vcmp.gt.f32.partialorder %v1844_v19, 0.0  ;;  %v1978_v1 = vmul.f32 0.1, %v1844_v19 }
 0x28a   : > { %v4750_v57 = vsel %vm1914_vm5, %v1844_v19, %v1978_v1 }
 0x28b   : > { %v1757_v39 = vpop.f32.mrf.mxu2 }
 0x28c   : > { %v1758_v42 = vadd.f32 %v1757_v39, %v1669_v8  ;;  %v1846_v34 = vpop.f32.mrf.mxu3  ;;  %2398 = vmatmul.bf16.gmra.mxu2 %v4675_v14  ;;  %v1581_v54 = vpop.f32.mrf.mxu0  ;;  %v3245_v14 = vld [vmem:[%s5109_s3 + $0x48] sm:$0xf0] }
 0x28d   : > { %v1582_v17 = vadd.f32 %v1581_v54, %v5393_v24  ;;  %v1670_v45 = vpop.f32.mrf.mxu1  ;;  %v4768_v12 = vor.u32 %v3369_v31, %v3245_v14  ;;  %v4806_v39 = vpop.permute.xlu2 %2199 }
 0x28e   : > { %v1847_v59 = vadd.f32 %v1846_v34, %v1758_v42  ;;  %v4808_v42 = vpop.permute.xlu1 %2189 }
 0x28f   : > { %v1671_v36 = vadd.f32 %v1670_v45, %v1582_v17  ;;  %5396 = vst [vmem:[#allocation17_spill] sm:$0xff] %v4808_v42  ;;  %v3259_v45 = vld [vmem:[%s5109_s3 + $0x60] sm:$0xf] }
 0x290   : > { %v1980_v47 = vmul.f32 0.1, %v1847_v59  ;;  %vm1916_vm6 = vcmp.gt.f32.partialorder %v1847_v59, 0.0 }
 0x292   : > { %v4772_v9 = vsel %vm1916_vm6, %v1847_v59, %v1980_v47  ;;  %v3374_v59 = vld [vmem:[%s5109_s3 + $0x64] sm:$0xf0] }
 0x293   : > { %v1759_v2 = vpop.f32.mrf.mxu2  ;;  %v4829_v31 = vor.u32 %v3374_v59, %v3259_v45 }
 0x294   : > { %v1760_v10 = vadd.f32 %v1759_v2, %v1671_v36  ;;  %v1848_v3 = vpop.f32.mrf.mxu3  ;;  %v1584_v56 = vpop.f32.mrf.mxu0  ;;  %v3373_v36 = vld [vmem:[%s5109_s3 + $0x64] sm:$0xf] }
 0x295   : > { %v1585_v40 = vadd.f32 %v1584_v56, %v5394_v63  ;;  %v1673_v32 = vpop.f32.mrf.mxu1  ;;  %v4827_v49 = vpop.permute.xlu2 %2194  ;;  %v4831_v14 = vor.u32 %v3373_v36, %v3261_v29  ;;  %v5402_v29 = vld [vmem:[#allocation32_spill] sm:$0xff] }
 0x296   : > { %v1849_v41 = vadd.f32 %v1848_v3, %v1760_v10  ;;  %5397 = vst [vmem:[#allocation74_spill] sm:$0xff] %v4827_v49  ;;  %v4835_v56 = vpop.permute.xlu1 %2184 }
 0x297   : > { %v1674_v4 = vadd.f32 %v1673_v32, %v1585_v40  ;;  %2315 = vmatmul.bf16.gmra.mxu0 %v3244_v22  ;;  %2364 = vmatmul.bf16.gmra.mxu1 %v4768_v12  ;;  %5398 = vst [vmem:[#allocation73_spill] sm:$0xff] %v4831_v14 }
 0x298   : > { %vm1918_vm7 = vcmp.gt.f32.partialorder %v1849_v41, 0.0  ;;  %v1982_v55 = vmul.f32 0.1, %v1849_v41  ;;  %5399 = vst [vmem:[#allocation51_spill] sm:$0xff] %v4835_v56 }
 0x29a   : > { %v4774_v7 = vsel %vm1918_vm7, %v1849_v41, %v1982_v55 }
 0x29b   : > { %v1762_v6 = vpop.f32.mrf.mxu2 }
 0x29c   : > { %v1763_v30 = vadd.f32 %v1762_v6, %v1674_v4  ;;  %v1851_v37 = vpop.f32.mrf.mxu3  ;;  %2403 = vmatmul.bf16.gmra.mxu2 %v4708_v58  ;;  %v4779_v18 = vpop.f32.mrf.mxu0  ;;  %v3253_v58 = vld [vmem:[%s5109_s3 + $0x58] sm:$0xf0]  ;;  %v3267_v4 = vld [vmem:[%s5109_s3 + $0x70] sm:$0xf]  ;;  %v3376_v6 = vld [vmem:[%s5109_s3 + $0x74] sm:$0xf0] }
 0x29d   : > { %v4781_v25 = vpop.f32.mrf.mxu1  ;;  %v4799_v61 = vor.u32 %v3371_v38, %v3253_v58  ;;  %v4839_v41 = vpop.permute.xlu2 %2169  ;;  %v4857_v33 = vor.u32 %v3376_v6, %v3267_v4  ;;  %v5403_v4 = vld [vmem:[#allocation42_spill] sm:$0xff] }
 0x29e   : > { %v4783_v50 = vadd.f32 %v1851_v37, %v1763_v30  ;;  %v4844_v55 = vpop.permute.xlu1 %2159  ;;  %v3375_v30 = vld [vmem:[%s5109_s3 + $0x74] sm:$0xf]  ;;  %v4855_v37 = vpop.permute.xlu0 %2204 }
 0x29f   : > { %5395 = vst [vmem:[#allocation16_spill] sm:$0xff] %v4799_v61 }
 0x2a0   : > { %5400 = vst [vmem:[#allocation18_spill] sm:$0xff] %v4855_v37  ;;  %vm1920_vm1 = vcmp.gt.f32.partialorder %v4783_v50, 0.0 }
 0x2a3   : > { %v4797_v35 = vpop.f32.mrf.mxu2 }
 0x2a4   : > { %v4801_v19 = vpop.f32.mrf.mxu3  ;;  %v1589_v8 = vpop.f32.mrf.mxu0 }
 0x2a5   : > { %v4803_v1 = vpop.f32.mrf.mxu1  ;;  %v4863_v36 = vpop.permute.xlu2 %2164 }
 0x2a6   : > { %v4866_v52 = vpop.permute.xlu1 %2154  ;;  %v4870_v56 = vpop.permute.xlu0 %2179 }
 0x2a7   : > { %2320 = vmatmul.bf16.gmra.mxu0 %v3252_v15  ;;  %2369 = vmatmul.bf16.gmra.mxu1 %v4799_v61  ;;  %5404 = vst [vmem:[#allocation20_spill] sm:$0xff] %v4870_v56 }
 0x2ab   : > { %v4810_v34 = vpop.f32.mrf.mxu2 }
 0x2ac   : > { %v4812_v54 = vpop.f32.mrf.mxu3  ;;  %2408 = vmatmul.bf16.gmra.mxu2 %v4741_v23  ;;  %v1591_v24 = vpop.f32.mrf.mxu0 }
 0x2ad   : > { %v1680_v17 = vpop.f32.mrf.mxu1 }
 0x2b3   : > { %v1769_v23 = vpop.f32.mrf.mxu2 }
 0x2b4   : > { %v4833_v2 = vpop.f32.mrf.mxu3  ;;  %v1594_v10 = vpop.f32.mrf.mxu0 }
 0x2b5   : > { %v1683_v3 = vpop.f32.mrf.mxu1  ;;  %v1595_v6 = vadd.f32 %v1594_v10, %v5403_v4  ;;  %v1587_v10 = vadd.f32 %v4779_v18, %v5343_v20 }
 0x2b7   : > { %2325 = vmatmul.bf16.gmra.mxu0 %v4829_v31  ;;  %2374 = vmatmul.bf16.gmra.mxu1 %v4831_v14  ;;  %v1684_v49 = vadd.f32 %v1683_v3, %v1595_v6 }
 0x2bb   : > { %v1772_v63 = vpop.f32.mrf.mxu2 }
 0x2bc   : > { %v1861_v40 = vpop.f32.mrf.mxu3  ;;  %2413 = vmatmul.bf16.gmra.mxu2 %v3244_v22  ;;  %v1596_v32 = vpop.f32.mrf.mxu0  ;;  %v3269_v22 = vld [vmem:[%s5109_s3 + $0x78] sm:$0xf0] }
 0x2bd   : > { %v1685_v47 = vpop.f32.mrf.mxu1  ;;  %v4859_v38 = vor.u32 %v3375_v30, %v3269_v22  ;;  %v1597_v48 = vadd.f32 %v1596_v32, %v5339_v53  ;;  %v1773_v32 = vadd.f32 %v1772_v63, %v1684_v49  ;;  %v4886_v63 = vpop.permute.xlu0 %2174 }
 0x2bf   : > { %5401 = vst [vmem:[#allocation19_spill] sm:$0xff] %v4859_v38  ;;  %v1686_v61 = vadd.f32 %v1685_v47, %v1597_v48  ;;  %v4880_v48 = vpop.permute.xlu1 %2129  ;;  %v1862_v49 = vadd.f32 %v1861_v40, %v1773_v32 }
 0x2c1   : > { %vm1928_vm11 = vcmp.gt.f32.partialorder %v1862_v49, 0.0 }
 0x2c3   : > { %v1774_v43 = vpop.f32.mrf.mxu2 }
 0x2c4   : > { %v1863_v58 = vpop.f32.mrf.mxu3  ;;  %v1599_v45 = vpop.f32.mrf.mxu0  ;;  %v1775_v53 = vadd.f32 %v1774_v43, %v1686_v61  ;;  %v1676_v61 = vadd.f32 %v4781_v25, %v1587_v10 }
 0x2c5   : > { %v1688_v59 = vpop.f32.mrf.mxu1  ;;  %v1600_v51 = vadd.f32 %v1599_v45, %v5402_v29  ;;  %v1590_v29 = vadd.f32 %v1589_v8, %v5340_v16 }
 0x2c6   : > { %v1765_v3 = vadd.f32 %v4797_v35, %v1676_v61 }
 0x2c7   : > { %2330 = vmatmul.bf16.gmra.mxu0 %v4857_v33  ;;  %2379 = vmatmul.bf16.gmra.mxu1 %v4859_v38  ;;  %v1689_v30 = vadd.f32 %v1688_v59, %v1600_v51  ;;  %v1592_v38 = vadd.f32 %v1591_v24, %v5341_v11  ;;  %v1679_v11 = vadd.f32 %v4803_v1, %v1590_v29 }
 0x2c9   : > { %v1681_v51 = vadd.f32 %v1680_v17, %v1592_v38  ;;  %v1768_v17 = vadd.f32 %v4810_v34, %v1679_v11  ;;  %v1854_v38 = vadd.f32 %v4801_v19, %v1765_v3 }
 0x2cb   : > { %v1777_v44 = vpop.f32.mrf.mxu2  ;;  %v1857_v47 = vadd.f32 %v4812_v54, %v1768_v17  ;;  %vm1922_vm15 = vcmp.gt.f32.partialorder %v1854_v38, 0.0 }
 0x2cc   : > { %v1866_v22 = vpop.f32.mrf.mxu3  ;;  %2418 = vmatmul.bf16.gmra.mxu2 %v3252_v15  ;;  %v1601_v14 = vpop.f32.mrf.mxu0  ;;  %v1778_v42 = vadd.f32 %v1777_v44, %v1689_v30  ;;  %v1770_v44 = vadd.f32 %v1769_v23, %v1681_v51  ;;  %v1986_v51 = vmul.f32 0.1, %v1854_v38 }
 0x2cd   : > { %v1690_v37 = vpop.f32.mrf.mxu1  ;;  %v1602_v45 = vadd.f32 %v1601_v14, %v5342_v5  ;;  %v4877_v15 = vpop.permute.xlu2 %2139  ;;  %v1864_v5 = vadd.f32 %v1863_v58, %v1775_v53  ;;  %v1988_v54 = vmul.f32 0.1, %v1857_v47  ;;  %vm1924_vm13 = vcmp.gt.f32.partialorder %v1857_v47, 0.0 }
 0x2ce   : > { %v1867_v59 = vadd.f32 %v1866_v22, %v1778_v42  ;;  %v1859_v23 = vadd.f32 %v4833_v2, %v1770_v44 }
 0x2cf   : > { %v1691_v4 = vadd.f32 %v1690_v37, %v1602_v45  ;;  %vm1930_vm10 = vcmp.gt.f32.partialorder %v1864_v5, 0.0  ;;  %v1992_v37 = vmul.f32 0.1, %v1862_v49 }
 0x2d0   : > { %v1996_v42 = vmul.f32 0.1, %v1867_v59  ;;  %vm1932_vm8 = vcmp.gt.f32.partialorder %v1867_v59, 0.0  ;;  %v1990_v35 = vmul.f32 0.1, %v1859_v23  ;;  %vm1926_vm12 = vcmp.gt.f32.partialorder %v1859_v23, 0.0 }
 0x2d1   : > { %v2056_v45 = vsel %vm1928_vm11, %v1862_v49, %v1992_v37 }
 0x2d2   : > { %v2060_v43 = vsel %vm1932_vm8, %v1867_v59, %v1996_v42  ;;  %v2054_v19 = vsel %vm1926_vm12, %v1859_v23, %v1990_v35  ;;  %v4896_v59 = vpop.permute.xlu0 %2149  ;;  %v5408_v35 = vpack.c.bf16 %v4685_v13, %v4683_v60 }
 0x2d3   : > { %v1779_v56 = vpop.f32.mrf.mxu2 }
 0x2d4   : > { %v1780_v24 = vadd.f32 %v1779_v56, %v1691_v4  ;;  %v2296_v16 = vpop.f32.mrf.mxu0  ;;  %v1868_v8 = vpop.f32.mrf.mxu3  ;;  %v1994_v56 = vmul.f32 0.1, %v1864_v5  ;;  %v2052_v4 = vsel %vm1924_vm13, %v1857_v47, %v1988_v54  ;;  %v5406_v47 = vpack.c.bf16 %v4750_v57, %v4748_v27 }
 0x2d5   : > { %v2297_v20 = vadd.f32 %v2296_v16, %v4880_v48  ;;  %v2345_v18 = vpop.f32.mrf.mxu1  ;;  %v4891_v58 = vpop.permute.xlu2 %2134  ;;  %v2090_v11 = vpack.c.bf16 %v2054_v19, %v2052_v4  ;;  %v2050_v16 = vsel %vm1922_vm15, %v1854_v38, %v1986_v51 }
 0x2d6   : > { %v1869_v14 = vadd.f32 %v1868_v8, %v1780_v24  ;;  %v2058_v2 = vsel %vm1930_vm10, %v1864_v5, %v1994_v56 }
 0x2d7   : > { %v2346_v1 = vadd.f32 %v2345_v18, %v2297_v20  ;;  %v2092_v10 = vpack.c.bf16 %v2058_v2, %v2056_v45 }
 0x2d8   : > { %vm1934_vm9 = vcmp.gt.f32.partialorder %v1869_v14, 0.0  ;;  %v1998_v25 = vmul.f32 0.1, %v1869_v14 }
 0x2d9   : > { %v2515_v29 = vmul.f32 0.1, %v2346_v1  ;;  %vm2483_vm14 = vcmp.gt.f32.partialorder %v2346_v1, 0.0 }
 0x2da   : > { %v2062_v34 = vsel %vm1934_vm9, %v1869_v14, %v1998_v25  ;;  %v4903_v42 = vpop.permute.xlu0 %2144 }
 0x2db   : > { %v2094_v40 = vpack.c.bf16 %v2062_v34, %v2060_v43  ;;  %v2547_v44 = vsel %vm2483_vm14, %v2346_v1, %v2515_v29  ;;  %v5405_v1 = vpack.c.bf16 %v4774_v7, %v4772_v9  ;;  %v5407_v9 = vpack.c.bf16 %v4723_v62, %v4721_v0 }
 0x2dc   : > { %2423 = vmatmul.bf16.gmra.mxu2 %v4829_v31  ;;  %v2298_v6 = vpop.f32.mrf.mxu0  ;;  %v1984_v31 = vmul.f32 0.1, %v4783_v50 }
 0x2dd   : > { %v2299_v30 = vadd.f32 %v2298_v6, %v4891_v58  ;;  %2434 = vmatpush.bf16.msra.mxu3 %v2094_v40  ;;  %v2347_v22 = vpop.f32.mrf.mxu1 }
 0x2de   : > { %v2048_v18 = vsel %vm1920_vm1, %v4783_v50, %v1984_v31 }
 0x2df   : > { %v2348_v53 = vadd.f32 %v2347_v22, %v2299_v30  ;;  %v2088_v49 = vpack.c.bf16 %v2050_v16, %v2048_v18 }
 0x2e1   : > { %vm2485_vm0 = vcmp.gt.f32.partialorder %v2348_v53, 0.0  ;;  %v2517_v32 = vmul.f32 0.1, %v2348_v53  ;;  %2435 = vmatpush.bf16.msra.mxu3 %v2092_v10 }
 0x2e3   : > { %v2549_v5 = vsel %vm2485_vm0, %v2348_v53, %v2517_v32 }
 0x2e4   : > { %v2301_v24 = vpop.f32.mrf.mxu0  ;;  %v4899_v61 = vpack.c.bf16 %v2549_v5, %v2547_v44 }
 0x2e5   : > { %v2302_v8 = vadd.f32 %v2301_v24, %v4877_v15  ;;  %2436 = vmatpush.bf16.msra.mxu3 %v2090_v11  ;;  %v2350_v20 = vpop.f32.mrf.mxu1 }
 0x2e7   : > { %v2351_v17 = vadd.f32 %v2350_v20, %v2302_v8 }
 0x2e9   : > { %2437 = vmatpush.bf16.msra.mxu3 %v2088_v49  ;;  %v2519_v56 = vmul.f32 0.1, %v2351_v17  ;;  %vm2487_vm2 = vcmp.gt.f32.partialorder %v2351_v17, 0.0 }
 0x2eb   : > { %v2551_v37 = vsel %vm2487_vm2, %v2351_v17, %v2519_v56 }
 0x2ec   : > { %2428 = vmatmul.bf16.gmra.mxu2 %v4857_v33  ;;  %v2303_v14 = vpop.f32.mrf.mxu0 }
 0x2ed   : > { %v2304_v3 = vadd.f32 %v2303_v14, %v4903_v42  ;;  %2438 = vmatpush.bf16.msra.mxu3 %v5405_v1  ;;  %v2352_v23 = vpop.f32.mrf.mxu1 }
 0x2ef   : > { %v2353_v25 = vadd.f32 %v2352_v23, %v2304_v3 }
 0x2f1   : > { %vm2489_vm3 = vcmp.gt.f32.partialorder %v2353_v25, 0.0  ;;  %v2521_v50 = vmul.f32 0.1, %v2353_v25  ;;  %2439 = vmatpush.bf16.msra.mxu3 %v5406_v47  ;;  %v5409_v47 = vld [vmem:[#allocation74_spill] sm:$0xff] }
 0x2f3   : > { %v2553_v43 = vsel %vm2489_vm3, %v2353_v25, %v2521_v50 }
 0x2f4   : > { %v2306_v33 = vpop.f32.mrf.mxu0  ;;  %v4913_v34 = vpack.c.bf16 %v2553_v43, %v2551_v37  ;;  %v5410_v37 = vld [vmem:[#allocation17_spill] sm:$0xff] }
 0x2f5   : > { %v2307_v40 = vadd.f32 %v2306_v33, %v4896_v59  ;;  %2440 = vmatpush.bf16.msra.mxu3 %v5407_v9  ;;  %v2355_v7 = vpop.f32.mrf.mxu1  ;;  %v5412_v9 = vld [vmem:[#allocation51_spill] sm:$0xff] }
 0x2f7   : > { %v2356_v38 = vadd.f32 %v2355_v7, %v2307_v40  ;;  %v5411_v40 = vld [vmem:[#allocation16_spill] sm:$0xff] }
 0x2f9   : > { %2441 = vmatpush.bf16.msra.mxu3 %v5408_v35  ;;  %v2523_v2 = vmul.f32 0.1, %v2356_v38  ;;  %vm2491_vm4 = vcmp.gt.f32.partialorder %v2356_v38, 0.0  ;;  %v5413_v35 = vld [vmem:[#allocation18_spill] sm:$0xff] }
 0x2fb   : > { %v2555_v54 = vsel %vm2491_vm4, %v2356_v38, %v2523_v2 }
 0x2fc   : > { %2442 = vmatmul.bf16.vlgmr.msra.gmra.mxu3 %v4650_v21  ;;  %v2308_v27 = vpop.f32.mrf.mxu0 }
 0x2fd   : > { %v2309_v57 = vadd.f32 %v2308_v27, %v4866_v52  ;;  %v2357_v6 = vpop.f32.mrf.mxu1 }
 0x2ff   : > { %v2358_v30 = vadd.f32 %v2357_v6, %v2309_v57  ;;  %v5414_v57 = vld [vmem:[#allocation20_spill] sm:$0xff] }
 0x301   : > { %vm2493_vm5 = vcmp.gt.f32.partialorder %v2358_v30, 0.0  ;;  %v2525_v22 = vmul.f32 0.1, %v2358_v30 }
 0x303   : > { %v2557_v0 = vsel %vm2493_vm5, %v2358_v30, %v2525_v22 }
 0x304   : > { %v2311_v62 = vpop.f32.mrf.mxu0  ;;  %v4924_v45 = vpack.c.bf16 %v2557_v0, %v2555_v54 }
 0x305   : > { %v2312_v29 = vadd.f32 %v2311_v62, %v4844_v55  ;;  %v2360_v60 = vpop.f32.mrf.mxu1 }
 0x307   : > { %v2361_v13 = vadd.f32 %v2360_v60, %v2312_v29 }
 0x309   : > { %v2527_v51 = vmul.f32 0.1, %v2361_v13  ;;  %vm2495_vm6 = vcmp.gt.f32.partialorder %v2361_v13, 0.0 }
 0x30b   : > { %v2559_v31 = vsel %vm2495_vm6, %v2361_v13, %v2527_v51 }
 0x30c   : > { %2447 = vmatmul.bf16.gmra.mxu3 %v4677_v28  ;;  %v2313_v21 = vpop.f32.mrf.mxu0 }
 0x30d   : > { %v2314_v53 = vadd.f32 %v2313_v21, %v4863_v36  ;;  %v2362_v10 = vpop.f32.mrf.mxu1 }
 0x30f   : > { %v2363_v19 = vadd.f32 %v2362_v10, %v2314_v53 }
 0x311   : > { %vm2497_vm7 = vcmp.gt.f32.partialorder %v2363_v19, 0.0  ;;  %v2529_v32 = vmul.f32 0.1, %v2363_v19 }
 0x313   : > { %v2561_v4 = vsel %vm2497_vm7, %v2363_v19, %v2529_v32 }
 0x314   : > { %v2316_v11 = vpop.f32.mrf.mxu0  ;;  %v4929_v44 = vpack.c.bf16 %v2561_v4, %v2559_v31 }
 0x315   : > { %v2317_v5 = vadd.f32 %v2316_v11, %v4839_v41  ;;  %v2365_v24 = vpop.f32.mrf.mxu1 }
 0x317   : > { %v4932_v16 = vadd.f32 %v2365_v24, %v2317_v5 }
 0x319   : > { %vm2499_vm15 = vcmp.gt.f32.partialorder %v4932_v16, 0.0 }
 0x31c   : > { %2452 = vmatmul.bf16.gmra.mxu3 %v4710_v46  ;;  %v2318_v28 = vpop.f32.mrf.mxu0 }
 0x31d   : > { %v2367_v8 = vpop.f32.mrf.mxu1  ;;  %v2319_v54 = vadd.f32 %v2318_v28, %v4886_v63  ;;  %v2394_v28 = vpop.f32.mrf.mxu2 }
 0x31f   : > { %v2368_v51 = vadd.f32 %v2367_v8, %v2319_v54  ;;  %v5415_v8 = vld [vmem:[#allocation73_spill] sm:$0xff] }
 0x321   : > { %v2533_v5 = vmul.f32 0.1, %v2368_v51  ;;  %vm2501_vm14 = vcmp.gt.f32.partialorder %v2368_v51, 0.0 }
 0x324   : > { %v2321_v20 = vpop.f32.mrf.mxu0 }
 0x325   : > { %v2370_v18 = vpop.f32.mrf.mxu1  ;;  %v2322_v6 = vadd.f32 %v2321_v20, %v5414_v57  ;;  %v2531_v20 = vmul.f32 0.1, %v4932_v16 }
 0x327   : > { %v2371_v60 = vadd.f32 %v2370_v18, %v2322_v6 }
 0x329   : > { %v2535_v31 = vmul.f32 0.1, %v2371_v60  ;;  %vm2503_vm13 = vcmp.gt.f32.partialorder %v2371_v60, 0.0 }
 0x32b   : > { %v2567_v18 = vsel %vm2503_vm13, %v2371_v60, %v2535_v31 }
 0x32c   : > { %2457 = vmatmul.bf16.gmra.mxu3 %v4743_v26  ;;  %v2323_v17 = vpop.f32.mrf.mxu0 }
 0x32d   : > { %v2372_v49 = vpop.f32.mrf.mxu1  ;;  %v2324_v7 = vadd.f32 %v2323_v17, %v5412_v9 }
 0x32f   : > { %v2373_v0 = vadd.f32 %v2372_v49, %v2324_v7  ;;  %v2565_v49 = vsel %vm2501_vm14, %v2368_v51, %v2533_v5 }
 0x331   : > { %v2537_v19 = vmul.f32 0.1, %v2373_v0  ;;  %vm2505_vm12 = vcmp.gt.f32.partialorder %v2373_v0, 0.0 }
 0x333   : > { %v2569_v24 = vsel %vm2505_vm12, %v2373_v0, %v2537_v19 }
 0x334   : > { %v2326_v14 = vpop.f32.mrf.mxu0  ;;  %v2589_v17 = vpack.c.bf16 %v2569_v24, %v2567_v18 }
 0x335   : > { %v2375_v3 = vpop.f32.mrf.mxu1  ;;  %v2327_v43 = vadd.f32 %v2326_v14, %v5410_v37  ;;  %v2563_v14 = vsel %vm2499_vm15, %v4932_v16, %v2531_v20  ;;  %v4959_v16 = vld [vmem:[%s5111_s5] sm:$0xff] }
 0x337   : > { %v2376_v2 = vadd.f32 %v2375_v3, %v2327_v43  ;;  %v2587_v3 = vpack.c.bf16 %v2565_v49, %v2563_v14 }
 0x339   : > { %v2539_v13 = vmul.f32 0.1, %v2376_v2  ;;  %vm2507_vm11 = vcmp.gt.f32.partialorder %v2376_v2, 0.0 }
 0x33b   : > { %v2571_v4 = vsel %vm2507_vm11, %v2376_v2, %v2539_v13 }
 0x33c   : > { %2462 = vmatmul.bf16.gmra.mxu3 %v4768_v12  ;;  %v2328_v1 = vpop.f32.mrf.mxu0 }
 0x33d   : > { %v2377_v23 = vpop.f32.mrf.mxu1  ;;  %v2329_v46 = vadd.f32 %v2328_v1, %v5409_v47  ;;  %v2396_v1 = vpop.f32.mrf.mxu2 }
 0x33f   : > { %v2378_v38 = vadd.f32 %v2377_v23, %v2329_v46  ;;  %v5416_v23 = vld [vmem:[#allocation19_spill] sm:$0xff]  ;;  %v4974_v46 = vld [vmem:[%s5111_s5 + $0x8] sm:$0xff] }
 0x341   : > { %v2541_v62 = vmul.f32 0.1, %v2378_v38  ;;  %vm2509_vm10 = vcmp.gt.f32.partialorder %v2378_v38, 0.0 }
 0x343   : > { %v2573_v32 = vsel %vm2509_vm10, %v2378_v38, %v2541_v62 }
 0x344   : > { %v2331_v56 = vpop.f32.mrf.mxu0  ;;  %v2591_v11 = vpack.c.bf16 %v2573_v32, %v2571_v4 }
 0x345   : > { %v2380_v25 = vpop.f32.mrf.mxu1  ;;  %v2332_v50 = vadd.f32 %v2331_v56, %v4806_v39  ;;  %v2399_v56 = vpop.f32.mrf.mxu2 }
 0x346   : > { %v2400_v6 = vadd.f32 %v2399_v56, %v4877_v15 }
 0x347   : > { %v2381_v33 = vadd.f32 %v2380_v25, %v2332_v50 }
 0x349   : > { %v2543_v30 = vmul.f32 0.1, %v2381_v33  ;;  %vm2511_vm8 = vcmp.gt.f32.partialorder %v2381_v33, 0.0 }
 0x34b   : > { %v2575_v21 = vsel %vm2511_vm8, %v2381_v33, %v2543_v30  ;;  %v2397_v33 = vadd.f32 %v2396_v1, %v4891_v58 }
 0x34c   : > { %2467 = vmatmul.bf16.gmra.mxu3 %v5411_v40  ;;  %v2333_v26 = vpop.f32.mrf.mxu0 }
 0x34d   : > { %v2334_v27 = vadd.f32 %v2333_v26, %v5413_v35  ;;  %v2382_v12 = vpop.f32.mrf.mxu1 }
 0x34f   : > { %v2383_v22 = vadd.f32 %v2382_v12, %v2334_v27 }
 0x351   : > { %vm2513_vm9 = vcmp.gt.f32.partialorder %v2383_v22, 0.0  ;;  %v2545_v29 = vmul.f32 0.1, %v2383_v22 }
 0x353   : > { %v2577_v53 = vsel %vm2513_vm9, %v2383_v22, %v2545_v29  ;;  %v4984_v22 = vld [vmem:[%s5111_s5 + $0x10] sm:$0xff] }
 0x354   : > { %v2593_v10 = vpack.c.bf16 %v2577_v53, %v2575_v21 }
 0x356   : > { %2675 = vmatpush.bf16.msrb.mxu0 %v2593_v10  ;;  %3382 = vmatpush.bf16.msrb.mxu2 %v2593_v10 }
 0x35a   : > { %2676 = vmatpush.bf16.msrb.mxu0 %v2591_v11  ;;  %3383 = vmatpush.bf16.msrb.mxu2 %v2591_v11 }
 0x35c   : > { %2472 = vmatmul.bf16.gmra.mxu3 %v5415_v8 }
 0x35e   : > { %2677 = vmatpush.bf16.msrb.mxu0 %v2589_v17  ;;  %3384 = vmatpush.bf16.msrb.mxu2 %v2589_v17 }
 0x362   : > { %2678 = vmatpush.bf16.msrb.mxu0 %v2587_v3  ;;  %3385 = vmatpush.bf16.msrb.mxu2 %v2587_v3 }
 0x366   : > { %2679 = vmatpush.bf16.msrb.mxu0 %v4929_v44  ;;  %3386 = vmatpush.bf16.msrb.mxu2 %v4929_v44  ;;  %v4964_v44 = vld [vmem:[%s5111_s5 + $0x18] sm:$0xff] }
 0x36a   : > { %2680 = vmatpush.bf16.msrb.mxu0 %v4924_v45  ;;  %3387 = vmatpush.bf16.msrb.mxu2 %v4924_v45  ;;  %v2401_v45 = vpop.f32.mrf.mxu2 }
 0x36b   : > { %v2402_v58 = vadd.f32 %v2401_v45, %v4903_v42 }
 0x36c   : > { %2477 = vmatmul.bf16.gmra.mxu3 %v5416_v23 }
 0x36e   : > { %2681 = vmatpush.bf16.msrb.mxu0 %v4913_v34  ;;  %3388 = vmatpush.bf16.msrb.mxu2 %v4913_v34  ;;  %v2395_v34 = vadd.f32 %v2394_v28, %v4880_v48 }
 0x372   : > { %2682 = vmatpush.bf16.msrb.mxu0 %v4899_v61  ;;  %3389 = vmatpush.bf16.msrb.mxu2 %v4899_v61  ;;  %v2404_v43 = vpop.f32.mrf.mxu2 }
 0x373   : > { %v2405_v53 = vadd.f32 %v2404_v43, %v4896_v59 }
 0x375   : > { %2683 = vmatmul.bf16.vlgmr.msrb.gmra.mxu0 %v4959_v16  ;;  %2698 = vmatmul.bf16.vlgmr.msrb.gmra.mxu2 %v4964_v44 }
 0x37a   : > { %v2406_v38 = vpop.f32.mrf.mxu2 }
 0x37b   : > { %v2407_v32 = vadd.f32 %v2406_v38, %v4866_v52 }
 0x37f   : > { %v2443_v25 = vpop.f32.mrf.mxu3 }
 0x380   : > { %v2444_v50 = vadd.f32 %v2443_v25, %v2395_v34 }
 0x382   : > { %v2516_v40 = vmul.f32 0.1, %v2444_v50  ;;  %vm2484_vm0 = vcmp.gt.f32.partialorder %v2444_v50, 0.0  ;;  %v2409_v54 = vpop.f32.mrf.mxu2 }
 0x383   : > { %v2410_v18 = vadd.f32 %v2409_v54, %v4844_v55 }
 0x384   : > { %v2548_v48 = vsel %vm2484_vm0, %v2444_v50, %v2516_v40 }
 0x385   : > { %2688 = vmatmul.bf16.gmra.mxu0 %v4974_v46 }
 0x387   : > { %v2445_v61 = vpop.f32.mrf.mxu3 }
 0x388   : > { %v2446_v26 = vadd.f32 %v2445_v61, %v2397_v33 }
 0x38a   : > { %vm2486_vm1 = vcmp.gt.f32.partialorder %v2446_v26, 0.0  ;;  %v2518_v7 = vmul.f32 0.1, %v2446_v26  ;;  %v2411_v51 = vpop.f32.mrf.mxu2 }
 0x38b   : > { %v2412_v49 = vadd.f32 %v2411_v51, %v4863_v36 }
 0x38c   : > { %v2550_v27 = vsel %vm2486_vm1, %v2446_v26, %v2518_v7 }
 0x38d   : > { %v4978_v12 = vpack.c.bf16 %v2550_v27, %v2548_v48 }
 0x38f   : > { %v2448_v2 = vpop.f32.mrf.mxu3 }
 0x390   : > { %v2449_v30 = vadd.f32 %v2448_v2, %v2400_v6 }
 0x392   : > { %v2520_v62 = vmul.f32 0.1, %v2449_v30  ;;  %vm2488_vm2 = vcmp.gt.f32.partialorder %v2449_v30, 0.0  ;;  %v2414_v11 = vpop.f32.mrf.mxu2 }
 0x393   : > { %v2415_v34 = vadd.f32 %v2414_v11, %v4839_v41 }
 0x394   : > { %v2552_v13 = vsel %vm2488_vm2, %v2449_v30, %v2520_v62 }
 0x395   : > { %2693 = vmatmul.bf16.gmra.mxu0 %v4984_v22 }
 0x397   : > { %v2450_v0 = vpop.f32.mrf.mxu3 }
 0x398   : > { %v2451_v29 = vadd.f32 %v2450_v0, %v2402_v58 }
 0x39a   : > { %vm2490_vm3 = vcmp.gt.f32.partialorder %v2451_v29, 0.0  ;;  %v2522_v60 = vmul.f32 0.1, %v2451_v29  ;;  %v2416_v17 = vpop.f32.mrf.mxu2 }
 0x39b   : > { %v2417_v43 = vadd.f32 %v2416_v17, %v4886_v63 }
 0x39c   : > { %v2554_v15 = vsel %vm2490_vm3, %v2451_v29, %v2522_v60 }
 0x39d   : > { %v4988_v21 = vpack.c.bf16 %v2554_v15, %v2552_v13 }
 0x39f   : > { %v2453_v10 = vpop.f32.mrf.mxu3 }
 0x3a0   : > { %v2454_v19 = vadd.f32 %v2453_v10, %v2405_v53 }
 0x3a2   : > { %v2524_v42 = vmul.f32 0.1, %v2454_v19  ;;  %vm2492_vm4 = vcmp.gt.f32.partialorder %v2454_v19, 0.0  ;;  %v2419_v25 = vpop.f32.mrf.mxu2 }
 0x3a3   : > { %v2420_v11 = vadd.f32 %v2419_v25, %v5414_v57  ;;  %v5013_v57 = vpop.permute.xlu1 %2648 }
 0x3a4   : > { %v2556_v24 = vsel %vm2492_vm4, %v2454_v19, %v2524_v42 }
 0x3a7   : > { %v2455_v31 = vpop.f32.mrf.mxu3 }
 0x3a8   : > { %v2456_v4 = vadd.f32 %v2455_v31, %v2407_v32 }
 0x3aa   : > { %vm2494_vm5 = vcmp.gt.f32.partialorder %v2456_v4, 0.0  ;;  %v2526_v5 = vmul.f32 0.1, %v2456_v4  ;;  %v2421_v61 = vpop.f32.mrf.mxu2 }
 0x3ab   : > { %v2422_v19 = vadd.f32 %v2421_v61, %v5412_v9 }
 0x3ac   : > { %v2558_v28 = vsel %vm2494_vm5, %v2456_v4, %v2526_v5 }
 0x3ad   : > { %v4992_v20 = vpack.c.bf16 %v2558_v28, %v2556_v24 }
 0x3af   : > { %v2458_v8 = vpop.f32.mrf.mxu3 }
 0x3b0   : > { %v2459_v59 = vadd.f32 %v2458_v8, %v2410_v18 }
 0x3b2   : > { %v2528_v52 = vmul.f32 0.1, %v2459_v59  ;;  %vm2496_vm6 = vcmp.gt.f32.partialorder %v2459_v59, 0.0  ;;  %v2424_v6 = vpop.f32.mrf.mxu2 }
 0x3b3   : > { %v2425_v15 = vadd.f32 %v2424_v6, %v5410_v37  ;;  %v5010_v37 = vpop.permute.xlu0 %2643 }
 0x3b4   : > { %v2560_v23 = vsel %vm2496_vm6, %v2459_v59, %v2528_v52 }
 0x3b7   : > { %v2460_v14 = vpop.f32.mrf.mxu3 }
 0x3b8   : > { %v2461_v3 = vadd.f32 %v2460_v14, %v2412_v49 }
 0x3ba   : > { %vm2498_vm7 = vcmp.gt.f32.partialorder %v2461_v3, 0.0  ;;  %v2530_v1 = vmul.f32 0.1, %v2461_v3  ;;  %v2426_v41 = vpop.f32.mrf.mxu2 }
 0x3bb   : > { %v2427_v60 = vadd.f32 %v2426_v41, %v5409_v47 }
 0x3bc   : > { %v2562_v56 = vsel %vm2498_vm7, %v2461_v3, %v2530_v1 }
 0x3bd   : > { %v4996_v45 = vpack.c.bf16 %v2562_v56, %v2560_v23 }
 0x3bf   : > { %v2463_v50 = vpop.f32.mrf.mxu3 }
 0x3c0   : > { %v2464_v55 = vadd.f32 %v2463_v50, %v2415_v34 }
 0x3c2   : > { %v2532_v36 = vmul.f32 0.1, %v2464_v55  ;;  %vm2500_vm8 = vcmp.gt.f32.partialorder %v2464_v55, 0.0  ;;  %v2429_v58 = vpop.f32.mrf.mxu2 }
 0x3c3   : > { %v2430_v62 = vadd.f32 %v2429_v58, %v4806_v39 }
 0x3c4   : > { %v2564_v7 = vsel %vm2500_vm8, %v2464_v55, %v2532_v36  ;;  %vm2796_vm8 = vcmask 523264  }
 0x3c7   : > { %v2465_v33 = vpop.f32.mrf.mxu3 }
 0x3c8   : > { %v2466_v40 = vadd.f32 %v2465_v33, %v2417_v43 }
 0x3ca   : > { %vm2502_vm9 = vcmp.gt.f32.partialorder %v2466_v40, 0.0  ;;  %v2534_v26 = vmul.f32 0.1, %v2466_v40  ;;  %v2431_v63 = vpop.f32.mrf.mxu2 }
 0x3cb   : > { %v2432_v53 = vadd.f32 %v2431_v63, %v5413_v35 }
 0x3cc   : > { %v2566_v38 = vsel %vm2502_vm9, %v2466_v40, %v2534_v26  ;;  %v5018_v26 = vpop.permute.xlu2 %2633 }
 0x3cd   : > { %v5000_v48 = vpack.c.bf16 %v2566_v38, %v2564_v7  ;;  %v5022_v7 = vpop.permute.xlu1 %2623 }
 0x3cf   : > { %v2468_v27 = vpop.f32.mrf.mxu3 }
 0x3d0   : > { %v2469_v35 = vadd.f32 %v2468_v27, %v2420_v11  ;;  %v5026_v27 = vpop.permute.xlu0 %2638 }
 0x3d2   : > { %v2536_v14 = vmul.f32 0.1, %v2469_v35  ;;  %vm2504_vm15 = vcmp.gt.f32.partialorder %v2469_v35, 0.0 }
 0x3d4   : > { %v2568_v55 = vsel %vm2504_vm15, %v2469_v35, %v2536_v14 }
 0x3d7   : > { %v2470_v2 = vpop.f32.mrf.mxu3 }
 0x3d8   : > { %v2471_v39 = vadd.f32 %v2470_v2, %v2422_v19  ;;  %v5041_v63 = vpop.permute.xlu0 %2613 }
 0x3da   : > { %v2538_v17 = vmul.f32 0.1, %v2471_v39  ;;  %vm2506_vm14 = vcmp.gt.f32.partialorder %v2471_v39, 0.0 }
 0x3dc   : > { %v2570_v25 = vsel %vm2506_vm14, %v2471_v39, %v2538_v17 }
 0x3dd   : > { %v2590_v61 = vpack.c.bf16 %v2570_v25, %v2568_v55 }
 0x3df   : > { %v2473_v30 = vpop.f32.mrf.mxu3 }
 0x3e0   : > { %v2474_v32 = vadd.f32 %v2473_v30, %v2425_v15 }
 0x3e2   : > { %v2540_v28 = vmul.f32 0.1, %v2474_v32  ;;  %vm2508_vm13 = vcmp.gt.f32.partialorder %v2474_v32, 0.0 }
 0x3e4   : > { %v2572_v3 = vsel %vm2508_vm13, %v2474_v32, %v2540_v28 }
 0x3e7   : > { %v2475_v54 = vpop.f32.mrf.mxu3 }
 0x3e8   : > { %v2476_v10 = vadd.f32 %v2475_v54, %v2427_v60 }
 0x3ea   : > { %v2542_v5 = vmul.f32 0.1, %v2476_v10  ;;  %vm2510_vm12 = vcmp.gt.f32.partialorder %v2476_v10, 0.0 }
 0x3ec   : > { %v2574_v49 = vsel %vm2510_vm12, %v2476_v10, %v2542_v5 }
 0x3ed   : > { %v2592_v56 = vpack.c.bf16 %v2574_v49, %v2572_v3 }
 0x3ef   : > { %v2478_v0 = vpop.f32.mrf.mxu3 }
 0x3f0   : > { %v2479_v13 = vadd.f32 %v2478_v0, %v2430_v62 }
 0x3f2   : > { %v5003_v29 = vpop.f32.mrf.mxu0  ;;  %v2544_v31 = vmul.f32 0.1, %v2479_v13  ;;  %vm2512_vm10 = vcmp.gt.f32.partialorder %v2479_v13, 0.0 }
 0x3f3   : > { %v2685_v62 = vadd.f32 %v5003_v29, %v5041_v63  ;;  %v2789_v29 = vld [vmem:[%s5113_s7] sm:$0xf] }
 0x3f4   : > { %v2576_v18 = vsel %vm2512_vm10, %v2479_v13, %v2544_v31 }
 0x3f5   : > { %vm2733_vm7 = vcmp.gt.f32.partialorder %v2685_v62, 0.0 }
 0x3f7   : > { %v2480_v51 = vpop.f32.mrf.mxu3 }
 0x3f8   : > { %v2481_v42 = vadd.f32 %v2480_v51, %v2432_v53  ;;  %v2699_v4 = vpop.f32.mrf.mxu2  ;;  %v2749_v51 = vmul.f32 0.1, %v2685_v62 }
 0x3f9   : > { %v2700_v59 = vadd.f32 %v2699_v4, %v5010_v37 }
 0x3fa   : > { %vm2514_vm11 = vcmp.gt.f32.partialorder %v2481_v42, 0.0  ;;  %v2546_v47 = vmul.f32 0.1, %v2481_v42  ;;  %v2686_v24 = vpop.f32.mrf.mxu0 }
 0x3fb   : > { %v2761_v1 = vmul.f32 0.1, %v2700_v59  ;;  %vm2745_vm0 = vcmp.gt.f32.partialorder %v2700_v59, 0.0 }
 0x3fc   : > { %v2578_v8 = vsel %vm2514_vm11, %v2481_v42, %v2546_v47 }
 0x3fd   : > { %v2594_v9 = vpack.c.bf16 %v2578_v8, %v2576_v18  ;;  %v2777_v43 = vsel %vm2745_vm0, %v2700_v59, %v2761_v1 }
 0x3ff   : > { %2704 = vmatpush.bf16.msrb.mxu1 %v2594_v9  ;;  %3390 = vmatpush.bf16.msrb.mxu3 %v2594_v9 }
 0x400   : > { %v2701_v52 = vpop.f32.mrf.mxu2 }
 0x401   : > { %v2702_v23 = vadd.f32 %v2701_v52, %v5013_v57 }
 0x402   : > { %v2689_v34 = vpop.f32.mrf.mxu0 }
 0x403   : > { %vm2747_vm1 = vcmp.gt.f32.partialorder %v2702_v23, 0.0  ;;  %v2763_v50 = vmul.f32 0.1, %v2702_v23  ;;  %2705 = vmatpush.bf16.msrb.mxu1 %v2592_v56  ;;  %3391 = vmatpush.bf16.msrb.mxu3 %v2592_v56  ;;  %v2690_v41 = vadd.f32 %v2689_v34, %v5022_v7 }
 0x405   : > { %v2779_v33 = vsel %vm2747_vm1, %v2702_v23, %v2763_v50  ;;  %v2753_v60 = vmul.f32 0.1, %v2690_v41  ;;  %vm2737_vm5 = vcmp.gt.f32.partialorder %v2690_v41, 0.0 }
 0x406   : > { %v2787_v36 = vpack.c.bf16 %v2779_v33, %v2777_v43 }
 0x407   : > { %2706 = vmatpush.bf16.msrb.mxu1 %v2590_v61  ;;  %3392 = vmatpush.bf16.msrb.mxu3 %v2590_v61  ;;  %v2769_v19 = vsel %vm2737_vm5, %v2690_v41, %v2753_v60 }
 0x408   : > { %2804 = vmatpush.bf16.msra.mxu2 %v2787_v36 }
 0x40a   : > { %v2691_v40 = vpop.f32.mrf.mxu0 }
 0x40b   : > { %2707 = vmatpush.bf16.msrb.mxu1 %v5000_v48  ;;  %3393 = vmatpush.bf16.msrb.mxu3 %v5000_v48  ;;  %v5031_v48 = vpop.permute.xlu2 %2628 }
 0x40c   : > { %v2692_v2 = vadd.f32 %v2691_v40, %v5031_v48 }
 0x40e   : > { %vm2739_vm4 = vcmp.gt.f32.partialorder %v2692_v2, 0.0 }
 0x40f   : > { %2708 = vmatpush.bf16.msrb.mxu1 %v4996_v45  ;;  %3394 = vmatpush.bf16.msrb.mxu3 %v4996_v45 }
 0x412   : > { %v2694_v38 = vpop.f32.mrf.mxu0 }
 0x413   : > { %2709 = vmatpush.bf16.msrb.mxu1 %v4992_v20  ;;  %3395 = vmatpush.bf16.msrb.mxu3 %v4992_v20  ;;  %v2695_v6 = vadd.f32 %v2694_v38, %v5018_v26  ;;  %v5038_v20 = vpop.permute.xlu1 %2618 }
 0x414   : > { %v2687_v54 = vadd.f32 %v2686_v24, %v5038_v20 }
 0x415   : > { %v2757_v30 = vmul.f32 0.1, %v2695_v6  ;;  %vm2741_vm2 = vcmp.gt.f32.partialorder %v2695_v6, 0.0 }
 0x416   : > { %v2751_v53 = vmul.f32 0.1, %v2687_v54  ;;  %vm2735_vm6 = vcmp.gt.f32.partialorder %v2687_v54, 0.0 }
 0x417   : > { %2710 = vmatpush.bf16.msrb.mxu1 %v4988_v21  ;;  %3396 = vmatpush.bf16.msrb.mxu3 %v4988_v21  ;;  %v2755_v21 = vmul.f32 0.1, %v2692_v2 }
 0x418   : > { %v2767_v31 = vsel %vm2735_vm6, %v2687_v54, %v2751_v53 }
 0x419   : > { %v2771_v10 = vsel %vm2739_vm4, %v2692_v2, %v2755_v21 }
 0x41a   : > { %v2696_v45 = vpop.f32.mrf.mxu0  ;;  %v2783_v32 = vpack.c.bf16 %v2771_v10, %v2769_v19 }
 0x41b   : > { %v2697_v58 = vadd.f32 %v2696_v45, %v5026_v27  ;;  %2711 = vmatpush.bf16.msrb.mxu1 %v4978_v12  ;;  %3397 = vmatpush.bf16.msrb.mxu3 %v4978_v12  ;;  %v2773_v12 = vsel %vm2741_vm2, %v2695_v6, %v2757_v30 }
 0x41d   : > { %vm2743_vm3 = vcmp.gt.f32.partialorder %v2697_v58, 0.0  ;;  %v2759_v0 = vmul.f32 0.1, %v2697_v58 }
 0x41e   : > { %2712 = vmatmul.bf16.vlgmr.msrb.gmra.mxu1 %v4959_v16  ;;  %2727 = vmatmul.bf16.vlgmr.msrb.gmra.mxu3 %v4964_v44  ;;  %v2765_v16 = vsel %vm2733_vm7, %v2685_v62, %v2749_v51 }
 0x41f   : > { %v2775_v13 = vsel %vm2743_vm3, %v2697_v58, %v2759_v0  ;;  %v2781_v44 = vpack.c.bf16 %v2767_v31, %v2765_v16 }
 0x420   : > { %v2785_v15 = vpack.c.bf16 %v2775_v13, %v2773_v12 }
 0x422   : > { %2805 = vmatpush.bf16.msra.mxu2 %v2785_v15 }
 0x426   : > { %2806 = vmatpush.bf16.msra.mxu2 %v2783_v32 }
 0x42a   : > { %2807 = vmatpush.bf16.msra.mxu2 %v2781_v44 }
 0x42d   : > { %3289 = vmatmul.msk.bf16.vlgmr.msra.gmra.mxu2 %vm2796_vm8, %v2789_v29 }
 0x42e   : > { %2717 = vmatmul.bf16.gmra.mxu1 %v4974_v46  ;;  %v2794_v46 = vpop.permute.xlu2 %2793 }
 0x43e   : > { %2722 = vmatmul.bf16.gmra.mxu1 %v4984_v22 }
 0x49b   : > { %v2713_v42 = vpop.f32.mrf.mxu1 }
 0x49c   : > { %v2714_v50 = vadd.f32 %v2713_v42, %v5041_v63 }
 0x49e   : > { %vm2734_vm0 = vcmp.gt.f32.partialorder %v2714_v50, 0.0 }
 0x4a1   : > { %v2728_v4 = vpop.f32.mrf.mxu3 }
 0x4a2   : > { %v2729_v39 = vadd.f32 %v2728_v4, %v5010_v37 }
 0x4a3   : > { %v2715_v11 = vpop.f32.mrf.mxu1 }
 0x4a4   : > { %v2762_v47 = vmul.f32 0.1, %v2729_v39  ;;  %vm2746_vm9 = vcmp.gt.f32.partialorder %v2729_v39, 0.0  ;;  %v2716_v56 = vadd.f32 %v2715_v11, %v5038_v20 }
 0x4a6   : > { %v2778_v18 = vsel %vm2746_vm9, %v2729_v39, %v2762_v47  ;;  %v2752_v36 = vmul.f32 0.1, %v2716_v56  ;;  %vm2736_vm15 = vcmp.gt.f32.partialorder %v2716_v56, 0.0 }
 0x4a9   : > { %v2730_v5 = vpop.f32.mrf.mxu3 }
 0x4aa   : > { %v2731_v24 = vadd.f32 %v2730_v5, %v5013_v57 }
 0x4ab   : > { %v2718_v35 = vpop.f32.mrf.mxu1 }
 0x4ac   : > { %vm2748_vm10 = vcmp.gt.f32.partialorder %v2731_v24, 0.0  ;;  %v2764_v28 = vmul.f32 0.1, %v2731_v24  ;;  %v2719_v3 = vadd.f32 %v2718_v35, %v5022_v7 }
 0x4ae   : > { %v2780_v8 = vsel %vm2748_vm10, %v2731_v24, %v2764_v28  ;;  %v2754_v55 = vmul.f32 0.1, %v2719_v3  ;;  %vm2738_vm14 = vcmp.gt.f32.partialorder %v2719_v3, 0.0 }
 0x4af   : > { %v2788_v9 = vpack.c.bf16 %v2780_v8, %v2778_v18 }
 0x4b0   : > { %v2809_v59 = vpop.f32.mrf.mxu2  ;;  %v2770_v7 = vsel %vm2738_vm14, %v2719_v3, %v2754_v55 }
 0x4b1   : > { %v2810_v22 = vadd.f32 %v2809_v59, %v2794_v46  ;;  %2817 = vmatpush.bf16.msra.mxu3 %v2788_v9 }
 0x4b3   : > { %2826 = vst [vmem:[%s5056_s27] sm:$0xff] %v2810_v22  ;;  %v2720_v37 = vpop.f32.mrf.mxu1 }
 0x4b4   : > { %v2721_v14 = vadd.f32 %v2720_v37, %v5031_v48 }
 0x4b6   : > { %v2756_v34 = vmul.f32 0.1, %v2721_v14  ;;  %vm2740_vm13 = vcmp.gt.f32.partialorder %v2721_v14, 0.0 }
 0x4b8   : > { %v2811_v17 = vpop.f32.mrf.mxu2  ;;  %v2772_v40 = vsel %vm2740_vm13, %v2721_v14, %v2756_v34 }
 0x4b9   : > { %v2784_v38 = vpack.c.bf16 %v2772_v40, %v2770_v7 }
 0x4bb   : > { %v2723_v49 = vpop.f32.mrf.mxu1 }
 0x4bc   : > { %v2724_v57 = vadd.f32 %v2723_v49, %v5018_v26  ;;  %v2750_v26 = vmul.f32 0.1, %v2714_v50 }
 0x4be   : > { %v2758_v1 = vmul.f32 0.1, %v2724_v57  ;;  %vm2742_vm11 = vcmp.gt.f32.partialorder %v2724_v57, 0.0  ;;  %v2766_v6 = vsel %vm2734_vm0, %v2714_v50, %v2750_v26 }
 0x4c0   : > { %v2774_v43 = vsel %vm2742_vm11, %v2724_v57, %v2758_v1 }
 0x4c3   : > { %v2725_v52 = vpop.f32.mrf.mxu1 }
 0x4c4   : > { %v2726_v23 = vadd.f32 %v2725_v52, %v5026_v27  ;;  %v2768_v27 = vsel %vm2736_vm15, %v2716_v56, %v2752_v36 }
 0x4c5   : > { %v2782_v48 = vpack.c.bf16 %v2768_v27, %v2766_v6 }
 0x4c6   : > { %vm2744_vm12 = vcmp.gt.f32.partialorder %v2726_v23, 0.0  ;;  %v2760_v25 = vmul.f32 0.1, %v2726_v23 }
 0x4c8   : > { %v2776_v33 = vsel %vm2744_vm12, %v2726_v23, %v2760_v25 }
 0x4c9   : > { %v2786_v61 = vpack.c.bf16 %v2776_v33, %v2774_v43 }
 0x4cb   : > { %2818 = vmatpush.bf16.msra.mxu3 %v2786_v61 }
 0x4cf   : > { %2819 = vmatpush.bf16.msra.mxu3 %v2784_v38 }
 0x4d3   : > { %2820 = vmatpush.bf16.msra.mxu3 %v2782_v48 }
 0x4d6   : > { %3290 = vmatmul.msk.bf16.vlgmr.msra.gmra.mxu3 %vm2796_vm8, %v2789_v29 }
 0x559   : > { %v2822_v2 = vpop.f32.mrf.mxu3 }
 0x55a   : > { %v2823_v45 = vadd.f32 %v2822_v2, %v2794_v46 }
 0x55c   : > { %2827 = vst [vmem:[%s5056_s27 + $0x8] sm:$0xff] %v2823_v45 }
 0x55d   : > { %3564 = shalt.err (!%p3561_p0)
}
 0x55e   : > { %3404 = dma.vmem_to_hbm [thread:$0]  (%p3761_p5), %s2845_s25, 256, %s2847_s18, %s2829_s1  }
 0x561   : > { %v2824_v41 = vpop.f32.mrf.mxu3 }
 0x562 PF: > { %s5419_s15 = sld [smem:[#allocation11_spill]]  ;;  %p3415_p3 = pnand %p2945_p11, %p3728_p6 }
 0x563   : > { %s5421_s27 = sld [smem:[#allocation12_spill]] }
 0x564   : > { %p3416_p7 = pneg %p3415_p3 }
 0x568   : > { %s2858_s29 = sand.u32 1, %s5419_s15  }
 0x569   : > { %s2859_s16 = scalar_lea.sflag [#allocation4], %s2858_s29 }
 0x56a   : > { %3598 = dma.done.wait (%p3416_p7), %s2859_s16, 256  }
 0x56b   : > { %3600 = vsyncadd (%p3416_p7), %s2859_s16, 4294967040  ;;  %s26_s14 = sadd.s32 1, %s5421_s27   ;;  %s5422_s28 = sld [smem:[#allocation14_spill]] }
 0x56c   : > { %p23_p9 = scmp.ge.s32.totalorder %s26_s14, 4   ;;  %s5423_s30 = smov %s3607_s10 }
 0x56d   : > { %s5424_s10 = smov %s3611_s11  ;;  %s5425_s11 = smov %s3770_s26 }
 0x56e   : > { %s5426_s12 = smov %s3619_s13  ;;  %25 = sbr.rel (!%p23_p9) target bundleno = 10 (0xa), region = 105 }
 0x571   : > { %s5427_s13 = smov %s5422_s28 }
 0x573   :  { %2865 = vsyncpa [#allocation3], 1 }
 0x574   :  { %2867 = vsyncpa [#allocation3 + $0x1], 1 }
 0x575   :  { %2868 = vsyncpa [#allocation6], 1 }
 0x576   :  { %2869 = vsyncpa [#allocation4], 1 }
 0x577   :  { %2871 = vsyncpa [#allocation4 + $0x1], 1 }

</bundles_post_ra>
